<compile_context>
chip_gen: v7x
topology: tpu7x:2x2x1
jax: 0.10.0
libtpu: 0.0.40
codegen_flags: <defaults>
</compile_context>

<pallas_src>
import numpy as np
import jax
import jax.numpy as jnp
from jax.experimental import pallas as pl
from jax.experimental.pallas import tpu as pltpu


# ----------------------------------------------------------------------------
# Fused forward kernel (single pallas_call, everything VMEM-resident)
# ----------------------------------------------------------------------------
def fused_forward_kernel(x_ref, w1_ref, b1_ref,
                         wc2_ref, g2_ref, b2_ref,
                         wc3_ref, g3_ref, b3_ref,
                         wc4_ref, g4_ref, b4_ref,
                         wfc_ref, bfc_ref, wh_ref, bh_ref,
                         out_ref, flat_ref):
    f32 = jnp.float32

    def dotf(a, b):
        return jnp.dot(a, b, preferred_element_type=f32)

    # conv1 (1x1 / stride 1 / pad 0): per-pixel channel matmul.
    # Activations live as (spatial, N*C): rows = h*W + w, lanes = n*32 + c,
    # batch handled by block-diagonal weights.
    h = jnp.maximum(dotf(x_ref[...], w1_ref[...]) + b1_ref[...], 0.0)   # (256, 64)

    # conv2..conv4 (3x3, stride 2, pad 2):
    #   xw  = h_bf16 @ Wcat      (one wide matmul; 9 tap slabs, 128-lane aligned)
    #   out = relu( sum_t  G_t @ xw[:, tap-t slab]  + b )
    for wc_ref, g_ref, b_ref in ((wc2_ref, g2_ref, b2_ref),
                                 (wc3_ref, g3_ref, b3_ref),
                                 (wc4_ref, g4_ref, b4_ref)):
        hb = h.astype(jnp.bfloat16)
        xw = dotf(hb, wc_ref[...]).astype(jnp.bfloat16)          # (S_in, 9*128)
        acc = None
        for t in range(9):                                       # unrolled taps
            term = dotf(g_ref[t], xw[:, t * 128:t * 128 + 64])   # (S_out, 64) f32
            acc = term if acc is None else acc + term
        h = jnp.maximum(acc + b_ref[...], 0.0)                   # (S_out, 64)

    # Flatten (NCHW semantics, FC rows pre-permuted at pack time) ->
    # 32 static-slice copies into a (N, 512) VMEM scratch, then ONE matmul.
    n_batch = flat_ref.shape[0]
    s4 = h.shape[0]                                              # 16 spatial slots
    c4 = 32
    for n in range(n_batch):
        for s in range(s4):
            flat_ref[pl.ds(n, 1), pl.ds(s * c4, c4)] = h[s:s + 1, n * c4:(n + 1) * c4]

    # Linear(512 -> 80) + ReLU, fused policy/value head (80 -> 8).
    hid = jnp.maximum(dotf(flat_ref[...], wfc_ref[...]) + bfc_ref[...], 0.0)   # (N, 80)
    logits = dotf(hid, wh_ref[...]) + bh_ref[...]                              # (N, 8)

    pol = logits[:, 0:7]
    m = jnp.max(pol, axis=-1, keepdims=True)
    e = jnp.exp(pol - m)
    probs = e / jnp.sum(e, axis=-1, keepdims=True)               # exact softmax

    out_ref[:, 0:7] = probs
    out_ref[:, 7:8] = logits[:, 7:8]


_VMEM = pl.BlockSpec(memory_space=pltpu.MemorySpace.VMEM)


def fused_forward(x_flat, kp, batch):
    return pl.pallas_call(
        fused_forward_kernel,
        out_shape=jax.ShapeDtypeStruct((batch, 8), jnp.float32),
        in_specs=[_VMEM] * 16,
        out_specs=_VMEM,
        scratch_shapes=[pltpu.VMEM((batch, 512), jnp.float32)],
        compiler_params=pltpu.CompilerParams(vmem_limit_bytes=32 * 1024 * 1024),
        cost_estimate=pl.CostEstimate(flops=84_000_000, transcendentals=16,
                                      bytes_accessed=1_200_000),
    )(x_flat, kp["w1"], kp["b1"],
      kp["wc2"], kp["g2"], kp["b2"],
      kp["wc3"], kp["g3"], kp["b3"],
      kp["wc4"], kp["g4"], kp["b4"],
      kp["wfc"], kp["bfc"], kp["wh"], kp["bh"])


@jax.jit
def network_forward(x, kp):
    n, c, h, w = x.shape
    # NCHW -> (H*W, N*Cin) once (rows = spatial, lanes = n*Cin + ci).
    x_flat = jnp.transpose(x, (2, 3, 0, 1)).reshape(h * w, n * c)
    out = fused_forward(x_flat, kp, n)
    return out[:, :7], out[:, 7:8]


# ----------------------------------------------------------------------------
# Parameter construction + one-time packing into kernel-ready tensors
# ----------------------------------------------------------------------------
def init_params():
    key = jax.random.PRNGKey(42)

    def uni(k, shape, fan_in):
        bound = 1.0 / float(np.sqrt(fan_in))
        return jax.random.uniform(k, shape, jnp.float32, -bound, bound)

    ks = jax.random.split(key, 14)
    p = {}
    p["conv1_w"] = uni(ks[0], (32, 4, 1, 1), 4)
    p["conv1_b"] = uni(ks[1], (32,), 4)
    p["conv2_w"] = uni(ks[2], (32, 32, 3, 3), 32 * 9)
    p["conv2_b"] = uni(ks[3], (32,), 32 * 9)
    p["conv3_w"] = uni(ks[4], (32, 32, 3, 3), 32 * 9)
    p["conv3_b"] = uni(ks[5], (32,), 32 * 9)
    p["conv4_w"] = uni(ks[6], (32, 32, 3, 3), 32 * 9)
    p["conv4_b"] = uni(ks[7], (32,), 32 * 9)
    flat = 32 * 4 * 4  # 512, implied by Lazy* layers with input (2, 4, 16, 16)
    p["out_w"] = uni(ks[8], (flat, 80), flat)    # stored (in, out)
    p["out_b"] = uni(ks[9], (80,), flat)
    p["pol_w"] = uni(ks[10], (80, 7), 80)
    p["pol_b"] = uni(ks[11], (7,), 80)
    p["val_w"] = uni(ks[12], (80, 1), 80)
    p["val_b"] = uni(ks[13], (1,), 80)
    return p


def pack_params(p, n, cin, h, w):
    """Pack torch-layout params into kernel-ready tensors (done once)."""
    kp = {}
    C = 32

    # conv1 (1x1): block-diagonal-over-batch channel matmul weight.
    w1 = np.asarray(p["conv1_w"]).reshape(C, cin)               # (co, ci)
    w1_blk = np.zeros((n * cin, n * C), np.float32)
    for b in range(n):
        w1_blk[b * cin:(b + 1) * cin, b * C:(b + 1) * C] = w1.T
    kp["w1"] = jnp.asarray(w1_blk)
    kp["b1"] = jnp.asarray(np.tile(np.asarray(p["conv1_b"]).reshape(1, C), (1, n)))

    def pack_conv(wname, bname, hin, win):
        wt = np.asarray(p[wname])                               # (Cout, Cin, 3, 3)
        cout, cin_l = wt.shape[0], wt.shape[1]
        hout = (hin + 4 - 3) // 2 + 1
        wout = (win + 4 - 3) // 2 + 1
        # Wcat: (N*Cin, 9*128) bf16, tap t's block-diag weights at lanes
        # [t*128, t*128+64), padded to a 128-lane slab so kernel slices are
        # vreg-aligned (free).
        wcat = np.zeros((n * cin_l, 9 * 128), np.float32)
        for t in range(9):
            i, j = t // 3, t % 3
            w_t = wt[:, :, i, j].T                              # (ci, co)
            for b in range(n):
                wcat[b * cin_l:(b + 1) * cin_l,
                     t * 128 + b * cout:t * 128 + (b + 1) * cout] = w_t
        # Batch-independent 0/1 spatial gathers, one per tap (bf16 = exact).
        g = np.zeros((9, hout * wout, hin * win), np.float32)
        for t in range(9):
            i, j = t // 3, t % 3
            for ho in range(hout):
                hi = 2 * ho + i - 2
                if not 0 <= hi < hin:
                    continue
                for wo in range(wout):
                    wi = 2 * wo + j - 2
                    if not 0 <= wi < win:
                        continue
                    g[t, ho * wout + wo, hi * win + wi] = 1.0
        bias = np.tile(np.asarray(p[bname]).reshape(1, cout), (1, n))
        return (jnp.asarray(wcat, jnp.bfloat16),
                jnp.asarray(g, jnp.bfloat16),
                jnp.asarray(bias, jnp.float32), hout, wout)

    kp["wc2"], kp["g2"], kp["b2"], h2, w2 = pack_conv("conv2_w", "conv2_b", h, w)
    kp["wc3"], kp["g3"], kp["b3"], h3, w3 = pack_conv("conv3_w", "conv3_b", h2, w2)
    kp["wc4"], kp["g4"], kp["b4"], h4, w4 = pack_conv("conv4_w", "conv4_b", h3, w3)

    # Linear(512 -> 80): permute rows from torch NCHW-flatten order (c*S4 + s)
    # to the kernel's flat order (s*C + c) so the flatten is a contiguous copy.
    s4 = h4 * w4                                               # 16
    out_w = np.asarray(p["out_w"])                             # (512, 80)
    assert out_w.shape[0] == s4 * C
    idx = np.arange(s4 * C)
    s_idx, c_idx = idx // C, idx % C
    kp["wfc"] = jnp.asarray(out_w[c_idx * s4 + s_idx, :], jnp.float32)
    kp["bfc"] = jnp.asarray(np.asarray(p["out_b"]).reshape(1, -1))

    # Fused policy/value head: single (80, 8) weight, cols 0..6 policy, 7 value.
    kp["wh"] = jnp.asarray(np.concatenate(
        [np.asarray(p["pol_w"]), np.asarray(p["val_w"])], axis=1))
    kp["bh"] = jnp.asarray(np.concatenate(
        [np.asarray(p["pol_b"]), np.asarray(p["val_b"])]).reshape(1, -1))
    return kp


# ----------------------------------------------------------------------------
# Pure-JAX reference (numerical cross-check)
# ----------------------------------------------------------------------------
def reference_forward(x, p):
    def conv(x, w, b, stride, pad):
        y = jax.lax.conv_general_dilated(
            x, w, window_strides=(stride, stride),
            padding=[(pad, pad), (pad, pad)],
            dimension_numbers=("NCHW", "OIHW", "NCHW"))
        return jax.nn.relu(y + b.reshape(1, -1, 1, 1))

    x = conv(x, p["conv1_w"], p["conv1_b"], 1, 0)
    x = conv(x, p["conv2_w"], p["conv2_b"], 2, 2)
    x = conv(x, p["conv3_w"], p["conv3_b"], 2, 2)
    x = conv(x, p["conv4_w"], p["conv4_b"], 2, 2)
    flat = x.reshape(x.shape[0], -1)
    hid = jax.nn.relu(flat @ p["out_w"] + p["out_b"])
    pol = jax.nn.softmax(hid @ p["pol_w"] + p["pol_b"], axis=-1)
    val = hid @ p["val_w"] + p["val_b"]
    return pol, val


if __name__ == "__main__":
    x = jax.random.normal(jax.random.PRNGKey(0), (2, 4, 16, 16), jnp.float32)
    raw = init_params()
    kp = pack_params(raw, *x.shape)

    policy, value = network_forward(x, kp)
    jax.block_until_ready((policy, value))

    assert policy.shape == (2, 7) and value.shape == (2, 1)
    assert jnp.allclose(jnp.sum(policy, axis=-1), 1.0, atol=1e-3)

    pol_ref, val_ref = reference_forward(x, raw)
    assert jnp.allclose(policy, pol_ref, atol=5e-2, rtol=5e-2)
    assert jnp.allclose(value, val_ref, atol=5e-2, rtol=5e-2)

    print("KERNEL_OK")
</pallas_src>

<mosaic_0001>
module attributes {stable_mosaic.version = 11 : i64} {
  func.func @fused_forward_kernel(%arg0: memref<256x8xf32, #tpu.memory_space<vmem>>, %arg1: memref<8x64xf32, #tpu.memory_space<vmem>>, %arg2: memref<1x64xf32, #tpu.memory_space<vmem>>, %arg3: memref<64x1152xbf16, #tpu.memory_space<vmem>>, %arg4: memref<9x81x256xbf16, #tpu.memory_space<vmem>>, %arg5: memref<1x64xf32, #tpu.memory_space<vmem>>, %arg6: memref<64x1152xbf16, #tpu.memory_space<vmem>>, %arg7: memref<9x36x81xbf16, #tpu.memory_space<vmem>>, %arg8: memref<1x64xf32, #tpu.memory_space<vmem>>, %arg9: memref<64x1152xbf16, #tpu.memory_space<vmem>>, %arg10: memref<9x16x36xbf16, #tpu.memory_space<vmem>>, %arg11: memref<1x64xf32, #tpu.memory_space<vmem>>, %arg12: memref<512x80xf32, #tpu.memory_space<vmem>>, %arg13: memref<1x80xf32, #tpu.memory_space<vmem>>, %arg14: memref<80x8xf32, #tpu.memory_space<vmem>>, %arg15: memref<1x8xf32, #tpu.memory_space<vmem>>, %arg16: memref<2x8xf32, #tpu.memory_space<vmem>>, %arg17: memref<2x512xf32, #tpu.memory_space<vmem>>) attributes {dimension_semantics = [], scalar_prefetch = 0 : i64, scratch_operands = 1 : i64, tpu.core_type = #tpu.core_type<tc>} {
    %c0 = arith.constant 0 : index
    %c0_0 = arith.constant 0 : index
    %0 = vector.load %arg0[%c0, %c0_0] : memref<256x8xf32, #tpu.memory_space<vmem>>, vector<256x8xf32>
    %c0_1 = arith.constant 0 : index
    %c0_2 = arith.constant 0 : index
    %1 = vector.load %arg1[%c0_1, %c0_2] : memref<8x64xf32, #tpu.memory_space<vmem>>, vector<8x64xf32>
    %cst = arith.constant dense<0.000000e+00> : vector<256x64xf32>
    %2 = tpu.matmul %0, %1, %cst {dimension_numbers = #tpu.dot_dimension_numbers<[1], [0], [0], [1], [0, 0, 1, 1], [], []>} : vector<256x8xf32>, vector<8x64xf32>, vector<256x64xf32> -> vector<256x64xf32>
    %c0_3 = arith.constant 0 : index
    %c0_4 = arith.constant 0 : index
    %3 = vector.load %arg2[%c0_3, %c0_4] : memref<1x64xf32, #tpu.memory_space<vmem>>, vector<1x64xf32>
    %4 = vector.broadcast %3 : vector<1x64xf32> to vector<256x64xf32>
    %5 = arith.addf %2, %4 : vector<256x64xf32>
    %cst_5 = arith.constant 0.000000e+00 : f32
    %6 = vector.broadcast %cst_5 : f32 to vector<256x64xf32>
    %7 = arith.maximumf %5, %6 : vector<256x64xf32>
    %8 = arith.truncf %7 : vector<256x64xf32> to vector<256x64xbf16>
    %c0_6 = arith.constant 0 : index
    %c0_7 = arith.constant 0 : index
    %9 = vector.load %arg3[%c0_6, %c0_7] : memref<64x1152xbf16, #tpu.memory_space<vmem>>, vector<64x1152xbf16>
    %cst_8 = arith.constant dense<0.000000e+00> : vector<256x1152xf32>
    %10 = tpu.matmul %8, %9, %cst_8 {dimension_numbers = #tpu.dot_dimension_numbers<[1], [0], [0], [1], [0, 0, 1, 1], [], []>} : vector<256x64xbf16>, vector<64x1152xbf16>, vector<256x1152xf32> -> vector<256x1152xf32>
    %11 = arith.truncf %10 : vector<256x1152xf32> to vector<256x1152xbf16>
    %c0_9 = arith.constant 0 : index
    %c0_10 = arith.constant 0 : index
    %c0_11 = arith.constant 0 : index
    %12 = vector.load %arg4[%c0_9, %c0_10, %c0_11] : memref<9x81x256xbf16, #tpu.memory_space<vmem>>, vector<1x81x256xbf16>
    %13 = vector.shape_cast %12 : vector<1x81x256xbf16> to vector<81x256xbf16>
    %14 = vector.extract_strided_slice %11 {offsets = [0, 0], sizes = [256, 64], strides = [1, 1]} : vector<256x1152xbf16> to vector<256x64xbf16>
    %cst_12 = arith.constant dense<0.000000e+00> : vector<81x64xf32>
    %15 = tpu.matmul %13, %14, %cst_12 {dimension_numbers = #tpu.dot_dimension_numbers<[1], [0], [0], [1], [0, 0, 1, 1], [], []>} : vector<81x256xbf16>, vector<256x64xbf16>, vector<81x64xf32> -> vector<81x64xf32>
    %c1 = arith.constant 1 : index
    %c0_13 = arith.constant 0 : index
    %c0_14 = arith.constant 0 : index
    %16 = vector.load %arg4[%c1, %c0_13, %c0_14] : memref<9x81x256xbf16, #tpu.memory_space<vmem>>, vector<1x81x256xbf16>
    %17 = vector.shape_cast %16 : vector<1x81x256xbf16> to vector<81x256xbf16>
    %18 = vector.extract_strided_slice %11 {offsets = [0, 128], sizes = [256, 64], strides = [1, 1]} : vector<256x1152xbf16> to vector<256x64xbf16>
    %cst_15 = arith.constant dense<0.000000e+00> : vector<81x64xf32>
    %19 = tpu.matmul %17, %18, %cst_15 {dimension_numbers = #tpu.dot_dimension_numbers<[1], [0], [0], [1], [0, 0, 1, 1], [], []>} : vector<81x256xbf16>, vector<256x64xbf16>, vector<81x64xf32> -> vector<81x64xf32>
    %20 = arith.addf %15, %19 : vector<81x64xf32>
    %c2 = arith.constant 2 : index
    %c0_16 = arith.constant 0 : index
    %c0_17 = arith.constant 0 : index
    %21 = vector.load %arg4[%c2, %c0_16, %c0_17] : memref<9x81x256xbf16, #tpu.memory_space<vmem>>, vector<1x81x256xbf16>
    %22 = vector.shape_cast %21 : vector<1x81x256xbf16> to vector<81x256xbf16>
    %23 = vector.extract_strided_slice %11 {offsets = [0, 256], sizes = [256, 64], strides = [1, 1]} : vector<256x1152xbf16> to vector<256x64xbf16>
    %cst_18 = arith.constant dense<0.000000e+00> : vector<81x64xf32>
    %24 = tpu.matmul %22, %23, %cst_18 {dimension_numbers = #tpu.dot_dimension_numbers<[1], [0], [0], [1], [0, 0, 1, 1], [], []>} : vector<81x256xbf16>, vector<256x64xbf16>, vector<81x64xf32> -> vector<81x64xf32>
    %25 = arith.addf %20, %24 : vector<81x64xf32>
    %c3 = arith.constant 3 : index
    %c0_19 = arith.constant 0 : index
    %c0_20 = arith.constant 0 : index
    %26 = vector.load %arg4[%c3, %c0_19, %c0_20] : memref<9x81x256xbf16, #tpu.memory_space<vmem>>, vector<1x81x256xbf16>
    %27 = vector.shape_cast %26 : vector<1x81x256xbf16> to vector<81x256xbf16>
    %28 = vector.extract_strided_slice %11 {offsets = [0, 384], sizes = [256, 64], strides = [1, 1]} : vector<256x1152xbf16> to vector<256x64xbf16>
    %cst_21 = arith.constant dense<0.000000e+00> : vector<81x64xf32>
    %29 = tpu.matmul %27, %28, %cst_21 {dimension_numbers = #tpu.dot_dimension_numbers<[1], [0], [0], [1], [0, 0, 1, 1], [], []>} : vector<81x256xbf16>, vector<256x64xbf16>, vector<81x64xf32> -> vector<81x64xf32>
    %30 = arith.addf %25, %29 : vector<81x64xf32>
    %c4 = arith.constant 4 : index
    %c0_22 = arith.constant 0 : index
    %c0_23 = arith.constant 0 : index
    %31 = vector.load %arg4[%c4, %c0_22, %c0_23] : memref<9x81x256xbf16, #tpu.memory_space<vmem>>, vector<1x81x256xbf16>
    %32 = vector.shape_cast %31 : vector<1x81x256xbf16> to vector<81x256xbf16>
    %33 = vector.extract_strided_slice %11 {offsets = [0, 512], sizes = [256, 64], strides = [1, 1]} : vector<256x1152xbf16> to vector<256x64xbf16>
    %cst_24 = arith.constant dense<0.000000e+00> : vector<81x64xf32>
    %34 = tpu.matmul %32, %33, %cst_24 {dimension_numbers = #tpu.dot_dimension_numbers<[1], [0], [0], [1], [0, 0, 1, 1], [], []>} : vector<81x256xbf16>, vector<256x64xbf16>, vector<81x64xf32> -> vector<81x64xf32>
    %35 = arith.addf %30, %34 : vector<81x64xf32>
    %c5 = arith.constant 5 : index
    %c0_25 = arith.constant 0 : index
    %c0_26 = arith.constant 0 : index
    %36 = vector.load %arg4[%c5, %c0_25, %c0_26] : memref<9x81x256xbf16, #tpu.memory_space<vmem>>, vector<1x81x256xbf16>
    %37 = vector.shape_cast %36 : vector<1x81x256xbf16> to vector<81x256xbf16>
    %38 = vector.extract_strided_slice %11 {offsets = [0, 640], sizes = [256, 64], strides = [1, 1]} : vector<256x1152xbf16> to vector<256x64xbf16>
    %cst_27 = arith.constant dense<0.000000e+00> : vector<81x64xf32>
    %39 = tpu.matmul %37, %38, %cst_27 {dimension_numbers = #tpu.dot_dimension_numbers<[1], [0], [0], [1], [0, 0, 1, 1], [], []>} : vector<81x256xbf16>, vector<256x64xbf16>, vector<81x64xf32> -> vector<81x64xf32>
    %40 = arith.addf %35, %39 : vector<81x64xf32>
    %c6 = arith.constant 6 : index
    %c0_28 = arith.constant 0 : index
    %c0_29 = arith.constant 0 : index
    %41 = vector.load %arg4[%c6, %c0_28, %c0_29] : memref<9x81x256xbf16, #tpu.memory_space<vmem>>, vector<1x81x256xbf16>
    %42 = vector.shape_cast %41 : vector<1x81x256xbf16> to vector<81x256xbf16>
    %43 = vector.extract_strided_slice %11 {offsets = [0, 768], sizes = [256, 64], strides = [1, 1]} : vector<256x1152xbf16> to vector<256x64xbf16>
    %cst_30 = arith.constant dense<0.000000e+00> : vector<81x64xf32>
    %44 = tpu.matmul %42, %43, %cst_30 {dimension_numbers = #tpu.dot_dimension_numbers<[1], [0], [0], [1], [0, 0, 1, 1], [], []>} : vector<81x256xbf16>, vector<256x64xbf16>, vector<81x64xf32> -> vector<81x64xf32>
    %45 = arith.addf %40, %44 : vector<81x64xf32>
    %c7 = arith.constant 7 : index
    %c0_31 = arith.constant 0 : index
    %c0_32 = arith.constant 0 : index
    %46 = vector.load %arg4[%c7, %c0_31, %c0_32] : memref<9x81x256xbf16, #tpu.memory_space<vmem>>, vector<1x81x256xbf16>
    %47 = vector.shape_cast %46 : vector<1x81x256xbf16> to vector<81x256xbf16>
    %48 = vector.extract_strided_slice %11 {offsets = [0, 896], sizes = [256, 64], strides = [1, 1]} : vector<256x1152xbf16> to vector<256x64xbf16>
    %cst_33 = arith.constant dense<0.000000e+00> : vector<81x64xf32>
    %49 = tpu.matmul %47, %48, %cst_33 {dimension_numbers = #tpu.dot_dimension_numbers<[1], [0], [0], [1], [0, 0, 1, 1], [], []>} : vector<81x256xbf16>, vector<256x64xbf16>, vector<81x64xf32> -> vector<81x64xf32>
    %50 = arith.addf %45, %49 : vector<81x64xf32>
    %c8 = arith.constant 8 : index
    %c0_34 = arith.constant 0 : index
    %c0_35 = arith.constant 0 : index
    %51 = vector.load %arg4[%c8, %c0_34, %c0_35] : memref<9x81x256xbf16, #tpu.memory_space<vmem>>, vector<1x81x256xbf16>
    %52 = vector.shape_cast %51 : vector<1x81x256xbf16> to vector<81x256xbf16>
    %53 = vector.extract_strided_slice %11 {offsets = [0, 1024], sizes = [256, 64], strides = [1, 1]} : vector<256x1152xbf16> to vector<256x64xbf16>
    %cst_36 = arith.constant dense<0.000000e+00> : vector<81x64xf32>
    %54 = tpu.matmul %52, %53, %cst_36 {dimension_numbers = #tpu.dot_dimension_numbers<[1], [0], [0], [1], [0, 0, 1, 1], [], []>} : vector<81x256xbf16>, vector<256x64xbf16>, vector<81x64xf32> -> vector<81x64xf32>
    %55 = arith.addf %50, %54 : vector<81x64xf32>
    %c0_37 = arith.constant 0 : index
    %c0_38 = arith.constant 0 : index
    %56 = vector.load %arg5[%c0_37, %c0_38] : memref<1x64xf32, #tpu.memory_space<vmem>>, vector<1x64xf32>
    %57 = vector.broadcast %56 : vector<1x64xf32> to vector<81x64xf32>
    %58 = arith.addf %55, %57 : vector<81x64xf32>
    %cst_39 = arith.constant 0.000000e+00 : f32
    %59 = vector.broadcast %cst_39 : f32 to vector<81x64xf32>
    %60 = arith.maximumf %58, %59 : vector<81x64xf32>
    %61 = arith.truncf %60 : vector<81x64xf32> to vector<81x64xbf16>
    %c0_40 = arith.constant 0 : index
    %c0_41 = arith.constant 0 : index
    %62 = vector.load %arg6[%c0_40, %c0_41] : memref<64x1152xbf16, #tpu.memory_space<vmem>>, vector<64x1152xbf16>
    %cst_42 = arith.constant dense<0.000000e+00> : vector<81x1152xf32>
    %63 = tpu.matmul %61, %62, %cst_42 {dimension_numbers = #tpu.dot_dimension_numbers<[1], [0], [0], [1], [0, 0, 1, 1], [], []>} : vector<81x64xbf16>, vector<64x1152xbf16>, vector<81x1152xf32> -> vector<81x1152xf32>
    %64 = arith.truncf %63 : vector<81x1152xf32> to vector<81x1152xbf16>
    %c0_43 = arith.constant 0 : index
    %c0_44 = arith.constant 0 : index
    %c0_45 = arith.constant 0 : index
    %65 = vector.load %arg7[%c0_43, %c0_44, %c0_45] : memref<9x36x81xbf16, #tpu.memory_space<vmem>>, vector<1x36x81xbf16>
    %66 = vector.shape_cast %65 : vector<1x36x81xbf16> to vector<36x81xbf16>
    %67 = vector.extract_strided_slice %64 {offsets = [0, 0], sizes = [81, 64], strides = [1, 1]} : vector<81x1152xbf16> to vector<81x64xbf16>
    %cst_46 = arith.constant dense<0.000000e+00> : vector<36x64xf32>
    %68 = tpu.matmul %66, %67, %cst_46 {dimension_numbers = #tpu.dot_dimension_numbers<[1], [0], [0], [1], [0, 0, 1, 1], [], []>} : vector<36x81xbf16>, vector<81x64xbf16>, vector<36x64xf32> -> vector<36x64xf32>
    %c1_47 = arith.constant 1 : index
    %c0_48 = arith.constant 0 : index
    %c0_49 = arith.constant 0 : index
    %69 = vector.load %arg7[%c1_47, %c0_48, %c0_49] : memref<9x36x81xbf16, #tpu.memory_space<vmem>>, vector<1x36x81xbf16>
    %70 = vector.shape_cast %69 : vector<1x36x81xbf16> to vector<36x81xbf16>
    %71 = vector.extract_strided_slice %64 {offsets = [0, 128], sizes = [81, 64], strides = [1, 1]} : vector<81x1152xbf16> to vector<81x64xbf16>
    %cst_50 = arith.constant dense<0.000000e+00> : vector<36x64xf32>
    %72 = tpu.matmul %70, %71, %cst_50 {dimension_numbers = #tpu.dot_dimension_numbers<[1], [0], [0], [1], [0, 0, 1, 1], [], []>} : vector<36x81xbf16>, vector<81x64xbf16>, vector<36x64xf32> -> vector<36x64xf32>
    %73 = arith.addf %68, %72 : vector<36x64xf32>
    %c2_51 = arith.constant 2 : index
    %c0_52 = arith.constant 0 : index
    %c0_53 = arith.constant 0 : index
    %74 = vector.load %arg7[%c2_51, %c0_52, %c0_53] : memref<9x36x81xbf16, #tpu.memory_space<vmem>>, vector<1x36x81xbf16>
    %75 = vector.shape_cast %74 : vector<1x36x81xbf16> to vector<36x81xbf16>
    %76 = vector.extract_strided_slice %64 {offsets = [0, 256], sizes = [81, 64], strides = [1, 1]} : vector<81x1152xbf16> to vector<81x64xbf16>
    %cst_54 = arith.constant dense<0.000000e+00> : vector<36x64xf32>
    %77 = tpu.matmul %75, %76, %cst_54 {dimension_numbers = #tpu.dot_dimension_numbers<[1], [0], [0], [1], [0, 0, 1, 1], [], []>} : vector<36x81xbf16>, vector<81x64xbf16>, vector<36x64xf32> -> vector<36x64xf32>
    %78 = arith.addf %73, %77 : vector<36x64xf32>
    %c3_55 = arith.constant 3 : index
    %c0_56 = arith.constant 0 : index
    %c0_57 = arith.constant 0 : index
    %79 = vector.load %arg7[%c3_55, %c0_56, %c0_57] : memref<9x36x81xbf16, #tpu.memory_space<vmem>>, vector<1x36x81xbf16>
    %80 = vector.shape_cast %79 : vector<1x36x81xbf16> to vector<36x81xbf16>
    %81 = vector.extract_strided_slice %64 {offsets = [0, 384], sizes = [81, 64], strides = [1, 1]} : vector<81x1152xbf16> to vector<81x64xbf16>
    %cst_58 = arith.constant dense<0.000000e+00> : vector<36x64xf32>
    %82 = tpu.matmul %80, %81, %cst_58 {dimension_numbers = #tpu.dot_dimension_numbers<[1], [0], [0], [1], [0, 0, 1, 1], [], []>} : vector<36x81xbf16>, vector<81x64xbf16>, vector<36x64xf32> -> vector<36x64xf32>
    %83 = arith.addf %78, %82 : vector<36x64xf32>
    %c4_59 = arith.constant 4 : index
    %c0_60 = arith.constant 0 : index
    %c0_61 = arith.constant 0 : index
    %84 = vector.load %arg7[%c4_59, %c0_60, %c0_61] : memref<9x36x81xbf16, #tpu.memory_space<vmem>>, vector<1x36x81xbf16>
    %85 = vector.shape_cast %84 : vector<1x36x81xbf16> to vector<36x81xbf16>
    %86 = vector.extract_strided_slice %64 {offsets = [0, 512], sizes = [81, 64], strides = [1, 1]} : vector<81x1152xbf16> to vector<81x64xbf16>
    %cst_62 = arith.constant dense<0.000000e+00> : vector<36x64xf32>
    %87 = tpu.matmul %85, %86, %cst_62 {dimension_numbers = #tpu.dot_dimension_numbers<[1], [0], [0], [1], [0, 0, 1, 1], [], []>} : vector<36x81xbf16>, vector<81x64xbf16>, vector<36x64xf32> -> vector<36x64xf32>
    %88 = arith.addf %83, %87 : vector<36x64xf32>
    %c5_63 = arith.constant 5 : index
    %c0_64 = arith.constant 0 : index
    %c0_65 = arith.constant 0 : index
    %89 = vector.load %arg7[%c5_63, %c0_64, %c0_65] : memref<9x36x81xbf16, #tpu.memory_space<vmem>>, vector<1x36x81xbf16>
    %90 = vector.shape_cast %89 : vector<1x36x81xbf16> to vector<36x81xbf16>
    %91 = vector.extract_strided_slice %64 {offsets = [0, 640], sizes = [81, 64], strides = [1, 1]} : vector<81x1152xbf16> to vector<81x64xbf16>
    %cst_66 = arith.constant dense<0.000000e+00> : vector<36x64xf32>
    %92 = tpu.matmul %90, %91, %cst_66 {dimension_numbers = #tpu.dot_dimension_numbers<[1], [0], [0], [1], [0, 0, 1, 1], [], []>} : vector<36x81xbf16>, vector<81x64xbf16>, vector<36x64xf32> -> vector<36x64xf32>
    %93 = arith.addf %88, %92 : vector<36x64xf32>
    %c6_67 = arith.constant 6 : index
    %c0_68 = arith.constant 0 : index
    %c0_69 = arith.constant 0 : index
    %94 = vector.load %arg7[%c6_67, %c0_68, %c0_69] : memref<9x36x81xbf16, #tpu.memory_space<vmem>>, vector<1x36x81xbf16>
    %95 = vector.shape_cast %94 : vector<1x36x81xbf16> to vector<36x81xbf16>
    %96 = vector.extract_strided_slice %64 {offsets = [0, 768], sizes = [81, 64], strides = [1, 1]} : vector<81x1152xbf16> to vector<81x64xbf16>
    %cst_70 = arith.constant dense<0.000000e+00> : vector<36x64xf32>
    %97 = tpu.matmul %95, %96, %cst_70 {dimension_numbers = #tpu.dot_dimension_numbers<[1], [0], [0], [1], [0, 0, 1, 1], [], []>} : vector<36x81xbf16>, vector<81x64xbf16>, vector<36x64xf32> -> vector<36x64xf32>
    %98 = arith.addf %93, %97 : vector<36x64xf32>
    %c7_71 = arith.constant 7 : index
    %c0_72 = arith.constant 0 : index
    %c0_73 = arith.constant 0 : index
    %99 = vector.load %arg7[%c7_71, %c0_72, %c0_73] : memref<9x36x81xbf16, #tpu.memory_space<vmem>>, vector<1x36x81xbf16>
    %100 = vector.shape_cast %99 : vector<1x36x81xbf16> to vector<36x81xbf16>
    %101 = vector.extract_strided_slice %64 {offsets = [0, 896], sizes = [81, 64], strides = [1, 1]} : vector<81x1152xbf16> to vector<81x64xbf16>
    %cst_74 = arith.constant dense<0.000000e+00> : vector<36x64xf32>
    %102 = tpu.matmul %100, %101, %cst_74 {dimension_numbers = #tpu.dot_dimension_numbers<[1], [0], [0], [1], [0, 0, 1, 1], [], []>} : vector<36x81xbf16>, vector<81x64xbf16>, vector<36x64xf32> -> vector<36x64xf32>
    %103 = arith.addf %98, %102 : vector<36x64xf32>
    %c8_75 = arith.constant 8 : index
    %c0_76 = arith.constant 0 : index
    %c0_77 = arith.constant 0 : index
    %104 = vector.load %arg7[%c8_75, %c0_76, %c0_77] : memref<9x36x81xbf16, #tpu.memory_space<vmem>>, vector<1x36x81xbf16>
    %105 = vector.shape_cast %104 : vector<1x36x81xbf16> to vector<36x81xbf16>
    %106 = vector.extract_strided_slice %64 {offsets = [0, 1024], sizes = [81, 64], strides = [1, 1]} : vector<81x1152xbf16> to vector<81x64xbf16>
    %cst_78 = arith.constant dense<0.000000e+00> : vector<36x64xf32>
    %107 = tpu.matmul %105, %106, %cst_78 {dimension_numbers = #tpu.dot_dimension_numbers<[1], [0], [0], [1], [0, 0, 1, 1], [], []>} : vector<36x81xbf16>, vector<81x64xbf16>, vector<36x64xf32> -> vector<36x64xf32>
    %108 = arith.addf %103, %107 : vector<36x64xf32>
    %c0_79 = arith.constant 0 : index
    %c0_80 = arith.constant 0 : index
    %109 = vector.load %arg8[%c0_79, %c0_80] : memref<1x64xf32, #tpu.memory_space<vmem>>, vector<1x64xf32>
    %110 = vector.broadcast %109 : vector<1x64xf32> to vector<36x64xf32>
    %111 = arith.addf %108, %110 : vector<36x64xf32>
    %cst_81 = arith.constant 0.000000e+00 : f32
    %112 = vector.broadcast %cst_81 : f32 to vector<36x64xf32>
    %113 = arith.maximumf %111, %112 : vector<36x64xf32>
    %114 = arith.truncf %113 : vector<36x64xf32> to vector<36x64xbf16>
    %c0_82 = arith.constant 0 : index
    %c0_83 = arith.constant 0 : index
    %115 = vector.load %arg9[%c0_82, %c0_83] : memref<64x1152xbf16, #tpu.memory_space<vmem>>, vector<64x1152xbf16>
    %cst_84 = arith.constant dense<0.000000e+00> : vector<36x1152xf32>
    %116 = tpu.matmul %114, %115, %cst_84 {dimension_numbers = #tpu.dot_dimension_numbers<[1], [0], [0], [1], [0, 0, 1, 1], [], []>} : vector<36x64xbf16>, vector<64x1152xbf16>, vector<36x1152xf32> -> vector<36x1152xf32>
    %117 = arith.truncf %116 : vector<36x1152xf32> to vector<36x1152xbf16>
    %c0_85 = arith.constant 0 : index
    %c0_86 = arith.constant 0 : index
    %c0_87 = arith.constant 0 : index
    %118 = vector.load %arg10[%c0_85, %c0_86, %c0_87] : memref<9x16x36xbf16, #tpu.memory_space<vmem>>, vector<1x16x36xbf16>
    %119 = vector.shape_cast %118 : vector<1x16x36xbf16> to vector<16x36xbf16>
    %120 = vector.extract_strided_slice %117 {offsets = [0, 0], sizes = [36, 64], strides = [1, 1]} : vector<36x1152xbf16> to vector<36x64xbf16>
    %cst_88 = arith.constant dense<0.000000e+00> : vector<16x64xf32>
    %121 = tpu.matmul %119, %120, %cst_88 {dimension_numbers = #tpu.dot_dimension_numbers<[1], [0], [0], [1], [0, 0, 1, 1], [], []>} : vector<16x36xbf16>, vector<36x64xbf16>, vector<16x64xf32> -> vector<16x64xf32>
    %c1_89 = arith.constant 1 : index
    %c0_90 = arith.constant 0 : index
    %c0_91 = arith.constant 0 : index
    %122 = vector.load %arg10[%c1_89, %c0_90, %c0_91] : memref<9x16x36xbf16, #tpu.memory_space<vmem>>, vector<1x16x36xbf16>
    %123 = vector.shape_cast %122 : vector<1x16x36xbf16> to vector<16x36xbf16>
    %124 = vector.extract_strided_slice %117 {offsets = [0, 128], sizes = [36, 64], strides = [1, 1]} : vector<36x1152xbf16> to vector<36x64xbf16>
    %cst_92 = arith.constant dense<0.000000e+00> : vector<16x64xf32>
    %125 = tpu.matmul %123, %124, %cst_92 {dimension_numbers = #tpu.dot_dimension_numbers<[1], [0], [0], [1], [0, 0, 1, 1], [], []>} : vector<16x36xbf16>, vector<36x64xbf16>, vector<16x64xf32> -> vector<16x64xf32>
    %126 = arith.addf %121, %125 : vector<16x64xf32>
    %c2_93 = arith.constant 2 : index
    %c0_94 = arith.constant 0 : index
    %c0_95 = arith.constant 0 : index
    %127 = vector.load %arg10[%c2_93, %c0_94, %c0_95] : memref<9x16x36xbf16, #tpu.memory_space<vmem>>, vector<1x16x36xbf16>
    %128 = vector.shape_cast %127 : vector<1x16x36xbf16> to vector<16x36xbf16>
    %129 = vector.extract_strided_slice %117 {offsets = [0, 256], sizes = [36, 64], strides = [1, 1]} : vector<36x1152xbf16> to vector<36x64xbf16>
    %cst_96 = arith.constant dense<0.000000e+00> : vector<16x64xf32>
    %130 = tpu.matmul %128, %129, %cst_96 {dimension_numbers = #tpu.dot_dimension_numbers<[1], [0], [0], [1], [0, 0, 1, 1], [], []>} : vector<16x36xbf16>, vector<36x64xbf16>, vector<16x64xf32> -> vector<16x64xf32>
    %131 = arith.addf %126, %130 : vector<16x64xf32>
    %c3_97 = arith.constant 3 : index
    %c0_98 = arith.constant 0 : index
    %c0_99 = arith.constant 0 : index
    %132 = vector.load %arg10[%c3_97, %c0_98, %c0_99] : memref<9x16x36xbf16, #tpu.memory_space<vmem>>, vector<1x16x36xbf16>
    %133 = vector.shape_cast %132 : vector<1x16x36xbf16> to vector<16x36xbf16>
    %134 = vector.extract_strided_slice %117 {offsets = [0, 384], sizes = [36, 64], strides = [1, 1]} : vector<36x1152xbf16> to vector<36x64xbf16>
    %cst_100 = arith.constant dense<0.000000e+00> : vector<16x64xf32>
    %135 = tpu.matmul %133, %134, %cst_100 {dimension_numbers = #tpu.dot_dimension_numbers<[1], [0], [0], [1], [0, 0, 1, 1], [], []>} : vector<16x36xbf16>, vector<36x64xbf16>, vector<16x64xf32> -> vector<16x64xf32>
    %136 = arith.addf %131, %135 : vector<16x64xf32>
    %c4_101 = arith.constant 4 : index
    %c0_102 = arith.constant 0 : index
    %c0_103 = arith.constant 0 : index
    %137 = vector.load %arg10[%c4_101, %c0_102, %c0_103] : memref<9x16x36xbf16, #tpu.memory_space<vmem>>, vector<1x16x36xbf16>
    %138 = vector.shape_cast %137 : vector<1x16x36xbf16> to vector<16x36xbf16>
    %139 = vector.extract_strided_slice %117 {offsets = [0, 512], sizes = [36, 64], strides = [1, 1]} : vector<36x1152xbf16> to vector<36x64xbf16>
    %cst_104 = arith.constant dense<0.000000e+00> : vector<16x64xf32>
    %140 = tpu.matmul %138, %139, %cst_104 {dimension_numbers = #tpu.dot_dimension_numbers<[1], [0], [0], [1], [0, 0, 1, 1], [], []>} : vector<16x36xbf16>, vector<36x64xbf16>, vector<16x64xf32> -> vector<16x64xf32>
    %141 = arith.addf %136, %140 : vector<16x64xf32>
    %c5_105 = arith.constant 5 : index
    %c0_106 = arith.constant 0 : index
    %c0_107 = arith.constant 0 : index
    %142 = vector.load %arg10[%c5_105, %c0_106, %c0_107] : memref<9x16x36xbf16, #tpu.memory_space<vmem>>, vector<1x16x36xbf16>
    %143 = vector.shape_cast %142 : vector<1x16x36xbf16> to vector<16x36xbf16>
    %144 = vector.extract_strided_slice %117 {offsets = [0, 640], sizes = [36, 64], strides = [1, 1]} : vector<36x1152xbf16> to vector<36x64xbf16>
    %cst_108 = arith.constant dense<0.000000e+00> : vector<16x64xf32>
    %145 = tpu.matmul %143, %144, %cst_108 {dimension_numbers = #tpu.dot_dimension_numbers<[1], [0], [0], [1], [0, 0, 1, 1], [], []>} : vector<16x36xbf16>, vector<36x64xbf16>, vector<16x64xf32> -> vector<16x64xf32>
    %146 = arith.addf %141, %145 : vector<16x64xf32>
    %c6_109 = arith.constant 6 : index
    %c0_110 = arith.constant 0 : index
    %c0_111 = arith.constant 0 : index
    %147 = vector.load %arg10[%c6_109, %c0_110, %c0_111] : memref<9x16x36xbf16, #tpu.memory_space<vmem>>, vector<1x16x36xbf16>
    %148 = vector.shape_cast %147 : vector<1x16x36xbf16> to vector<16x36xbf16>
    %149 = vector.extract_strided_slice %117 {offsets = [0, 768], sizes = [36, 64], strides = [1, 1]} : vector<36x1152xbf16> to vector<36x64xbf16>
    %cst_112 = arith.constant dense<0.000000e+00> : vector<16x64xf32>
    %150 = tpu.matmul %148, %149, %cst_112 {dimension_numbers = #tpu.dot_dimension_numbers<[1], [0], [0], [1], [0, 0, 1, 1], [], []>} : vector<16x36xbf16>, vector<36x64xbf16>, vector<16x64xf32> -> vector<16x64xf32>
    %151 = arith.addf %146, %150 : vector<16x64xf32>
    %c7_113 = arith.constant 7 : index
    %c0_114 = arith.constant 0 : index
    %c0_115 = arith.constant 0 : index
    %152 = vector.load %arg10[%c7_113, %c0_114, %c0_115] : memref<9x16x36xbf16, #tpu.memory_space<vmem>>, vector<1x16x36xbf16>
    %153 = vector.shape_cast %152 : vector<1x16x36xbf16> to vector<16x36xbf16>
    %154 = vector.extract_strided_slice %117 {offsets = [0, 896], sizes = [36, 64], strides = [1, 1]} : vector<36x1152xbf16> to vector<36x64xbf16>
    %cst_116 = arith.constant dense<0.000000e+00> : vector<16x64xf32>
    %155 = tpu.matmul %153, %154, %cst_116 {dimension_numbers = #tpu.dot_dimension_numbers<[1], [0], [0], [1], [0, 0, 1, 1], [], []>} : vector<16x36xbf16>, vector<36x64xbf16>, vector<16x64xf32> -> vector<16x64xf32>
    %156 = arith.addf %151, %155 : vector<16x64xf32>
    %c8_117 = arith.constant 8 : index
    %c0_118 = arith.constant 0 : index
    %c0_119 = arith.constant 0 : index
    %157 = vector.load %arg10[%c8_117, %c0_118, %c0_119] : memref<9x16x36xbf16, #tpu.memory_space<vmem>>, vector<1x16x36xbf16>
    %158 = vector.shape_cast %157 : vector<1x16x36xbf16> to vector<16x36xbf16>
    %159 = vector.extract_strided_slice %117 {offsets = [0, 1024], sizes = [36, 64], strides = [1, 1]} : vector<36x1152xbf16> to vector<36x64xbf16>
    %cst_120 = arith.constant dense<0.000000e+00> : vector<16x64xf32>
    %160 = tpu.matmul %158, %159, %cst_120 {dimension_numbers = #tpu.dot_dimension_numbers<[1], [0], [0], [1], [0, 0, 1, 1], [], []>} : vector<16x36xbf16>, vector<36x64xbf16>, vector<16x64xf32> -> vector<16x64xf32>
    %161 = arith.addf %156, %160 : vector<16x64xf32>
    %c0_121 = arith.constant 0 : index
    %c0_122 = arith.constant 0 : index
    %162 = vector.load %arg11[%c0_121, %c0_122] : memref<1x64xf32, #tpu.memory_space<vmem>>, vector<1x64xf32>
    %163 = vector.broadcast %162 : vector<1x64xf32> to vector<16x64xf32>
    %164 = arith.addf %161, %163 : vector<16x64xf32>
    %cst_123 = arith.constant 0.000000e+00 : f32
    %165 = vector.broadcast %cst_123 : f32 to vector<16x64xf32>
    %166 = arith.maximumf %164, %165 : vector<16x64xf32>
    %167 = vector.extract_strided_slice %166 {offsets = [0, 0], sizes = [1, 32], strides = [1, 1]} : vector<16x64xf32> to vector<1x32xf32>
    %c0_124 = arith.constant 0 : index
    %c0_125 = arith.constant 0 : index
    %168 = vector.load %arg17[%c0_124, %c0_125] : memref<2x512xf32, #tpu.memory_space<vmem>>, vector<1x32xf32>
    tpu.vector_store %arg17[%c0_124, %c0_125], %167 {strides = array<i32>} : memref<2x512xf32, #tpu.memory_space<vmem>>, vector<1x32xf32>,
    %169 = vector.extract_strided_slice %166 {offsets = [1, 0], sizes = [1, 32], strides = [1, 1]} : vector<16x64xf32> to vector<1x32xf32>
    %c0_126 = arith.constant 0 : index
    %c32 = arith.constant 32 : index
    %170 = vector.load %arg17[%c0_126, %c32] : memref<2x512xf32, #tpu.memory_space<vmem>>, vector<1x32xf32>
    tpu.vector_store %arg17[%c0_126, %c32], %169 {strides = array<i32>} : memref<2x512xf32, #tpu.memory_space<vmem>>, vector<1x32xf32>,
    %171 = vector.extract_strided_slice %166 {offsets = [2, 0], sizes = [1, 32], strides = [1, 1]} : vector<16x64xf32> to vector<1x32xf32>
    %c0_127 = arith.constant 0 : index
    %c64 = arith.constant 64 : index
    %172 = vector.load %arg17[%c0_127, %c64] : memref<2x512xf32, #tpu.memory_space<vmem>>, vector<1x32xf32>
    tpu.vector_store %arg17[%c0_127, %c64], %171 {strides = array<i32>} : memref<2x512xf32, #tpu.memory_space<vmem>>, vector<1x32xf32>,
    %173 = vector.extract_strided_slice %166 {offsets = [3, 0], sizes = [1, 32], strides = [1, 1]} : vector<16x64xf32> to vector<1x32xf32>
    %c0_128 = arith.constant 0 : index
    %c96 = arith.constant 96 : index
    %174 = vector.load %arg17[%c0_128, %c96] : memref<2x512xf32, #tpu.memory_space<vmem>>, vector<1x32xf32>
    tpu.vector_store %arg17[%c0_128, %c96], %173 {strides = array<i32>} : memref<2x512xf32, #tpu.memory_space<vmem>>, vector<1x32xf32>,
    %175 = vector.extract_strided_slice %166 {offsets = [4, 0], sizes = [1, 32], strides = [1, 1]} : vector<16x64xf32> to vector<1x32xf32>
    %c0_129 = arith.constant 0 : index
    %c128 = arith.constant 128 : index
    %176 = vector.load %arg17[%c0_129, %c128] : memref<2x512xf32, #tpu.memory_space<vmem>>, vector<1x32xf32>
    tpu.vector_store %arg17[%c0_129, %c128], %175 {strides = array<i32>} : memref<2x512xf32, #tpu.memory_space<vmem>>, vector<1x32xf32>,
    %177 = vector.extract_strided_slice %166 {offsets = [5, 0], sizes = [1, 32], strides = [1, 1]} : vector<16x64xf32> to vector<1x32xf32>
    %c0_130 = arith.constant 0 : index
    %c160 = arith.constant 160 : index
    %178 = vector.load %arg17[%c0_130, %c160] : memref<2x512xf32, #tpu.memory_space<vmem>>, vector<1x32xf32>
    tpu.vector_store %arg17[%c0_130, %c160], %177 {strides = array<i32>} : memref<2x512xf32, #tpu.memory_space<vmem>>, vector<1x32xf32>,
    %179 = vector.extract_strided_slice %166 {offsets = [6, 0], sizes = [1, 32], strides = [1, 1]} : vector<16x64xf32> to vector<1x32xf32>
    %c0_131 = arith.constant 0 : index
    %c192 = arith.constant 192 : index
    %180 = vector.load %arg17[%c0_131, %c192] : memref<2x512xf32, #tpu.memory_space<vmem>>, vector<1x32xf32>
    tpu.vector_store %arg17[%c0_131, %c192], %179 {strides = array<i32>} : memref<2x512xf32, #tpu.memory_space<vmem>>, vector<1x32xf32>,
    %181 = vector.extract_strided_slice %166 {offsets = [7, 0], sizes = [1, 32], strides = [1, 1]} : vector<16x64xf32> to vector<1x32xf32>
    %c0_132 = arith.constant 0 : index
    %c224 = arith.constant 224 : index
    %182 = vector.load %arg17[%c0_132, %c224] : memref<2x512xf32, #tpu.memory_space<vmem>>, vector<1x32xf32>
    tpu.vector_store %arg17[%c0_132, %c224], %181 {strides = array<i32>} : memref<2x512xf32, #tpu.memory_space<vmem>>, vector<1x32xf32>,
    %183 = vector.extract_strided_slice %166 {offsets = [8, 0], sizes = [1, 32], strides = [1, 1]} : vector<16x64xf32> to vector<1x32xf32>
    %c0_133 = arith.constant 0 : index
    %c256 = arith.constant 256 : index
    %184 = vector.load %arg17[%c0_133, %c256] : memref<2x512xf32, #tpu.memory_space<vmem>>, vector<1x32xf32>
    tpu.vector_store %arg17[%c0_133, %c256], %183 {strides = array<i32>} : memref<2x512xf32, #tpu.memory_space<vmem>>, vector<1x32xf32>,
    %185 = vector.extract_strided_slice %166 {offsets = [9, 0], sizes = [1, 32], strides = [1, 1]} : vector<16x64xf32> to vector<1x32xf32>
    %c0_134 = arith.constant 0 : index
    %c288 = arith.constant 288 : index
    %186 = vector.load %arg17[%c0_134, %c288] : memref<2x512xf32, #tpu.memory_space<vmem>>, vector<1x32xf32>
    tpu.vector_store %arg17[%c0_134, %c288], %185 {strides = array<i32>} : memref<2x512xf32, #tpu.memory_space<vmem>>, vector<1x32xf32>,
    %187 = vector.extract_strided_slice %166 {offsets = [10, 0], sizes = [1, 32], strides = [1, 1]} : vector<16x64xf32> to vector<1x32xf32>
    %c0_135 = arith.constant 0 : index
    %c320 = arith.constant 320 : index
    %188 = vector.load %arg17[%c0_135, %c320] : memref<2x512xf32, #tpu.memory_space<vmem>>, vector<1x32xf32>
    tpu.vector_store %arg17[%c0_135, %c320], %187 {strides = array<i32>} : memref<2x512xf32, #tpu.memory_space<vmem>>, vector<1x32xf32>,
    %189 = vector.extract_strided_slice %166 {offsets = [11, 0], sizes = [1, 32], strides = [1, 1]} : vector<16x64xf32> to vector<1x32xf32>
    %c0_136 = arith.constant 0 : index
    %c352 = arith.constant 352 : index
    %190 = vector.load %arg17[%c0_136, %c352] : memref<2x512xf32, #tpu.memory_space<vmem>>, vector<1x32xf32>
    tpu.vector_store %arg17[%c0_136, %c352], %189 {strides = array<i32>} : memref<2x512xf32, #tpu.memory_space<vmem>>, vector<1x32xf32>,
    %191 = vector.extract_strided_slice %166 {offsets = [12, 0], sizes = [1, 32], strides = [1, 1]} : vector<16x64xf32> to vector<1x32xf32>
    %c0_137 = arith.constant 0 : index
    %c384 = arith.constant 384 : index
    %192 = vector.load %arg17[%c0_137, %c384] : memref<2x512xf32, #tpu.memory_space<vmem>>, vector<1x32xf32>
    tpu.vector_store %arg17[%c0_137, %c384], %191 {strides = array<i32>} : memref<2x512xf32, #tpu.memory_space<vmem>>, vector<1x32xf32>,
    %193 = vector.extract_strided_slice %166 {offsets = [13, 0], sizes = [1, 32], strides = [1, 1]} : vector<16x64xf32> to vector<1x32xf32>
    %c0_138 = arith.constant 0 : index
    %c416 = arith.constant 416 : index
    %194 = vector.load %arg17[%c0_138, %c416] : memref<2x512xf32, #tpu.memory_space<vmem>>, vector<1x32xf32>
    tpu.vector_store %arg17[%c0_138, %c416], %193 {strides = array<i32>} : memref<2x512xf32, #tpu.memory_space<vmem>>, vector<1x32xf32>,
    %195 = vector.extract_strided_slice %166 {offsets = [14, 0], sizes = [1, 32], strides = [1, 1]} : vector<16x64xf32> to vector<1x32xf32>
    %c0_139 = arith.constant 0 : index
    %c448 = arith.constant 448 : index
    %196 = vector.load %arg17[%c0_139, %c448] : memref<2x512xf32, #tpu.memory_space<vmem>>, vector<1x32xf32>
    tpu.vector_store %arg17[%c0_139, %c448], %195 {strides = array<i32>} : memref<2x512xf32, #tpu.memory_space<vmem>>, vector<1x32xf32>,
    %197 = vector.extract_strided_slice %166 {offsets = [15, 0], sizes = [1, 32], strides = [1, 1]} : vector<16x64xf32> to vector<1x32xf32>
    %c0_140 = arith.constant 0 : index
    %c480 = arith.constant 480 : index
    %198 = vector.load %arg17[%c0_140, %c480] : memref<2x512xf32, #tpu.memory_space<vmem>>, vector<1x32xf32>
    tpu.vector_store %arg17[%c0_140, %c480], %197 {strides = array<i32>} : memref<2x512xf32, #tpu.memory_space<vmem>>, vector<1x32xf32>,
    %199 = vector.extract_strided_slice %166 {offsets = [0, 32], sizes = [1, 32], strides = [1, 1]} : vector<16x64xf32> to vector<1x32xf32>
    %c1_141 = arith.constant 1 : index
    %c0_142 = arith.constant 0 : index
    %200 = vector.load %arg17[%c1_141, %c0_142] : memref<2x512xf32, #tpu.memory_space<vmem>>, vector<1x32xf32>
    tpu.vector_store %arg17[%c1_141, %c0_142], %199 {strides = array<i32>} : memref<2x512xf32, #tpu.memory_space<vmem>>, vector<1x32xf32>,
    %201 = vector.extract_strided_slice %166 {offsets = [1, 32], sizes = [1, 32], strides = [1, 1]} : vector<16x64xf32> to vector<1x32xf32>
    %c1_143 = arith.constant 1 : index
    %c32_144 = arith.constant 32 : index
    %202 = vector.load %arg17[%c1_143, %c32_144] : memref<2x512xf32, #tpu.memory_space<vmem>>, vector<1x32xf32>
    tpu.vector_store %arg17[%c1_143, %c32_144], %201 {strides = array<i32>} : memref<2x512xf32, #tpu.memory_space<vmem>>, vector<1x32xf32>,
    %203 = vector.extract_strided_slice %166 {offsets = [2, 32], sizes = [1, 32], strides = [1, 1]} : vector<16x64xf32> to vector<1x32xf32>
    %c1_145 = arith.constant 1 : index
    %c64_146 = arith.constant 64 : index
    %204 = vector.load %arg17[%c1_145, %c64_146] : memref<2x512xf32, #tpu.memory_space<vmem>>, vector<1x32xf32>
    tpu.vector_store %arg17[%c1_145, %c64_146], %203 {strides = array<i32>} : memref<2x512xf32, #tpu.memory_space<vmem>>, vector<1x32xf32>,
    %205 = vector.extract_strided_slice %166 {offsets = [3, 32], sizes = [1, 32], strides = [1, 1]} : vector<16x64xf32> to vector<1x32xf32>
    %c1_147 = arith.constant 1 : index
    %c96_148 = arith.constant 96 : index
    %206 = vector.load %arg17[%c1_147, %c96_148] : memref<2x512xf32, #tpu.memory_space<vmem>>, vector<1x32xf32>
    tpu.vector_store %arg17[%c1_147, %c96_148], %205 {strides = array<i32>} : memref<2x512xf32, #tpu.memory_space<vmem>>, vector<1x32xf32>,
    %207 = vector.extract_strided_slice %166 {offsets = [4, 32], sizes = [1, 32], strides = [1, 1]} : vector<16x64xf32> to vector<1x32xf32>
    %c1_149 = arith.constant 1 : index
    %c128_150 = arith.constant 128 : index
    %208 = vector.load %arg17[%c1_149, %c128_150] : memref<2x512xf32, #tpu.memory_space<vmem>>, vector<1x32xf32>
    tpu.vector_store %arg17[%c1_149, %c128_150], %207 {strides = array<i32>} : memref<2x512xf32, #tpu.memory_space<vmem>>, vector<1x32xf32>,
    %209 = vector.extract_strided_slice %166 {offsets = [5, 32], sizes = [1, 32], strides = [1, 1]} : vector<16x64xf32> to vector<1x32xf32>
    %c1_151 = arith.constant 1 : index
    %c160_152 = arith.constant 160 : index
    %210 = vector.load %arg17[%c1_151, %c160_152] : memref<2x512xf32, #tpu.memory_space<vmem>>, vector<1x32xf32>
    tpu.vector_store %arg17[%c1_151, %c160_152], %209 {strides = array<i32>} : memref<2x512xf32, #tpu.memory_space<vmem>>, vector<1x32xf32>,
    %211 = vector.extract_strided_slice %166 {offsets = [6, 32], sizes = [1, 32], strides = [1, 1]} : vector<16x64xf32> to vector<1x32xf32>
    %c1_153 = arith.constant 1 : index
    %c192_154 = arith.constant 192 : index
    %212 = vector.load %arg17[%c1_153, %c192_154] : memref<2x512xf32, #tpu.memory_space<vmem>>, vector<1x32xf32>
    tpu.vector_store %arg17[%c1_153, %c192_154], %211 {strides = array<i32>} : memref<2x512xf32, #tpu.memory_space<vmem>>, vector<1x32xf32>,
    %213 = vector.extract_strided_slice %166 {offsets = [7, 32], sizes = [1, 32], strides = [1, 1]} : vector<16x64xf32> to vector<1x32xf32>
    %c1_155 = arith.constant 1 : index
    %c224_156 = arith.constant 224 : index
    %214 = vector.load %arg17[%c1_155, %c224_156] : memref<2x512xf32, #tpu.memory_space<vmem>>, vector<1x32xf32>
    tpu.vector_store %arg17[%c1_155, %c224_156], %213 {strides = array<i32>} : memref<2x512xf32, #tpu.memory_space<vmem>>, vector<1x32xf32>,
    %215 = vector.extract_strided_slice %166 {offsets = [8, 32], sizes = [1, 32], strides = [1, 1]} : vector<16x64xf32> to vector<1x32xf32>
    %c1_157 = arith.constant 1 : index
    %c256_158 = arith.constant 256 : index
    %216 = vector.load %arg17[%c1_157, %c256_158] : memref<2x512xf32, #tpu.memory_space<vmem>>, vector<1x32xf32>
    tpu.vector_store %arg17[%c1_157, %c256_158], %215 {strides = array<i32>} : memref<2x512xf32, #tpu.memory_space<vmem>>, vector<1x32xf32>,
    %217 = vector.extract_strided_slice %166 {offsets = [9, 32], sizes = [1, 32], strides = [1, 1]} : vector<16x64xf32> to vector<1x32xf32>
    %c1_159 = arith.constant 1 : index
    %c288_160 = arith.constant 288 : index
    %218 = vector.load %arg17[%c1_159, %c288_160] : memref<2x512xf32, #tpu.memory_space<vmem>>, vector<1x32xf32>
    tpu.vector_store %arg17[%c1_159, %c288_160], %217 {strides = array<i32>} : memref<2x512xf32, #tpu.memory_space<vmem>>, vector<1x32xf32>,
    %219 = vector.extract_strided_slice %166 {offsets = [10, 32], sizes = [1, 32], strides = [1, 1]} : vector<16x64xf32> to vector<1x32xf32>
    %c1_161 = arith.constant 1 : index
    %c320_162 = arith.constant 320 : index
    %220 = vector.load %arg17[%c1_161, %c320_162] : memref<2x512xf32, #tpu.memory_space<vmem>>, vector<1x32xf32>
    tpu.vector_store %arg17[%c1_161, %c320_162], %219 {strides = array<i32>} : memref<2x512xf32, #tpu.memory_space<vmem>>, vector<1x32xf32>,
    %221 = vector.extract_strided_slice %166 {offsets = [11, 32], sizes = [1, 32], strides = [1, 1]} : vector<16x64xf32> to vector<1x32xf32>
    %c1_163 = arith.constant 1 : index
    %c352_164 = arith.constant 352 : index
    %222 = vector.load %arg17[%c1_163, %c352_164] : memref<2x512xf32, #tpu.memory_space<vmem>>, vector<1x32xf32>
    tpu.vector_store %arg17[%c1_163, %c352_164], %221 {strides = array<i32>} : memref<2x512xf32, #tpu.memory_space<vmem>>, vector<1x32xf32>,
    %223 = vector.extract_strided_slice %166 {offsets = [12, 32], sizes = [1, 32], strides = [1, 1]} : vector<16x64xf32> to vector<1x32xf32>
    %c1_165 = arith.constant 1 : index
    %c384_166 = arith.constant 384 : index
    %224 = vector.load %arg17[%c1_165, %c384_166] : memref<2x512xf32, #tpu.memory_space<vmem>>, vector<1x32xf32>
    tpu.vector_store %arg17[%c1_165, %c384_166], %223 {strides = array<i32>} : memref<2x512xf32, #tpu.memory_space<vmem>>, vector<1x32xf32>,
    %225 = vector.extract_strided_slice %166 {offsets = [13, 32], sizes = [1, 32], strides = [1, 1]} : vector<16x64xf32> to vector<1x32xf32>
    %c1_167 = arith.constant 1 : index
    %c416_168 = arith.constant 416 : index
    %226 = vector.load %arg17[%c1_167, %c416_168] : memref<2x512xf32, #tpu.memory_space<vmem>>, vector<1x32xf32>
    tpu.vector_store %arg17[%c1_167, %c416_168], %225 {strides = array<i32>} : memref<2x512xf32, #tpu.memory_space<vmem>>, vector<1x32xf32>,
    %227 = vector.extract_strided_slice %166 {offsets = [14, 32], sizes = [1, 32], strides = [1, 1]} : vector<16x64xf32> to vector<1x32xf32>
    %c1_169 = arith.constant 1 : index
    %c448_170 = arith.constant 448 : index
    %228 = vector.load %arg17[%c1_169, %c448_170] : memref<2x512xf32, #tpu.memory_space<vmem>>, vector<1x32xf32>
    tpu.vector_store %arg17[%c1_169, %c448_170], %227 {strides = array<i32>} : memref<2x512xf32, #tpu.memory_space<vmem>>, vector<1x32xf32>,
    %229 = vector.extract_strided_slice %166 {offsets = [15, 32], sizes = [1, 32], strides = [1, 1]} : vector<16x64xf32> to vector<1x32xf32>
    %c1_171 = arith.constant 1 : index
    %c480_172 = arith.constant 480 : index
    %230 = vector.load %arg17[%c1_171, %c480_172] : memref<2x512xf32, #tpu.memory_space<vmem>>, vector<1x32xf32>
    tpu.vector_store %arg17[%c1_171, %c480_172], %229 {strides = array<i32>} : memref<2x512xf32, #tpu.memory_space<vmem>>, vector<1x32xf32>,
    %c0_173 = arith.constant 0 : index
    %c0_174 = arith.constant 0 : index
    %231 = vector.load %arg17[%c0_173, %c0_174] : memref<2x512xf32, #tpu.memory_space<vmem>>, vector<2x512xf32>
    %c0_175 = arith.constant 0 : index
    %c0_176 = arith.constant 0 : index
    %232 = vector.load %arg12[%c0_175, %c0_176] : memref<512x80xf32, #tpu.memory_space<vmem>>, vector<512x80xf32>
    %cst_177 = arith.constant dense<0.000000e+00> : vector<2x80xf32>
    %233 = tpu.matmul %231, %232, %cst_177 {dimension_numbers = #tpu.dot_dimension_numbers<[1], [0], [0], [1], [0, 0, 1, 1], [], []>} : vector<2x512xf32>, vector<512x80xf32>, vector<2x80xf32> -> vector<2x80xf32>
    %c0_178 = arith.constant 0 : index
    %c0_179 = arith.constant 0 : index
    %234 = vector.load %arg13[%c0_178, %c0_179] : memref<1x80xf32, #tpu.memory_space<vmem>>, vector<1x80xf32>
    %235 = vector.broadcast %234 : vector<1x80xf32> to vector<2x80xf32>
    %236 = arith.addf %233, %235 : vector<2x80xf32>
    %cst_180 = arith.constant 0.000000e+00 : f32
    %237 = vector.broadcast %cst_180 : f32 to vector<2x80xf32>
    %238 = arith.maximumf %236, %237 : vector<2x80xf32>
    %c0_181 = arith.constant 0 : index
    %c0_182 = arith.constant 0 : index
    %239 = vector.load %arg14[%c0_181, %c0_182] : memref<80x8xf32, #tpu.memory_space<vmem>>, vector<80x8xf32>
    %cst_183 = arith.constant dense<0.000000e+00> : vector<2x8xf32>
    %240 = tpu.matmul %238, %239, %cst_183 {dimension_numbers = #tpu.dot_dimension_numbers<[1], [0], [0], [1], [0, 0, 1, 1], [], []>} : vector<2x80xf32>, vector<80x8xf32>, vector<2x8xf32> -> vector<2x8xf32>
    %c0_184 = arith.constant 0 : index
    %c0_185 = arith.constant 0 : index
    %241 = vector.load %arg15[%c0_184, %c0_185] : memref<1x8xf32, #tpu.memory_space<vmem>>, vector<1x8xf32>
    %242 = vector.broadcast %241 : vector<1x8xf32> to vector<2x8xf32>
    %243 = arith.addf %240, %242 : vector<2x8xf32>
    %244 = vector.extract_strided_slice %243 {offsets = [0, 0], sizes = [2, 7], strides = [1, 1]} : vector<2x8xf32> to vector<2x7xf32>
    %cst_186 = arith.constant dense<0xFF800000> : vector<2xf32>
    %245 = vector.multi_reduction <maximumf>, %244, %cst_186 [1] : vector<2x7xf32> to vector<2xf32>
    %246 = vector.shape_cast %245 : vector<2xf32> to vector<2x1xf32>
    %247 = vector.broadcast %246 : vector<2x1xf32> to vector<2x7xf32>
    %248 = arith.subf %244, %247 : vector<2x7xf32>
    %249 = math.exp %248 : vector<2x7xf32>
    %cst_187 = arith.constant dense<0.000000e+00> : vector<2xf32>
    %250 = vector.multi_reduction <add>, %249, %cst_187 [1] : vector<2x7xf32> to vector<2xf32>
    %251 = vector.shape_cast %250 : vector<2xf32> to vector<2x1xf32>
    %252 = vector.broadcast %251 : vector<2x1xf32> to vector<2x7xf32>
    %253 = arith.divf %249, %252 : vector<2x7xf32>
    %c0_188 = arith.constant 0 : index
    %c0_189 = arith.constant 0 : index
    %254 = vector.load %arg16[%c0_188, %c0_189] : memref<2x8xf32, #tpu.memory_space<vmem>>, vector<2x7xf32>
    tpu.vector_store %arg16[%c0_188, %c0_189], %253 {strides = array<i32>} : memref<2x8xf32, #tpu.memory_space<vmem>>, vector<2x7xf32>,
    %255 = vector.extract_strided_slice %243 {offsets = [0, 7], sizes = [2, 1], strides = [1, 1]} : vector<2x8xf32> to vector<2x1xf32>
    %c0_190 = arith.constant 0 : index
    %c7_191 = arith.constant 7 : index
    %256 = vector.load %arg16[%c0_190, %c7_191] : memref<2x8xf32, #tpu.memory_space<vmem>>, vector<2x1xf32>
    tpu.vector_store %arg16[%c0_190, %c7_191], %255 {strides = array<i32>} : memref<2x8xf32, #tpu.memory_space<vmem>>, vector<2x1xf32>,
    return
  }
}

</mosaic_0001>

<bundles_post_ra>
// kernel: network_forward.1
= control target key start
LH: loop header
LB: loop body
LE: loop exit
PB: predicated region body
PF: predicated region fallthrough
CT: control target
= control target key end

     0   :  { %s11805_s0 = inlined_call_operand.vmem [shape: f32[256,8], index: 0, kind: input, shape index: {}]   ;;  %s11806_s1 = inlined_call_operand.vmem [shape: f32[8,64], index: 1, kind: input, shape index: {}]   ;;  %s11807_s2 = inlined_call_operand.vmem [shape: f32[1,64], index: 2, kind: input, shape index: {}]   ;;  %s11808_s3 = inlined_call_operand.hbm [shape: bf16[64,1152], index: 3, kind: input, shape index: {}]   ;;  %s11809_s4 = inlined_call_operand.vmem [shape: bf16[9,81,256], index: 4, kind: input, shape index: {}]   ;;  %s11810_s5 = inlined_call_operand.vmem [shape: f32[1,64], index: 5, kind: input, shape index: {}]   ;;  %s11811_s6 = inlined_call_operand.hbm [shape: bf16[64,1152], index: 6, kind: input, shape index: {}]   ;;  %s11812_s7 = inlined_call_operand.vmem [shape: bf16[9,36,81], index: 7, kind: input, shape index: {}]   ;;  %s11813_s8 = inlined_call_operand.vmem [shape: f32[1,64], index: 8, kind: input, shape index: {}]   ;;  %s11814_s9 = inlined_call_operand.hbm [shape: bf16[64,1152], index: 9, kind: input, shape index: {}]   ;;  %s11815_s10 = inlined_call_operand.vmem [shape: bf16[9,16,36], index: 10, kind: input, shape index: {}]   ;;  %s11816_s11 = inlined_call_operand.vmem [shape: f32[1,64], index: 11, kind: input, shape index: {}]   ;;  %s11817_s12 = inlined_call_operand.vmem [shape: f32[512,80], index: 12, kind: input, shape index: {}]   ;;  %s11818_s13 = inlined_call_operand.vmem [shape: f32[1,80], index: 13, kind: input, shape index: {}]   ;;  %s11819_s14 = inlined_call_operand.vmem [shape: f32[80,8], index: 14, kind: input, shape index: {}]   ;;  %s11820_s15 = inlined_call_operand.vmem [shape: f32[1,8], index: 15, kind: input, shape index: {}]   ;;  %s11821_s16 = inlined_call_operand.vmem [shape: f32[2,8], index: 16, kind: output, shape index: {}]  }
   0x1   :  { %11866 = sst [smem:[#allocation32_spill]] %s11805_s0 }
   0x2   :  { %21 = vsyncpa [#allocation4], 0 }
   0x3   :  { %22 = vsyncpa [#allocation6], 0  ;;  %s8787_s21 = smov [#allocation5]   ;;  %s8788_s23 = smov [#allocation3]  }
   0x4   :  { %s50_s22 = sshll.u32 %s8787_s21, 4  ;;  %s34_s24 = sshll.u32 %s8788_s23, 4  ;;  %s51_s22 = int_to_ptr.vmem [resolvable:$true] %s50_s22  ;;  %s8885_s24 = int_to_ptr.vmem [resolvable:$true] %s34_s24 }
   0x5   :  { %s8717_s27 = scalar_lea.hbm %s11811_s6, 4608 }
   0x6   :  { %p8718_p0 = scmp.ne.s32.totalorder %s11811_s6, %s8717_s27  ;;  %p8721_p1 = scmp.lt.u32.totalorder %s8717_s27, %s11811_s6 }
   0x8   :  { %p8723_p2 = pnand %p8721_p1, %p8718_p0 }
   0xa   :  { %8726 = shalt.err (!%p8723_p2)
}
   0xb   :  { %s8727_s17 = scalar_lea.vmem %s51_s22, 4608  ;;  %p8732_p4 = scmp.lt.s32.totalorder %s51_s22, %s51_s22 }
   0xc   :  { %p8728_p3 = scmp.ne.s32.totalorder %s51_s22, %s8727_s17  ;;  %p8733_p5 = scmp.lt.s32.totalorder %s8727_s17, %s8727_s17 }
   0xe   :  { %p8734_p6 = por %p8733_p5, %p8732_p4 }
  0x10   :  { %p8735_p7 = pnand %p8734_p6, %p8728_p3 }
  0x12   :  { %8738 = shalt.err (!%p8735_p7)
}
  0x13   :  { %s8789_s18 = smov 576   ;;  %s8790_s19 = smov 36  }
  0x14   :  { %56 = dma.hbm_to_vmem [thread:$0]  %s11811_s6, 4608, %s51_s22, [#allocation6], %s8789_s18, %s8789_s18, %s8790_s19  }
  0x15   :  { %s8739_s26 = scalar_lea.hbm %s11808_s3, 4608 }
  0x16   :  { %p8740_p8 = scmp.ne.s32.totalorder %s11808_s3, %s8739_s26  ;;  %p8743_p9 = scmp.lt.u32.totalorder %s8739_s26, %s11808_s3 }
  0x18   :  { %p8745_p10 = pnand %p8743_p9, %p8740_p8 }
  0x1a   :  { %8748 = shalt.err (!%p8745_p10)
}
  0x1b   :  { %s8749_s0 = scalar_lea.vmem %s8885_s24, 4608  ;;  %p8754_p12 = scmp.lt.s32.totalorder %s8885_s24, %s8885_s24 }
  0x1c   :  { %p8750_p11 = scmp.ne.s32.totalorder %s8885_s24, %s8749_s0  ;;  %p8755_p13 = scmp.lt.s32.totalorder %s8749_s0, %s8749_s0 }
  0x1e   :  { %p8756_p0 = por %p8755_p13, %p8754_p12 }
  0x20   :  { %p8757_p1 = pnand %p8756_p0, %p8750_p11 }
  0x22   :  { %8760 = shalt.err (!%p8757_p1)
}
  0x23   :  { %40 = dma.hbm_to_vmem [thread:$0]  %s11808_s3, 4608, %s8885_s24, [#allocation4], %s8789_s18, %s8789_s18, %s8790_s19  }
  0x24   :  { %s8791_s17 = smov [#allocation7]   ;;  %s8761_s25 = scalar_lea.hbm %s11814_s9, 4608 }
  0x25   :  { %s66_s20 = sshll.u32 %s8791_s17, 4  ;;  %p8762_p2 = scmp.ne.s32.totalorder %s11814_s9, %s8761_s25  ;;  %s67_s20 = int_to_ptr.vmem [resolvable:$true] %s66_s20 }
  0x26   :  { %p8765_p3 = scmp.lt.u32.totalorder %s8761_s25, %s11814_s9 }
  0x28   :  { %p8767_p4 = pnand %p8765_p3, %p8762_p2 }
  0x2a   :  { %8770 = shalt.err (!%p8767_p4)
}
  0x2b   :  { %s8771_s30 = scalar_lea.vmem %s67_s20, 4608  ;;  %p8776_p6 = scmp.lt.s32.totalorder %s67_s20, %s67_s20 }
  0x2c   :  { %p8772_p5 = scmp.ne.s32.totalorder %s67_s20, %s8771_s30  ;;  %p8777_p7 = scmp.lt.s32.totalorder %s8771_s30, %s8771_s30 }
  0x2e   :  { %p8778_p8 = por %p8777_p7, %p8776_p6 }
  0x30   :  { %p8779_p9 = pnand %p8778_p8, %p8772_p5 }
  0x32   :  { %8782 = shalt.err (!%p8779_p9)
}
  0x33   :  { %72 = dma.hbm_to_vmem [thread:$0]  %s11814_s9, 4608, %s67_s20, [#allocation6], %s8789_s18, %s8789_s18, %s8790_s19  }
  0x34   :  { %8783 = dma.done.wait [#allocation4], 4608  }
  0x35   :  { %8784 = vsyncadd [#allocation4], 4294962688 }
  0x36   :  { %8785 = dma.done.wait [#allocation6], 9216  }
  0x37   :  { %8786 = vsyncadd [#allocation6], 4294958080  ;;  %vm135_vm0 = vcmask 64512   ;;  %v127_v0 = vld [vmem:[%s11806_s1] sm:$0xff]  ;;  %s11867_s21 = sld [smem:[#allocation32_spill]]  ;;  %v11823_v49 = vmov 0  }
  0x38   :  { %7814 = vmatprep.subr.mxu0 %v127_v0  ;;  %8352 = vmatprep.subr.mxu1 %v127_v0  ;;  %v8367_v15 = vld [vmem:[#allocation3] ss:$36 sps:$4 sm:$0xff]   ;;  %v8370_v18 = vld [vmem:[#allocation3 + $0x8] ss:$36 sps:$4 sm:$0xff]   ;;  %v8376_v25 = vld [vmem:[#allocation3 + $0x50] ss:$36 sps:$4 sm:$0xff]  }
  0x39   :  { %7815 = vmatpush3.msra.mxu0 %v127_v0  ;;  %8353 = vmatpush3.msra.mxu1 %v127_v0  ;;  %v8369_v16 = vld [vmem:[#allocation3 + $0x4] ss:$36 sps:$4 sm:$0xff]   ;;  %v8372_v19 = vld [vmem:[#allocation3 + $0xc] ss:$36 sps:$4 sm:$0xff]   ;;  %v8378_v26 = vld [vmem:[#allocation3 + $0x54] ss:$36 sps:$4 sm:$0xff]  }
  0x3a   :  { %778 = vmatprep.subr.bf16.mxu1 %v8369_v16  ;;  %v8375_v22 = vld [vmem:[#allocation3 + $0x4c] ss:$36 sps:$4 sm:$0xff]   ;;  %971 = vmatprep.subr.bf16.mxu0 %v8372_v19  ;;  %v8381_v41 = vld [vmem:[#allocation3 + $0x94] ss:$36 sps:$4 sm:$0xff]   ;;  %v8384_v42 = vld [vmem:[#allocation3 + $0x9c] ss:$36 sps:$4 sm:$0xff]  }
  0x3b   :  { %v8373_v24 = vld [vmem:[#allocation3 + $0x48] ss:$36 sps:$4 sm:$0xff]   ;;  %v8379_v43 = vld [vmem:[#allocation3 + $0x90] ss:$36 sps:$4 sm:$0xff]   ;;  %v8382_v44 = vld [vmem:[#allocation3 + $0x98] ss:$36 sps:$4 sm:$0xff]  }
  0x3c   :  { %v8387_v45 = vld [vmem:[#allocation3 + $0xdc] ss:$36 sps:$4 sm:$0xff]   ;;  %v8390_v46 = vld [vmem:[#allocation3 + $0xe4] ss:$36 sps:$4 sm:$0xff]   ;;  %v8393_v50 = vld [vmem:[#allocation3 + $0x14] ss:$36 sps:$4 sm:$0xff]  }
  0x3d   :  { %v95_v1 = vld [vmem:[%s11867_s21] sm:$0xff]  ;;  %v96_v2 = vld [vmem:[%s11867_s21 + $0x8] sm:$0xff]  ;;  %v97_v3 = vld [vmem:[%s11867_s21 + $0x10] sm:$0xff]  ;;  %vm729_vm1 = vcmask 523264   ;;  %vm8794_vm2 = vmmov 0   ;;  %vm4081_vm3 = vcmask 1040384  }
  0x3e   :  { %7816 = vmatprep.mubr.msk.f32.mxu0 %vm135_vm0, %v95_v1  ;;  %v98_v4 = vld [vmem:[%s11867_s21 + $0x18] sm:$0xff]  ;;  %v99_v5 = vld [vmem:[%s11867_s21 + $0x20] sm:$0xff]  ;;  %v100_v6 = vld [vmem:[%s11867_s21 + $0x28] sm:$0xff]  ;;  %vm4071_vm4 = vcmask 662528   ;;  %vm5462_vm5 = vcmask 1041408   ;;  %vm5458_vm6 = vcmask 293888  }
  0x3f   :  { %7817 = vmatmul.mubr.msk.f32.vlgmr.msra.gmra.mrb[0].mxu0 %vm135_vm0, %v96_v2  ;;  %v119_v7 = vld [vmem:[%s11867_s21 + $0xc0] sm:$0xff]  ;;  %v120_v8 = vld [vmem:[%s11867_s21 + $0xc8] sm:$0xff]  ;;  %v101_v9 = vld [vmem:[%s11867_s21 + $0x30] sm:$0xff]  ;;  %vm5969_vm7 = vcmask 253952   ;;  %s8796_s24 = smov 96   ;;  %s8798_s0 = smov 32  }
  0x40   :  { %7819 = vmatprep.mubr.msk.f32.mxu0 %vm135_vm0, %v97_v3  ;;  %7852 = vmatprep.mubr.msk.f32.mxu1 %vm135_vm0, %v119_v7  ;;  %v121_v10 = vld [vmem:[%s11867_s21 + $0xd0] sm:$0xff]  ;;  %v102_v11 = vld [vmem:[%s11867_s21 + $0x38] sm:$0xff]  ;;  %v123_v13 = vld [vmem:[%s11867_s21 + $0xe0] sm:$0xff]  ;;  %vm5984_vm8 = vcmask 516352   ;;  %vm5990_vm9 = vcmask 778752   ;;  %vm5997_vm10 = vcmask 1041152  }
  0x41   :  { %7853 = vmatmul.mubr.msk.f32.vlgmr.msra.gmra.mrb[0].mxu1 %vm135_vm0, %v120_v8  ;;  %v122_v12 = vld [vmem:[%s11867_s21 + $0xd8] sm:$0xff]  ;;  %v103_v14 = vld [vmem:[%s11867_s21 + $0x40] sm:$0xff]  ;;  %v124_v17 = vld [vmem:[%s11867_s21 + $0xe8] sm:$0xff]  ;;  %972 = vmatpush1.bf16.msra.mxu0 %v8370_v18  ;;  %vm6387_vm11 = vcmask 654336   ;;  %vm6461_vm12 = vcmask 50176   ;;  %vm6474_vm13 = vcmask 58424  }
  0x42   :  { %7855 = vmatprep.mubr.msk.f32.mxu1 %vm135_vm0, %v121_v10  ;;  %v104_v20 = vld [vmem:[%s11867_s21 + $0x48] sm:$0xff]  ;;  %v125_v21 = vld [vmem:[%s11867_s21 + $0xf0] sm:$0xff]  ;;  %v126_v27 = vld [vmem:[%s11867_s21 + $0xf8] sm:$0xff]  ;;  %779 = vmatpush1.bf16.msra.mxu1 %v8367_v15 }
  0x43   :  { %7820 = vmatmul.mubr.msk.f32.gmra.mrb[2].mxu0 %vm135_vm0, %v98_v4  ;;  %v105_v23 = vld [vmem:[%s11867_s21 + $0x50] sm:$0xff]  ;;  %v106_v28 = vld [vmem:[%s11867_s21 + $0x58] sm:$0xff]  ;;  %780 = vmatprep.subr.bf16.mxu1 %v8375_v22  ;;  %v107_v29 = vld [vmem:[%s11867_s21 + $0x60] sm:$0xff] }
  0x44   :  { %7822 = vmatprep.mubr.msk.f32.mxu0 %vm135_vm0, %v99_v5  ;;  %973 = vmatprep.subr.bf16.mxu0 %v8378_v26  ;;  %v108_v30 = vld [vmem:[%s11867_s21 + $0x68] sm:$0xff]  ;;  %v109_v31 = vld [vmem:[%s11867_s21 + $0x70] sm:$0xff]  ;;  %v110_v32 = vld [vmem:[%s11867_s21 + $0x78] sm:$0xff] }
  0x45   :  { %7856 = vmatmul.mubr.msk.f32.gmra.mrb[2].mxu1 %vm135_vm0, %v122_v12  ;;  %974 = vmatpush1.bf16.msra.mxu0 %v8376_v25  ;;  %v111_v33 = vld [vmem:[%s11867_s21 + $0x80] sm:$0xff]  ;;  %v112_v34 = vld [vmem:[%s11867_s21 + $0x88] sm:$0xff]  ;;  %v113_v35 = vld [vmem:[%s11867_s21 + $0x90] sm:$0xff] }
  0x46   :  { %7858 = vmatprep.mubr.msk.f32.mxu1 %vm135_vm0, %v123_v13  ;;  %781 = vmatpush1.bf16.msra.mxu1 %v8373_v24  ;;  %v114_v36 = vld [vmem:[%s11867_s21 + $0x98] sm:$0xff]  ;;  %v115_v37 = vld [vmem:[%s11867_s21 + $0xa0] sm:$0xff]  ;;  %v116_v38 = vld [vmem:[%s11867_s21 + $0xa8] sm:$0xff] }
  0x47   :  { %7823 = vmatmul.mubr.msk.f32.gmra.mrb[4].mxu0 %vm135_vm0, %v100_v6  ;;  %v117_v39 = vld [vmem:[%s11867_s21 + $0xb0] sm:$0xff]  ;;  %v118_v40 = vld [vmem:[%s11867_s21 + $0xb8] sm:$0xff]  ;;  %782 = vmatprep.subr.bf16.mxu1 %v8381_v41  ;;  %v8385_v47 = vld [vmem:[#allocation3 + $0xd8] ss:$36 sps:$4 sm:$0xff]  }
  0x48   :  { %7825 = vmatprep.mubr.msk.f32.mxu0 %vm135_vm0, %v101_v9  ;;  %975 = vmatprep.subr.bf16.mxu0 %v8384_v42  ;;  %v8388_v48 = vld [vmem:[#allocation3 + $0xe0] ss:$36 sps:$4 sm:$0xff]   ;;  %v9073_v52 = vld [vmem:[%s11807_s2] ss:$0 sm:$0xff]  ;;  %v8391_v0 = vld [vmem:[#allocation3 + $0x10] ss:$36 sps:$4 sm:$0xff]  }
  0x49   :  { %7859 = vmatmul.mubr.msk.f32.gmra.mrb[4].mxu1 %vm135_vm0, %v124_v17  ;;  %976 = vmatpush1.bf16.msra.mxu0 %v8382_v44  ;;  %v8399_v51 = vld [vmem:[#allocation3 + $0x1c] ss:$36 sps:$4 sm:$0xff]   ;;  %v8405_v5 = vld [vmem:[#allocation3 + $0x64] ss:$36 sps:$4 sm:$0xff]   ;;  %v8408_v22 = vld [vmem:[#allocation3 + $0xac] ss:$36 sps:$4 sm:$0xff]  }
  0x4a   :  { %7861 = vmatprep.mubr.msk.f32.mxu1 %vm135_vm0, %v125_v21  ;;  %783 = vmatpush1.bf16.msra.mxu1 %v8379_v43  ;;  %v8397_v1 = vld [vmem:[#allocation3 + $0x18] ss:$36 sps:$4 sm:$0xff]   ;;  %v8402_v17 = vld [vmem:[#allocation3 + $0xa4] ss:$36 sps:$4 sm:$0xff]  }
  0x4b   :  { %7826 = vmatmul.mubr.msk.f32.gmra.mrb[6].mxu0 %vm135_vm0, %v102_v11  ;;  %784 = vmatprep.subr.bf16.mxu1 %v8387_v45  ;;  %v8396_v3 = vld [vmem:[#allocation3 + $0x5c] ss:$36 sps:$4 sm:$0xff]  }
  0x4c   :  { %7828 = vmatprep.mubr.msk.f32.mxu0 %vm135_vm0, %v103_v14  ;;  %977 = vmatprep.subr.bf16.mxu0 %v8390_v46  ;;  %v8394_v12 = vld [vmem:[#allocation3 + $0x58] ss:$36 sps:$4 sm:$0xff]   ;;  %v8403_v18 = vld [vmem:[#allocation3 + $0x60] ss:$36 sps:$4 sm:$0xff]  }
  0x4d   :  { %7862 = vmatmul.mubr.msk.f32.gmra.mrb[6].mxu1 %vm135_vm0, %v126_v27  ;;  %978 = vmatpush1.bf16.msra.mxu0 %v8388_v48 }
  0x4e   :  { %785 = vmatpush1.bf16.msra.mxu1 %v8385_v47  ;;  %810 = vmatprep.mubr.bf16.mxu1 %v11823_v49 }
  0x4f   :  { %7829 = vmatmul.mubr.msk.f32.gmra.mrb[8].mxu0 %vm135_vm0, %v104_v20  ;;  %1164 = vmatprep.subr.bf16.mxu1 %v8393_v50 }
  0x50   :  { %7831 = vmatprep.mubr.msk.f32.mxu0 %vm135_vm0, %v105_v23  ;;  %1357 = vmatprep.subr.bf16.mxu0 %v8399_v51 }
  0x53   :  { %7832 = vmatmul.mubr.msk.f32.gmra.mrb[10].mxu0 %vm135_vm0, %v106_v28 }
  0x54   :  { %7834 = vmatprep.mubr.msk.f32.mxu0 %vm135_vm0, %v107_v29 }
  0x57   :  { %7835 = vmatmul.mubr.msk.f32.gmra.mrb[12].mxu0 %vm135_vm0, %v108_v30 }
  0x58   :  { %7837 = vmatprep.mubr.msk.f32.mxu0 %vm135_vm0, %v109_v31  ;;  %v8400_v31 = vld [vmem:[#allocation3 + $0xa0] ss:$36 sps:$4 sm:$0xff]  }
  0x5b   :  { %7838 = vmatmul.mubr.msk.f32.gmra.mrb[14].mxu0 %vm135_vm0, %v110_v32 }
  0x5c   :  { %7840 = vmatprep.mubr.msk.f32.mxu0 %vm135_vm0, %v111_v33 }
  0x5f   :  { %7841 = vmatmul.mubr.msk.f32.gmra.mrb[16].mxu0 %vm135_vm0, %v112_v34 }
  0x60   :  { %7843 = vmatprep.mubr.msk.f32.mxu0 %vm135_vm0, %v113_v35  ;;  %v8406_v35 = vld [vmem:[#allocation3 + $0xa8] ss:$36 sps:$4 sm:$0xff]  }
  0x63   :  { %7844 = vmatmul.mubr.msk.f32.gmra.mrb[18].mxu0 %vm135_vm0, %v114_v36  ;;  %v8411_v36 = vld [vmem:[#allocation3 + $0xec] ss:$36 sps:$4 sm:$0xff]  }
  0x64   :  { %7846 = vmatprep.mubr.msk.f32.mxu0 %vm135_vm0, %v115_v37 }
  0x67   :  { %7847 = vmatmul.mubr.msk.f32.gmra.mrb[20].mxu0 %vm135_vm0, %v116_v38 }
  0x68   :  { %7849 = vmatprep.mubr.msk.f32.mxu0 %vm135_vm0, %v117_v39 }
  0x6b   :  { %7850 = vmatmul.mubr.msk.f32.gmra.mrb[22].mxu0 %vm135_vm0, %v118_v40  ;;  %v8414_v40 = vld [vmem:[#allocation3 + $0xf4] ss:$36 sps:$4 sm:$0xff]  }
  0x6c   :  { %1003 = vmatprep.mubr.bf16.mxu0 %v11823_v49 }
 0x112   :  { %v7818_v53 = vpop.f32.mrb[0].mxu0 }
 0x113   :  { %v304_v54 = vadd.f32 %v7818_v53, %v9073_v52  ;;  %v298_v55 = vpop.f32.mrb[1].mxu0 }
 0x114   :  { %v299_v56 = vadd.f32 %v9073_v52, %v298_v55  ;;  %v7854_v4 = vpop.f32.mrb[0].mxu1  ;;  %v8412_v55 = vld [vmem:[#allocation3 + $0xf0] ss:$36 sps:$4 sm:$0xff]  }
 0x115   :  { %v458_v57 = vmax.f32 %v304_v54, 0.0  ;;  %v424_v8 = vadd.f32 %v7854_v4, %v9073_v52  ;;  %v418_v9 = vpop.f32.mrb[1].mxu1  ;;  %v8409_v54 = vld [vmem:[#allocation3 + $0xe8] ss:$36 sps:$4 sm:$0xff]  }
 0x116   :  { %v457_v58 = vmax.f32 %v299_v56, 0.0  ;;  %v7821_v59 = vpop.f32.mrb[2].mxu0  ;;  %v419_v13 = vadd.f32 %v9073_v52, %v418_v9 }
 0x117   :  { %v314_v60 = vadd.f32 %v7821_v59, %v9073_v52  ;;  %v308_v61 = vpop.f32.mrb[3].mxu0  ;;  %v482_v16 = vmax.f32 %v424_v8, 0.0 }
 0x118   :  { %v9078_v62 = vpack.c.bf16 %v458_v57, %v457_v58  ;;  %v309_v63 = vadd.f32 %v9073_v52, %v308_v61  ;;  %v481_v20 = vmax.f32 %v419_v13, 0.0  ;;  %v7857_v21 = vpop.f32.mrb[2].mxu1 }
 0x119   :  { %v460_v2 = vmax.f32 %v314_v60, 0.0  ;;  %v434_v25 = vadd.f32 %v7857_v21, %v9073_v52  ;;  %v428_v26 = vpop.f32.mrb[3].mxu1 }
 0x11a   :  { %v459_v6 = vmax.f32 %v309_v63, 0.0  ;;  %6551 = vmatmul.mubr.msk.bf16.vlgmr.msra.gmra.mrb[8].mxu1 %vm729_vm1, %v9078_v62  ;;  %6567 = vmatmul.mubr.msk.bf16.vlgmr.msra.gmra.mrb[24].mxu0 %vm729_vm1, %v9078_v62  ;;  %v7824_v7 = vpop.f32.mrb[4].mxu0  ;;  %v9095_v29 = vpack.c.bf16 %v482_v16, %v481_v20  ;;  %v429_v30 = vadd.f32 %v9073_v52, %v428_v26 }
 0x11b   :  { %v324_v10 = vadd.f32 %v7824_v7, %v9073_v52  ;;  %820 = vmatprep.mubr.bf16.mxu1 %v11823_v49  ;;  %1013 = vmatprep.mubr.bf16.mxu0 %v11823_v49  ;;  %v318_v11 = vpop.f32.mrb[5].mxu0  ;;  %v484_v34 = vmax.f32 %v434_v25, 0.0 }
 0x11c   :  { %v9090_v14 = vpack.c.bf16 %v460_v2, %v459_v6  ;;  %v319_v15 = vadd.f32 %v9073_v52, %v318_v11  ;;  %1165 = vmatpush1.bf16.msra.mxu1 %v8391_v0  ;;  %1358 = vmatpush1.bf16.msra.mxu0 %v8397_v1  ;;  %v483_v38 = vmax.f32 %v429_v30, 0.0  ;;  %v7860_v39 = vpop.f32.mrb[4].mxu1 }
 0x11d   :  { %v462_v19 = vmax.f32 %v324_v10, 0.0  ;;  %1166 = vmatprep.subr.bf16.mxu1 %v8396_v3  ;;  %1359 = vmatprep.subr.bf16.mxu0 %v8405_v5  ;;  %v444_v43 = vadd.f32 %v7860_v39, %v9073_v52  ;;  %v438_v44 = vpop.f32.mrb[5].mxu1 }
 0x11e   :  { %v461_v23 = vmax.f32 %v319_v15, 0.0  ;;  %v7827_v24 = vpop.f32.mrb[6].mxu0  ;;  %v9109_v47 = vpack.c.bf16 %v484_v34, %v483_v38  ;;  %v439_v48 = vadd.f32 %v9073_v52, %v438_v44 }
 0x11f   :  { %v334_v27 = vadd.f32 %v7827_v24, %v9073_v52  ;;  %v328_v28 = vpop.f32.mrb[7].mxu0  ;;  %v486_v53 = vmax.f32 %v444_v43, 0.0 }
 0x120   :  { %v9098_v32 = vpack.c.bf16 %v462_v19, %v461_v23  ;;  %v329_v33 = vadd.f32 %v9073_v52, %v328_v28  ;;  %1167 = vmatpush1.bf16.msra.mxu1 %v8394_v12  ;;  %1360 = vmatpush1.bf16.msra.mxu0 %v8403_v18  ;;  %v485_v57 = vmax.f32 %v439_v48, 0.0  ;;  %v7863_v58 = vpop.f32.mrb[6].mxu1 }
 0x121   :  { %v464_v37 = vmax.f32 %v334_v27, 0.0  ;;  %1168 = vmatprep.subr.bf16.mxu1 %v8402_v17  ;;  %1361 = vmatprep.subr.bf16.mxu0 %v8408_v22  ;;  %v454_v61 = vadd.f32 %v7863_v58, %v9073_v52  ;;  %v448_v63 = vpop.f32.mrb[7].mxu1 }
 0x122   :  { %6552 = vmatmul.mubr.msk.bf16.gmra.mrb[12].mxu1 %vm729_vm1, %v9090_v14  ;;  %6568 = vmatmul.mubr.msk.bf16.gmra.mrb[28].mxu0 %vm729_vm1, %v9090_v14  ;;  %v463_v41 = vmax.f32 %v329_v33, 0.0  ;;  %v7830_v42 = vpop.f32.mrb[8].mxu0  ;;  %v9117_v2 = vpack.c.bf16 %v486_v53, %v485_v57  ;;  %v449_v3 = vadd.f32 %v9073_v52, %v448_v63  ;;  %v8417_v63 = vld [vmem:[#allocation3 + $0xb0] ss:$36 sps:$4 sm:$0xff]  }
 0x123   :  { %830 = vmatprep.mubr.bf16.mxu1 %v11823_v49  ;;  %1023 = vmatprep.mubr.bf16.mxu0 %v11823_v49  ;;  %v344_v45 = vadd.f32 %v7830_v42, %v9073_v52  ;;  %v338_v46 = vpop.f32.mrb[9].mxu0  ;;  %v488_v6 = vmax.f32 %v454_v61, 0.0  ;;  %v8416_v61 = vld [vmem:[#allocation3 + $0x68] ss:$36 sps:$4 sm:$0xff]  }
 0x124   :  { %v9112_v50 = vpack.c.bf16 %v464_v37, %v463_v41  ;;  %v339_v51 = vadd.f32 %v9073_v52, %v338_v46  ;;  %1169 = vmatpush1.bf16.msra.mxu1 %v8400_v31  ;;  %1362 = vmatpush1.bf16.msra.mxu0 %v8406_v35  ;;  %v487_v8 = vmax.f32 %v449_v3, 0.0 }
 0x125   :  { %v466_v56 = vmax.f32 %v344_v45, 0.0  ;;  %1170 = vmatprep.subr.bf16.mxu1 %v8411_v36  ;;  %1363 = vmatprep.subr.bf16.mxu0 %v8414_v40 }
 0x126   :  { %v465_v59 = vmax.f32 %v339_v51, 0.0  ;;  %v7833_v60 = vpop.f32.mrb[10].mxu0  ;;  %v9130_v13 = vpack.c.bf16 %v488_v6, %v487_v8 }
 0x127   :  { %v354_v0 = vadd.f32 %v7833_v60, %v9073_v52  ;;  %v348_v1 = vpop.f32.mrb[11].mxu0 }
 0x128   :  { %v9120_v4 = vpack.c.bf16 %v466_v56, %v465_v59  ;;  %v349_v5 = vadd.f32 %v9073_v52, %v348_v1  ;;  %1171 = vmatpush1.bf16.msra.mxu1 %v8409_v54  ;;  %1364 = vmatpush1.bf16.msra.mxu0 %v8412_v55 }
 0x129   :  { %v468_v7 = vmax.f32 %v354_v0, 0.0  ;;  %v8418_v0 = vld [vmem:[#allocation3 + $0xf8] ss:$36 sps:$4 sm:$0xff]  }
 0x12a   :  { %6553 = vmatmul.mubr.msk.bf16.gmra.mrb[16].mxu1 %vm729_vm1, %v9098_v32  ;;  %6569 = vmatmul.mubr.msk.bf16.gmra.mrb[32].mxu0 %vm729_vm1, %v9098_v32  ;;  %v467_v9 = vmax.f32 %v349_v5, 0.0  ;;  %v7836_v10 = vpop.f32.mrb[12].mxu0 }
 0x12b   :  { %840 = vmatprep.mubr.bf16.mxu1 %v11823_v49  ;;  %1033 = vmatprep.mubr.bf16.mxu0 %v11823_v49  ;;  %v364_v11 = vadd.f32 %v7836_v10, %v9073_v52  ;;  %v358_v12 = vpop.f32.mrb[13].mxu0 }
 0x12c   :  { %v9132_v15 = vpack.c.bf16 %v468_v7, %v467_v9  ;;  %v359_v16 = vadd.f32 %v9073_v52, %v358_v12 }
 0x12d   :  { %v470_v17 = vmax.f32 %v364_v11, 0.0 }
 0x12e   :  { %v469_v18 = vmax.f32 %v359_v16, 0.0  ;;  %v7839_v19 = vpop.f32.mrb[14].mxu0 }
 0x12f   :  { %v374_v20 = vadd.f32 %v7839_v19, %v9073_v52  ;;  %v368_v21 = vpop.f32.mrb[15].mxu0 }
 0x130   :  { %v9136_v22 = vpack.c.bf16 %v470_v17, %v469_v18  ;;  %v369_v23 = vadd.f32 %v9073_v52, %v368_v21  ;;  %v8424_v17 = vld [vmem:[%s11809_s4 + $0x5c] ss:$8 sps:$4 sm:$0xff]  }
 0x131   :  { %v472_v24 = vmax.f32 %v374_v20, 0.0 }
 0x132   :  { %6554 = vmatmul.mubr.msk.bf16.gmra.mrb[20].mxu1 %vm729_vm1, %v9112_v50  ;;  %6570 = vmatmul.mubr.msk.bf16.gmra.mrb[36].mxu0 %vm729_vm1, %v9112_v50  ;;  %v471_v25 = vmax.f32 %v369_v23, 0.0  ;;  %v7842_v26 = vpop.f32.mrb[16].mxu0 }
 0x133   :  { %850 = vmatprep.mubr.bf16.mxu1 %v11823_v49  ;;  %1043 = vmatprep.mubr.bf16.mxu0 %v11823_v49  ;;  %v384_v27 = vadd.f32 %v7842_v26, %v9073_v52  ;;  %v378_v28 = vpop.f32.mrb[17].mxu0 }
 0x134   :  { %v9146_v30 = vpack.c.bf16 %v472_v24, %v471_v25  ;;  %v379_v31 = vadd.f32 %v9073_v52, %v378_v28 }
 0x135   :  { %v474_v33 = vmax.f32 %v384_v27, 0.0 }
 0x136   :  { %v473_v34 = vmax.f32 %v379_v31, 0.0  ;;  %v7845_v35 = vpop.f32.mrb[18].mxu0 }
 0x137   :  { %v394_v36 = vadd.f32 %v7845_v35, %v9073_v52  ;;  %v388_v37 = vpop.f32.mrb[19].mxu0 }
 0x138   :  { %v9150_v38 = vpack.c.bf16 %v474_v33, %v473_v34  ;;  %v389_v39 = vadd.f32 %v9073_v52, %v388_v37 }
 0x139   :  { %v476_v40 = vmax.f32 %v394_v36, 0.0 }
 0x13a   :  { %6555 = vmatmul.mubr.msk.bf16.gmra.mrb[24].mxu1 %vm729_vm1, %v9120_v4  ;;  %6571 = vmatmul.mubr.msk.bf16.gmra.mrb[40].mxu0 %vm729_vm1, %v9120_v4  ;;  %v475_v41 = vmax.f32 %v389_v39, 0.0  ;;  %v7848_v42 = vpop.f32.mrb[20].mxu0 }
 0x13b   :  { %860 = vmatprep.mubr.bf16.mxu1 %v11823_v49  ;;  %1053 = vmatprep.mubr.bf16.mxu0 %v11823_v49  ;;  %v404_v43 = vadd.f32 %v7848_v42, %v9073_v52  ;;  %v398_v44 = vpop.f32.mrb[21].mxu0 }
 0x13c   :  { %v9160_v45 = vpack.c.bf16 %v476_v40, %v475_v41  ;;  %v399_v46 = vadd.f32 %v9073_v52, %v398_v44 }
 0x13d   :  { %v478_v48 = vmax.f32 %v404_v43, 0.0 }
 0x13e   :  { %v477_v51 = vmax.f32 %v399_v46, 0.0  ;;  %v7851_v53 = vpop.f32.mrb[22].mxu0 }
 0x13f   :  { %v414_v54 = vadd.f32 %v7851_v53, %v9073_v52  ;;  %v408_v55 = vpop.f32.mrb[23].mxu0 }
 0x140   :  { %v9164_v56 = vpack.c.bf16 %v478_v48, %v477_v51  ;;  %v409_v57 = vadd.f32 %v9073_v52, %v408_v55  ;;  %v8415_v52 = vld [vmem:[#allocation3 + $0x20] ss:$36 sps:$4 sm:$0xff]  }
 0x141   :  { %v480_v58 = vmax.f32 %v414_v54, 0.0  ;;  %7864 = vmatprep.subr.bf16.mxu1 %v8415_v52 }
 0x142   :  { %6556 = vmatmul.mubr.msk.bf16.gmra.mrb[28].mxu1 %vm729_vm1, %v9132_v15  ;;  %6572 = vmatmul.mubr.msk.bf16.gmra.mrb[44].mxu0 %vm729_vm1, %v9132_v15  ;;  %v479_v59 = vmax.f32 %v409_v57, 0.0 }
 0x143   :  { %870 = vmatprep.mubr.bf16.mxu1 %v11823_v49  ;;  %1063 = vmatprep.mubr.bf16.mxu0 %v11823_v49 }
 0x144   :  { %v9173_v60 = vpack.c.bf16 %v480_v58, %v479_v59 }
 0x14a   :  { %6557 = vmatmul.mubr.msk.bf16.gmra.mrb[32].mxu1 %vm729_vm1, %v9136_v22  ;;  %6573 = vmatmul.mubr.msk.bf16.gmra.mrb[48].mxu0 %vm729_vm1, %v9136_v22 }
 0x14b   :  { %880 = vmatprep.mubr.bf16.mxu1 %v11823_v49  ;;  %1073 = vmatprep.mubr.bf16.mxu0 %v11823_v49 }
 0x152   :  { %6558 = vmatmul.mubr.msk.bf16.gmra.mrb[36].mxu1 %vm729_vm1, %v9146_v30  ;;  %6574 = vmatmul.mubr.msk.bf16.gmra.mrb[52].mxu0 %vm729_vm1, %v9146_v30 }
 0x153   :  { %890 = vmatprep.mubr.bf16.mxu1 %v11823_v49  ;;  %1083 = vmatprep.mubr.bf16.mxu0 %v11823_v49 }
 0x15a   :  { %6559 = vmatmul.mubr.msk.bf16.gmra.mrb[40].mxu1 %vm729_vm1, %v9150_v38  ;;  %6575 = vmatmul.mubr.msk.bf16.gmra.mrb[56].mxu0 %vm729_vm1, %v9150_v38 }
 0x15b   :  { %900 = vmatprep.mubr.bf16.mxu1 %v11823_v49  ;;  %1093 = vmatprep.mubr.bf16.mxu0 %v11823_v49 }
 0x162   :  { %6560 = vmatmul.mubr.msk.bf16.gmra.mrb[44].mxu1 %vm729_vm1, %v9160_v45  ;;  %6576 = vmatmul.mubr.msk.bf16.gmra.mrb[60].mxu0 %vm729_vm1, %v9160_v45 }
 0x163   :  { %910 = vmatprep.mubr.bf16.mxu1 %v11823_v49  ;;  %1103 = vmatprep.mubr.bf16.mxu0 %v11823_v49 }
 0x16a   :  { %6561 = vmatmul.mubr.msk.bf16.gmra.mrb[48].mxu1 %vm729_vm1, %v9164_v56  ;;  %6577 = vmatmul.mubr.msk.bf16.gmra.mrb[64].mxu0 %vm729_vm1, %v9164_v56 }
 0x16b   :  { %920 = vmatprep.mubr.bf16.mxu1 %v11823_v49  ;;  %1113 = vmatprep.mubr.bf16.mxu0 %v11823_v49 }
 0x172   :  { %6562 = vmatmul.mubr.msk.bf16.gmra.mrb[52].mxu1 %vm729_vm1, %v9173_v60  ;;  %6578 = vmatmul.mubr.msk.bf16.gmra.mrb[68].mxu0 %vm729_vm1, %v9173_v60 }
 0x173   :  { %930 = vmatprep.mubr.bf16.mxu1 %v11823_v49  ;;  %1123 = vmatprep.mubr.bf16.mxu0 %v11823_v49 }
 0x17a   :  { %6563 = vmatmul.mubr.msk.bf16.gmra.mrb[56].mxu1 %vm729_vm1, %v9095_v29  ;;  %6579 = vmatmul.mubr.msk.bf16.gmra.mrb[72].mxu0 %vm729_vm1, %v9095_v29 }
 0x17b   :  { %940 = vmatprep.mubr.bf16.mxu1 %v11823_v49  ;;  %1133 = vmatprep.mubr.bf16.mxu0 %v11823_v49 }
 0x182   :  { %6564 = vmatmul.mubr.msk.bf16.gmra.mrb[60].mxu1 %vm729_vm1, %v9109_v47  ;;  %6580 = vmatmul.mubr.msk.bf16.gmra.mrb[76].mxu0 %vm729_vm1, %v9109_v47 }
 0x183   :  { %950 = vmatprep.mubr.bf16.mxu1 %v11823_v49  ;;  %1143 = vmatprep.mubr.bf16.mxu0 %v11823_v49 }
 0x18a   :  { %6565 = vmatmul.mubr.msk.bf16.gmra.mrb[64].mxu1 %vm729_vm1, %v9117_v2  ;;  %6581 = vmatmul.mubr.msk.bf16.gmra.mrb[80].mxu0 %vm729_vm1, %v9117_v2 }
 0x18b   :  { %960 = vmatprep.mubr.bf16.mxu1 %v11823_v49  ;;  %1153 = vmatprep.mubr.bf16.mxu0 %v11823_v49 }
 0x192   :  { %6566 = vmatmul.mubr.msk.bf16.gmra.mrb[68].mxu1 %vm729_vm1, %v9130_v13  ;;  %6582 = vmatmul.mubr.msk.bf16.gmra.mrb[84].mxu0 %vm729_vm1, %v9130_v13 }
 0x193   :  { %1196 = vmatprep.mubr.bf16.mxu1 %v11823_v49  ;;  %1389 = vmatprep.mubr.bf16.mxu0 %v11823_v49 }
 0x19a   :  { %6583 = vmatmul.mubr.msk.bf16.vlgmr.msra.gmra.mrb[72].mxu1 %vm729_vm1, %v9078_v62  ;;  %6599 = vmatmul.mubr.msk.bf16.vlgmr.msra.gmra.mrb[88].mxu0 %vm729_vm1, %v9078_v62 }
 0x19b   :  { %1206 = vmatprep.mubr.bf16.mxu1 %v11823_v49  ;;  %1399 = vmatprep.mubr.bf16.mxu0 %v11823_v49 }
 0x19c   :  { %7865 = vmatpush3.bf16.msra.mxu1 %v8415_v52 }
 0x19d   :  { %7866 = vmatprep.subr.bf16.mxu1 %v8416_v61 }
 0x1a0   :  { %7867 = vmatpush3.bf16.msra.mxu1 %v8416_v61 }
 0x1a1   :  { %7868 = vmatprep.subr.bf16.mxu1 %v8417_v63 }
 0x1a2   :  { %6584 = vmatmul.mubr.msk.bf16.gmra.mrb[76].mxu1 %vm729_vm1, %v9090_v14  ;;  %6600 = vmatmul.mubr.msk.bf16.gmra.mrb[92].mxu0 %vm729_vm1, %v9090_v14 }
 0x1a3   :  { %1216 = vmatprep.mubr.bf16.mxu1 %v11823_v49  ;;  %1409 = vmatprep.mubr.bf16.mxu0 %v11823_v49 }
 0x1a4   :  { %7869 = vmatpush3.bf16.msra.mxu1 %v8417_v63 }
 0x1a5   :  { %7870 = vmatprep.subr.bf16.mxu1 %v8418_v0 }
 0x1a8   :  { %7871 = vmatpush3.bf16.msra.mxu1 %v8418_v0 }
 0x1aa   :  { %6585 = vmatmul.mubr.msk.bf16.gmra.mrb[80].mxu1 %vm729_vm1, %v9098_v32  ;;  %6601 = vmatmul.mubr.msk.bf16.gmra.mrb[96].mxu0 %vm729_vm1, %v9098_v32 }
 0x1ab   :  { %1226 = vmatprep.mubr.bf16.mxu1 %v11823_v49  ;;  %1419 = vmatprep.mubr.bf16.mxu0 %v11823_v49 }
 0x1b2   :  { %6586 = vmatmul.mubr.msk.bf16.gmra.mrb[84].mxu1 %vm729_vm1, %v9112_v50  ;;  %6602 = vmatmul.mubr.msk.bf16.gmra.mrb[100].mxu0 %vm729_vm1, %v9112_v50 }
 0x1b3   :  { %1236 = vmatprep.mubr.bf16.mxu1 %v11823_v49  ;;  %1429 = vmatprep.mubr.bf16.mxu0 %v11823_v49 }
 0x1ba   :  { %6587 = vmatmul.mubr.msk.bf16.gmra.mrb[88].mxu1 %vm729_vm1, %v9120_v4  ;;  %6603 = vmatmul.mubr.msk.bf16.gmra.mrb[104].mxu0 %vm729_vm1, %v9120_v4 }
 0x1bb   :  { %1246 = vmatprep.mubr.bf16.mxu1 %v11823_v49  ;;  %1439 = vmatprep.mubr.bf16.mxu0 %v11823_v49 }
 0x1c2   :  { %6588 = vmatmul.mubr.msk.bf16.gmra.mrb[92].mxu1 %vm729_vm1, %v9132_v15  ;;  %6604 = vmatmul.mubr.msk.bf16.gmra.mrb[108].mxu0 %vm729_vm1, %v9132_v15 }
 0x1c3   :  { %1256 = vmatprep.mubr.bf16.mxu1 %v11823_v49  ;;  %1449 = vmatprep.mubr.bf16.mxu0 %v11823_v49 }
 0x1ca   :  { %6589 = vmatmul.mubr.msk.bf16.gmra.mrb[96].mxu1 %vm729_vm1, %v9136_v22  ;;  %6605 = vmatmul.mubr.msk.bf16.gmra.mrb[112].mxu0 %vm729_vm1, %v9136_v22 }
 0x1cb   :  { %1266 = vmatprep.mubr.bf16.mxu1 %v11823_v49  ;;  %1459 = vmatprep.mubr.bf16.mxu0 %v11823_v49 }
 0x1d2   :  { %6590 = vmatmul.mubr.msk.bf16.gmra.mrb[100].mxu1 %vm729_vm1, %v9146_v30  ;;  %6606 = vmatmul.mubr.msk.bf16.gmra.mrb[116].mxu0 %vm729_vm1, %v9146_v30 }
 0x1d3   :  { %1276 = vmatprep.mubr.bf16.mxu1 %v11823_v49  ;;  %1469 = vmatprep.mubr.bf16.mxu0 %v11823_v49 }
 0x1da   :  { %6591 = vmatmul.mubr.msk.bf16.gmra.mrb[104].mxu1 %vm729_vm1, %v9150_v38  ;;  %6607 = vmatmul.mubr.msk.bf16.gmra.mrb[120].mxu0 %vm729_vm1, %v9150_v38 }
 0x1db   :  { %1286 = vmatprep.mubr.bf16.mxu1 %v11823_v49  ;;  %1479 = vmatprep.mubr.bf16.mxu0 %v11823_v49 }
 0x1e2   :  { %6592 = vmatmul.mubr.msk.bf16.gmra.mrb[108].mxu1 %vm729_vm1, %v9160_v45  ;;  %6608 = vmatmul.mubr.msk.bf16.gmra.mrb[124].mxu0 %vm729_vm1, %v9160_v45 }
 0x1e3   :  { %1296 = vmatprep.mubr.bf16.mxu1 %v11823_v49  ;;  %1489 = vmatprep.mubr.bf16.mxu0 %v11823_v49 }
 0x1ea   :  { %6593 = vmatmul.mubr.msk.bf16.gmra.mrb[112].mxu1 %vm729_vm1, %v9164_v56  ;;  %6609 = vmatmul.mubr.msk.bf16.gmra.mrb[128].mxu0 %vm729_vm1, %v9164_v56 }
 0x1eb   :  { %1306 = vmatprep.mubr.bf16.mxu1 %v11823_v49  ;;  %1499 = vmatprep.mubr.bf16.mxu0 %v11823_v49 }
 0x1ed   :  { %v9301_v1 = vpop.f32.mrb[8].mxu1  ;;  %v9303_v3 = vpop.f32.mrb[24].mxu0 }
 0x1ee   :  { %v9305_v5 = vpop.f32.mrb[9].mxu1  ;;  %v9307_v6 = vpop.f32.mrb[25].mxu0 }
 0x1ef   :  { %v9309_v7 = vpop.f32.mrb[10].mxu1  ;;  %v9311_v8 = vpop.f32.mrb[26].mxu0 }
 0x1f0   :  { %v9317_v11 = vpop.f32.mrb[11].mxu1  ;;  %v9319_v12 = vpop.f32.mrb[27].mxu0 }
 0x1f2   :  { %6594 = vmatmul.mubr.msk.bf16.gmra.mrb[116].mxu1 %vm729_vm1, %v9173_v60  ;;  %6610 = vmatmul.mubr.msk.bf16.gmra.mrb[132].mxu0 %vm729_vm1, %v9173_v60 }
 0x1f3   :  { %1316 = vmatprep.mubr.bf16.mxu1 %v11823_v49  ;;  %1509 = vmatprep.mubr.bf16.mxu0 %v11823_v49 }
 0x1f5   :  { %v9331_v18 = vpop.f32.mrb[12].mxu1  ;;  %v9333_v19 = vpop.f32.mrb[28].mxu0 }
 0x1f6   :  { %v9335_v20 = vpop.f32.mrb[13].mxu1  ;;  %v9337_v21 = vpop.f32.mrb[29].mxu0 }
 0x1f7   :  { %v9339_v23 = vpop.f32.mrb[14].mxu1  ;;  %v9341_v24 = vpop.f32.mrb[30].mxu0 }
 0x1f8   :  { %v9347_v27 = vpop.f32.mrb[15].mxu1  ;;  %v9349_v28 = vpop.f32.mrb[31].mxu0 }
 0x1fa   :  { %6595 = vmatmul.mubr.msk.bf16.gmra.mrb[120].mxu1 %vm729_vm1, %v9095_v29  ;;  %6611 = vmatmul.mubr.msk.bf16.gmra.mrb[136].mxu0 %vm729_vm1, %v9095_v29 }
 0x1fb   :  { %1326 = vmatprep.mubr.bf16.mxu1 %v11823_v49  ;;  %1519 = vmatprep.mubr.bf16.mxu0 %v11823_v49 }
 0x1fd   :  { %v9361_v34 = vpop.f32.mrb[16].mxu1  ;;  %v9363_v35 = vpop.f32.mrb[32].mxu0 }
 0x1fe   :  { %11868 = vst [vmem:[#allocation10_spill] sm:$0xff] %v9363_v35  ;;  %v9365_v36 = vpop.f32.mrb[17].mxu1  ;;  %v9367_v37 = vpop.f32.mrb[33].mxu0 }
 0x1ff   :  { %v9369_v39 = vpop.f32.mrb[18].mxu1  ;;  %v9371_v40 = vpop.f32.mrb[34].mxu0 }
 0x200   :  { %11869 = vst [vmem:[#allocation11_spill] sm:$0xff] %v9371_v40  ;;  %v9377_v43 = vpop.f32.mrb[19].mxu1  ;;  %v9379_v44 = vpop.f32.mrb[35].mxu0 }
 0x202   :  { %6596 = vmatmul.mubr.msk.bf16.gmra.mrb[124].mxu1 %vm729_vm1, %v9109_v47  ;;  %6612 = vmatmul.mubr.msk.bf16.gmra.mrb[140].mxu0 %vm729_vm1, %v9109_v47 }
 0x203   :  { %1336 = vmatprep.mubr.bf16.mxu1 %v11823_v49  ;;  %1529 = vmatprep.mubr.bf16.mxu0 %v11823_v49 }
 0x205   :  { %v9391_v51 = vpop.f32.mrb[20].mxu1  ;;  %v9393_v53 = vpop.f32.mrb[36].mxu0 }
 0x206   :  { %11870 = vst [vmem:[#allocation12_spill] sm:$0xff] %v9393_v53  ;;  %v9395_v54 = vpop.f32.mrb[21].mxu1  ;;  %v9397_v55 = vpop.f32.mrb[37].mxu0 }
 0x207   :  { %11871 = vst [vmem:[#allocation13_spill] sm:$0xff] %v9397_v55  ;;  %v9399_v57 = vpop.f32.mrb[22].mxu1  ;;  %v9401_v58 = vpop.f32.mrb[38].mxu0 }
 0x208   :  { %11872 = vst [vmem:[#allocation14_spill] sm:$0xff] %v9401_v58  ;;  %v9407_v61 = vpop.f32.mrb[23].mxu1  ;;  %v9409_v63 = vpop.f32.mrb[39].mxu0 }
 0x209   :  { %11873 = vst [vmem:[#allocation15_spill] sm:$0xff] %v9409_v63 }
 0x20a   :  { %6597 = vmatmul.mubr.msk.bf16.gmra.mrb[128].mxu1 %vm729_vm1, %v9117_v2  ;;  %6613 = vmatmul.mubr.msk.bf16.gmra.mrb[144].mxu0 %vm729_vm1, %v9117_v2 }
 0x20b   :  { %1346 = vmatprep.mubr.bf16.mxu1 %v11823_v49  ;;  %1539 = vmatprep.mubr.bf16.mxu0 %v11823_v49 }
 0x20d   :  { %v9421_v52 = vpop.f32.mrb[24].mxu1  ;;  %v9423_v48 = vpop.f32.mrb[40].mxu0 }
 0x20e   :  { %11874 = vst [vmem:[#allocation16_spill] sm:$0xff] %v9423_v48  ;;  %v9425_v26 = vpop.f32.mrb[25].mxu1  ;;  %v9427_v33 = vpop.f32.mrb[41].mxu0 }
 0x20f   :  { %11875 = vst [vmem:[#allocation17_spill] sm:$0xff] %v9427_v33  ;;  %v9429_v10 = vpop.f32.mrb[26].mxu1  ;;  %v9431_v42 = vpop.f32.mrb[42].mxu0 }
 0x210   :  { %11876 = vst [vmem:[#allocation18_spill] sm:$0xff] %v9431_v42  ;;  %v9440_v59 = vpop.f32.mrb[27].mxu1  ;;  %v9442_v46 = vpop.f32.mrb[43].mxu0 }
 0x211   :  { %11877 = vst [vmem:[#allocation19_spill] sm:$0xff] %v9442_v46 }
 0x212   :  { %6598 = vmatmul.mubr.msk.bf16.gmra.mrb[132].mxu1 %vm729_vm1, %v9130_v13  ;;  %6614 = vmatmul.mubr.msk.bf16.gmra.mrb[148].mxu0 %vm729_vm1, %v9130_v13 }
 0x213   :  { %7872 = vmatprep.mubr.msk.bf16.mxu1 %vm729_vm1, %v9078_v62  ;;  %1967 = vmatprep.mubr.bf16.mxu0 %v8424_v17 }
 0x215   :  { %v9454_v49 = vpop.f32.mrb[28].mxu1  ;;  %v9456_v0 = vpop.f32.mrb[44].mxu0 }
 0x216   :  { %11878 = vst [vmem:[#allocation20_spill] sm:$0xff] %v9456_v0  ;;  %v9458_v25 = vpop.f32.mrb[29].mxu1  ;;  %v9460_v41 = vpop.f32.mrb[45].mxu0 }
 0x217   :  { %11879 = vst [vmem:[#allocation21_spill] sm:$0xff] %v9460_v41  ;;  %v9462_v16 = vpop.f32.mrb[30].mxu1  ;;  %v9464_v31 = vpop.f32.mrb[46].mxu0 }
 0x218   :  { %11880 = vst [vmem:[#allocation22_spill] sm:$0xff] %v9464_v31  ;;  %v9470_v62 = vpop.f32.mrb[31].mxu1  ;;  %v9472_v17 = vpop.f32.mrb[47].mxu0 }
 0x219   :  { %11881 = vst [vmem:[#allocation23_spill] sm:$0xff] %v9472_v17 }
 0x21a   :  { %7873 = vmatmul.mubr.msk.bf16.vlgmr.msra.gmra.mrb[136].mxu1 %vm729_vm1, %v9090_v14 }
 0x21b   :  { %7876 = vmatprep.mubr.msk.bf16.mxu1 %vm729_vm1, %v9098_v32 }
 0x21d   :  { %v9482_v9 = vpop.f32.mrb[32].mxu1  ;;  %v9484_v46 = vpop.f32.mrb[48].mxu0 }
 0x21e   :  { %11882 = vst [vmem:[#allocation24_spill] sm:$0xff] %v9484_v46  ;;  %v9486_v48 = vpop.f32.mrb[33].mxu1  ;;  %v9488_v0 = vpop.f32.mrb[49].mxu0 }
 0x21f   :  { %11883 = vst [vmem:[#allocation25_spill] sm:$0xff] %v9488_v0  ;;  %v9490_v31 = vpop.f32.mrb[34].mxu1  ;;  %v9492_v42 = vpop.f32.mrb[50].mxu0 }
 0x220   :  { %11884 = vst [vmem:[#allocation26_spill] sm:$0xff] %v9492_v42  ;;  %v9498_v41 = vpop.f32.mrb[35].mxu1  ;;  %v9500_v32 = vpop.f32.mrb[51].mxu0 }
 0x221   :  { %11885 = vst [vmem:[#allocation27_spill] sm:$0xff] %v9500_v32 }
 0x222   :  { %7877 = vmatmul.mubr.msk.bf16.gmra.mrb[140].mxu1 %vm729_vm1, %v9112_v50 }
 0x223   :  { %7880 = vmatprep.mubr.msk.bf16.mxu1 %vm729_vm1, %v9120_v4 }
 0x225   :  { %v9510_v33 = vpop.f32.mrb[36].mxu1  ;;  %v9512_v58 = vpop.f32.mrb[52].mxu0 }
 0x226   :  { %11886 = vst [vmem:[#allocation28_spill] sm:$0xff] %v9512_v58  ;;  %v9514_v14 = vpop.f32.mrb[37].mxu1  ;;  %v9516_v46 = vpop.f32.mrb[53].mxu0 }
 0x227   :  { %11887 = vst [vmem:[#allocation29_spill] sm:$0xff] %v9516_v46  ;;  %v9518_v42 = vpop.f32.mrb[38].mxu1  ;;  %v9520_v17 = vpop.f32.mrb[54].mxu0 }
 0x228   :  { %11888 = vst [vmem:[#allocation30_spill] sm:$0xff] %v9520_v17  ;;  %v9526_v0 = vpop.f32.mrb[39].mxu1  ;;  %v9528_v4 = vpop.f32.mrb[55].mxu0 }
 0x229   :  { %11889 = vst [vmem:[#allocation31_spill] sm:$0xff] %v9528_v4 }
 0x22a   :  { %7881 = vmatmul.mubr.msk.bf16.gmra.mrb[144].mxu1 %vm729_vm1, %v9132_v15 }
 0x22b   :  { %7884 = vmatprep.mubr.msk.bf16.mxu1 %vm729_vm1, %v9136_v22 }
 0x22d   :  { %v892_v53 = vpop.f32.mrb[40].mxu1  ;;  %v9538_v63 = vpop.f32.mrb[56].mxu0 }
 0x22e   :  { %v894_v50 = vpop.f32.mrb[41].mxu1  ;;  %v9540_v58 = vpop.f32.mrb[57].mxu0 }
 0x22f   :  { %v896_v17 = vpop.f32.mrb[42].mxu1  ;;  %v9542_v35 = vpop.f32.mrb[58].mxu0 }
 0x230   :  { %v1783_v40 = vpack.c.bf16 %v896_v17, %v892_v53  ;;  %v898_v55 = vpop.f32.mrb[43].mxu1  ;;  %v9546_v46 = vpop.f32.mrb[59].mxu0  ;;  %v11890_v53 = vpack.c.bf16 %v9309_v7, %v9301_v1  ;;  %v11891_v17 = vpack.c.bf16 %v9317_v11, %v9305_v5  ;;  %v11892_v11 = vpack.c.bf16 %v9339_v23, %v9331_v18 }
 0x231   :  { %v1784_v15 = vpack.c.bf16 %v898_v55, %v894_v50 }
 0x232   :  { %7885 = vmatmul.mubr.msk.bf16.gmra.mrb[148].mxu1 %vm729_vm1, %v9146_v30  ;;  %7183 = vmatprep.subr.bf16.mxu1 %v1783_v40 }
 0x233   :  { %7888 = vmatprep.mubr.msk.bf16.mxu1 %vm729_vm1, %v9150_v38  ;;  %7131 = vmatprep.subr.bf16.mxu0 %v1784_v15 }
 0x234   :  { %7184 = vmatpush3.bf16.msra.mxu1 %v11890_v53  ;;  %7132 = vmatpush3.bf16.msra.mxu0 %v11891_v17  ;;  %v11893_v53 = vpack.c.bf16 %v9347_v27, %v9335_v20  ;;  %v11894_v27 = vpack.c.bf16 %v9369_v39, %v9361_v34 }
 0x235   :  { %v902_v55 = vpop.f32.mrb[44].mxu1  ;;  %v9560_v50 = vpop.f32.mrb[60].mxu0 }
 0x236   :  { %v904_v32 = vpop.f32.mrb[45].mxu1  ;;  %v9562_v22 = vpop.f32.mrb[61].mxu0 }
 0x237   :  { %v906_v30 = vpop.f32.mrb[46].mxu1  ;;  %v9564_v40 = vpop.f32.mrb[62].mxu0 }
 0x238   :  { %v1792_v4 = vpack.c.bf16 %v906_v30, %v902_v55  ;;  %v908_v38 = vpop.f32.mrb[47].mxu1  ;;  %v1794_v15 = vpack.c.bf16 %v9564_v40, %v9560_v50  ;;  %v9568_v1 = vpop.f32.mrb[63].mxu0 }
 0x239   :  { %v1793_v7 = vpack.c.bf16 %v908_v38, %v904_v32  ;;  %v1795_v5 = vpack.c.bf16 %v9568_v1, %v9562_v22  ;;  %v8427_v22 = vld [vmem:[%s11809_s4 + $0x68] ss:$8 sps:$4 sm:$0xff]   ;;  %v11911_v1 = vpack.c.bf16 %v9341_v24, %v9333_v19  ;;  %v8434_v24 = vld [vmem:[%s11809_s4 + $0x24] ss:$8 sps:$4 sm:$0xff]  }
 0x23a   :  { %7889 = vmatmul.mubr.msk.bf16.gmra.mrb[152].mxu1 %vm729_vm1, %v9160_v45  ;;  %7185 = vmatprep.subr.bf16.mxu1 %v1792_v4 }
 0x23b   :  { %7892 = vmatprep.mubr.msk.bf16.mxu1 %vm729_vm1, %v9164_v56  ;;  %7133 = vmatprep.subr.bf16.mxu0 %v1793_v7 }
 0x23c   :  { %7186 = vmatpush3.bf16.msra.mxu1 %v11892_v11  ;;  %7134 = vmatpush3.bf16.msra.mxu0 %v11893_v53  ;;  %v11895_v11 = vpack.c.bf16 %v9377_v43, %v9365_v36  ;;  %v11896_v43 = vpack.c.bf16 %v9399_v57, %v9391_v51 }
 0x23d   :  { %v912_v32 = vpop.f32.mrb[48].mxu1  ;;  %v9582_v17 = vpop.f32.mrb[64].mxu0 }
 0x23e   :  { %v914_v55 = vpop.f32.mrb[49].mxu1  ;;  %v9584_v30 = vpop.f32.mrb[65].mxu0 }
 0x23f   :  { %v916_v45 = vpop.f32.mrb[50].mxu1  ;;  %v9586_v4 = vpop.f32.mrb[66].mxu0 }
 0x240   :  { %v1801_v38 = vpack.c.bf16 %v916_v45, %v912_v32  ;;  %v918_v56 = vpop.f32.mrb[51].mxu1  ;;  %v1803_v7 = vpack.c.bf16 %v9586_v4, %v9582_v17  ;;  %v9590_v18 = vpop.f32.mrb[67].mxu0  ;;  %v11912_v17 = vpack.c.bf16 %v9379_v44, %v9367_v37  ;;  %v8462_v4 = vld [vmem:[%s11809_s4 + $0x11c] ss:$8 sps:$4 sm:$0xff]  }
 0x241   :  { %v1802_v23 = vpack.c.bf16 %v918_v56, %v914_v55  ;;  %v1804_v20 = vpack.c.bf16 %v9590_v18, %v9584_v30 }
 0x242   :  { %7893 = vmatmul.mubr.msk.bf16.gmra.mrb[156].mxu1 %vm729_vm1, %v9173_v60  ;;  %7187 = vmatprep.subr.bf16.mxu1 %v1801_v38 }
 0x243   :  { %7896 = vmatprep.mubr.msk.bf16.mxu1 %vm729_vm1, %v9095_v29  ;;  %7135 = vmatprep.subr.bf16.mxu0 %v1802_v23 }
 0x244   :  { %7188 = vmatpush3.bf16.msra.mxu1 %v11894_v27  ;;  %7136 = vmatpush3.bf16.msra.mxu0 %v11895_v11  ;;  %v11897_v27 = vpack.c.bf16 %v9407_v61, %v9395_v54  ;;  %v8421_v54 = vld [vmem:[%s11809_s4 + $0x4] ss:$8 sps:$4 sm:$0xff]  }
 0x245   :  { %v922_v53 = vpop.f32.mrb[52].mxu1  ;;  %v9604_v32 = vpop.f32.mrb[68].mxu0 }
 0x246   :  { %v924_v55 = vpop.f32.mrb[53].mxu1  ;;  %v9606_v45 = vpop.f32.mrb[69].mxu0 }
 0x247   :  { %v926_v60 = vpop.f32.mrb[54].mxu1  ;;  %v9608_v38 = vpop.f32.mrb[70].mxu0 }
 0x248   :  { %v1810_v56 = vpack.c.bf16 %v926_v60, %v922_v53  ;;  %v928_v29 = vpop.f32.mrb[55].mxu1  ;;  %v1812_v23 = vpack.c.bf16 %v9608_v38, %v9604_v32  ;;  %v9612_v34 = vpop.f32.mrb[71].mxu0 }
 0x249   :  { %v1811_v39 = vpack.c.bf16 %v928_v29, %v924_v55  ;;  %v1813_v36 = vpack.c.bf16 %v9612_v34, %v9606_v45  ;;  %v8433_v34 = vld [vmem:[%s11809_s4 + $0x78] ss:$8 sps:$4 sm:$0xff]  }
 0x24a   :  { %7897 = vmatmul.mubr.msk.bf16.gmra.mrb[160].mxu1 %vm729_vm1, %v9109_v47  ;;  %7189 = vmatprep.subr.bf16.mxu1 %v1810_v56 }
 0x24b   :  { %7900 = vmatprep.mubr.msk.bf16.mxu1 %vm729_vm1, %v9117_v2  ;;  %7137 = vmatprep.subr.bf16.mxu0 %v1811_v39 }
 0x24c   :  { %7190 = vmatpush3.bf16.msra.mxu1 %v11896_v43  ;;  %7138 = vmatpush3.bf16.msra.mxu0 %v11897_v27  ;;  %v11898_v43 = vpack.c.bf16 %v9429_v10, %v9421_v52  ;;  %v11899_v27 = vpack.c.bf16 %v9440_v59, %v9425_v26  ;;  %v11900_v59 = vpack.c.bf16 %v9462_v16, %v9454_v49 }
 0x24d   :  { %v932_v11 = vpop.f32.mrb[56].mxu1  ;;  %v9626_v53 = vpop.f32.mrb[72].mxu0 }
 0x24e   :  { %v934_v55 = vpop.f32.mrb[57].mxu1  ;;  %v9628_v60 = vpop.f32.mrb[73].mxu0 }
 0x24f   :  { %v936_v47 = vpop.f32.mrb[58].mxu1  ;;  %v9630_v56 = vpop.f32.mrb[74].mxu0 }
 0x250   :  { %v1819_v29 = vpack.c.bf16 %v936_v47, %v932_v11  ;;  %v938_v2 = vpop.f32.mrb[59].mxu1  ;;  %v9634_v51 = vpop.f32.mrb[75].mxu0 }
 0x251   :  { %v1820_v57 = vpack.c.bf16 %v938_v2, %v934_v55  ;;  %v11922_v32 = vpack.c.bf16 %v9634_v51, %v9628_v60  ;;  %v8440_v60 = vld [vmem:[%s11809_s4 + $0x34] ss:$8 sps:$4 sm:$0xff]  }
 0x252   :  { %7901 = vmatmul.mubr.msk.bf16.gmra.mrb[164].mxu1 %vm729_vm1, %v9130_v13  ;;  %7191 = vmatprep.subr.bf16.mxu1 %v1819_v29 }
 0x253   :  { %7139 = vmatprep.subr.bf16.mxu0 %v1820_v57  ;;  %7192 = vmatpush3.bf16.msra.mxu1 %v11898_v43 }
 0x254   :  { %7140 = vmatpush3.bf16.msra.mxu0 %v11899_v27  ;;  %2104 = vmatprep.mubr.bf16.mxu1 %v8421_v54  ;;  %v11901_v54 = vpack.c.bf16 %v9470_v62, %v9458_v25  ;;  %v11902_v62 = vpack.c.bf16 %v9490_v31, %v9482_v9 }
 0x255   :  { %v942_v11 = vpop.f32.mrb[60].mxu1  ;;  %v9649_v47 = vpop.f32.mrb[76].mxu0 }
 0x256   :  { %v944_v55 = vpop.f32.mrb[61].mxu1  ;;  %v9651_v2 = vpop.f32.mrb[77].mxu0 }
 0x257   :  { %v946_v39 = vpop.f32.mrb[62].mxu1  ;;  %v9653_v61 = vpop.f32.mrb[78].mxu0 }
 0x258   :  { %v1828_v13 = vpack.c.bf16 %v946_v39, %v942_v11  ;;  %v948_v29 = vpop.f32.mrb[63].mxu1  ;;  %v9657_v52 = vpop.f32.mrb[79].mxu0 }
 0x259   :  { %v1829_v57 = vpack.c.bf16 %v948_v29, %v944_v55  ;;  %v1831_v26 = vpack.c.bf16 %v9657_v52, %v9651_v2  ;;  %v8439_v52 = vld [vmem:[%s11809_s4 + $0x88] ss:$8 sps:$4 sm:$0xff]  }
 0x25a   :  { %7193 = vmatprep.subr.bf16.mxu1 %v1828_v13 }
 0x25b   :  { %7141 = vmatprep.subr.bf16.mxu0 %v1829_v57  ;;  %7194 = vmatpush3.bf16.msra.mxu1 %v11900_v59  ;;  %v11903_v59 = vpack.c.bf16 %v9498_v41, %v9486_v48  ;;  %v8419_v48 = vld [vmem:[%s11809_s4] ss:$8 sps:$4 sm:$0xff]  }
 0x25c   :  { %7142 = vmatpush3.bf16.msra.mxu0 %v11901_v54 }
 0x25d   :  { %v952_v39 = vpop.f32.mrb[64].mxu1  ;;  %v9667_v43 = vpop.f32.mrb[80].mxu0 }
 0x25e   :  { %v954_v27 = vpop.f32.mrb[65].mxu1  ;;  %v9669_v11 = vpop.f32.mrb[81].mxu0 }
 0x25f   :  { %v956_v55 = vpop.f32.mrb[66].mxu1  ;;  %v9671_v29 = vpop.f32.mrb[82].mxu0 }
 0x260   :  { %v1837_v10 = vpack.c.bf16 %v956_v55, %v952_v39  ;;  %v958_v13 = vpop.f32.mrb[67].mxu1  ;;  %v9675_v49 = vpop.f32.mrb[83].mxu0 }
 0x261   :  { %v1838_v16 = vpack.c.bf16 %v958_v13, %v954_v27 }
 0x262   :  { %7195 = vmatprep.subr.bf16.mxu1 %v1837_v10 }
 0x263   :  { %7143 = vmatprep.subr.bf16.mxu0 %v1838_v16  ;;  %7196 = vmatpush3.bf16.msra.mxu1 %v11902_v62  ;;  %v11904_v62 = vpack.c.bf16 %v9518_v42, %v9510_v33  ;;  %v11907_v33 = vpack.c.bf16 %v9542_v35, %v9538_v63  ;;  %v8425_v42 = vld [vmem:[%s11809_s4 + $0x6c] ss:$8 sps:$4 sm:$0xff]   ;;  %v11908_v35 = vpack.c.bf16 %v9319_v12, %v9307_v6 }
 0x264   :  { %7144 = vmatpush3.bf16.msra.mxu0 %v11903_v59  ;;  %v8422_v59 = vld [vmem:[%s11809_s4 + $0x58] ss:$8 sps:$4 sm:$0xff]  }
 0x265   :  { %v962_v54 = vpop.f32.mrb[68].mxu1  ;;  %v9685_v39 = vpop.f32.mrb[84].mxu0 }
 0x266   :  { %v964_v55 = vpop.f32.mrb[69].mxu1  ;;  %v9687_v57 = vpop.f32.mrb[85].mxu0 }
 0x267   :  { %v966_v27 = vpop.f32.mrb[70].mxu1  ;;  %v9689_v13 = vpop.f32.mrb[86].mxu0 }
 0x268   :  { %v1846_v25 = vpack.c.bf16 %v966_v27, %v962_v54  ;;  %v968_v10 = vpop.f32.mrb[71].mxu1  ;;  %v1848_v16 = vpack.c.bf16 %v9689_v13, %v9685_v39  ;;  %v9693_v9 = vpop.f32.mrb[87].mxu0  ;;  %v11905_v54 = vpack.c.bf16 %v9526_v0, %v9514_v14  ;;  %v11951_v13 = vld [vmem:[#allocation30_spill] sm:$0xff] }
 0x269   :  { %v1847_v31 = vpack.c.bf16 %v968_v10, %v964_v55  ;;  %v1849_v41 = vpack.c.bf16 %v9693_v9, %v9687_v57  ;;  %v6641_v57 = vld [vmem:[%s11809_s4 + $0xa8] sm:$0x11] }
 0x26a   :  { %7197 = vmatprep.subr.bf16.mxu1 %v1846_v25  ;;  %v11906_v25 = vpack.c.bf16 %v9546_v46, %v9540_v58  ;;  %v8428_v46 = vld [vmem:[%s11809_s4 + $0x14] ss:$8 sps:$4 sm:$0xff]   ;;  %v8448_v9 = vld [vmem:[%s11809_s4 + $0x40] ss:$8 sps:$4 sm:$0xff]  }
 0x26b   :  { %7145 = vmatprep.subr.bf16.mxu0 %v1847_v31  ;;  %7198 = vmatpush3.bf16.msra.mxu1 %v11904_v62 }
 0x26c   :  { %7146 = vmatpush3.bf16.msra.mxu0 %v11905_v54  ;;  %7287 = vmatprep.subr.bf16.mxu1 %v11906_v25  ;;  %v11909_v54 = vpack.c.bf16 %v9311_v8, %v9303_v3  ;;  %v8430_v3 = vld [vmem:[%s11809_s4 + $0x10] ss:$8 sps:$4 sm:$0xff]   ;;  %v11910_v8 = vpack.c.bf16 %v9349_v28, %v9337_v21  ;;  %v8431_v21 = vld [vmem:[%s11809_s4 + $0x7c] ss:$8 sps:$4 sm:$0xff]  }
 0x26d   :  { %v9712_v55 = vpop.f32.mrb[72].mxu1  ;;  %v9714_v27 = vpop.f32.mrb[88].mxu0  ;;  %7235 = vmatprep.subr.bf16.mxu0 %v11907_v33  ;;  %v8436_v33 = vld [vmem:[%s11809_s4 + $0x20] ss:$8 sps:$4 sm:$0xff]  }
 0x26e   :  { %v9722_v10 = vpop.f32.mrb[73].mxu1  ;;  %v9724_v0 = vpop.f32.mrb[89].mxu0  ;;  %2105 = vmatmul.mubr.bf16.vlgmr.msra.gmra.mrb[168].mxu1 %v8419_v48 }
 0x26f   :  { %v9729_v58 = vpop.f32.mrb[74].mxu1  ;;  %v9731_v14 = vpop.f32.mrb[90].mxu0  ;;  %7288 = vmatpush3.bf16.msra.mxu1 %v11908_v35  ;;  %1968 = vmatmul.mubr.bf16.vlgmr.msra.gmra.mrb[152].mxu0 %v8422_v59  ;;  %v11914_v59 = vld [vmem:[#allocation10_spill] sm:$0xff]  ;;  %v11920_v35 = vld [vmem:[#allocation12_spill] sm:$0xff] }
 0x270   :  { %v9740_v48 = vpop.f32.mrb[75].mxu1  ;;  %v9742_v62 = vpop.f32.mrb[91].mxu0  ;;  %7236 = vmatpush3.bf16.msra.mxu0 %v11909_v54  ;;  %7289 = vmatprep.subr.bf16.mxu1 %v1795_v5 }
 0x271   :  { %7237 = vmatprep.subr.bf16.mxu0 %v1794_v15  ;;  %1975 = vmatprep.mubr.bf16.mxu0 %v8425_v42  ;;  %v11916_v42 = vld [vmem:[#allocation15_spill] sm:$0xff] }
 0x272   :  { %2112 = vmatprep.mubr.bf16.mxu1 %v8428_v46  ;;  %v11917_v46 = vld [vmem:[#allocation13_spill] sm:$0xff] }
 0x273   :  { %7290 = vmatpush3.bf16.msra.mxu1 %v11910_v8  ;;  %v11918_v45 = vpack.c.bf16 %v11916_v42, %v11917_v46  ;;  %v8437_v8 = vld [vmem:[%s11809_s4 + $0x8c] ss:$8 sps:$4 sm:$0xff]   ;;  %v11928_v42 = vld [vmem:[#allocation16_spill] sm:$0xff] }
 0x274   :  { %7238 = vmatpush3.bf16.msra.mxu0 %v11911_v1  ;;  %7291 = vmatprep.subr.bf16.mxu1 %v1804_v20  ;;  %v11913_v20 = vld [vmem:[#allocation11_spill] sm:$0xff] }
 0x275   :  { %v9772_v50 = vpop.f32.mrb[76].mxu1  ;;  %v9774_v40 = vpop.f32.mrb[92].mxu0  ;;  %7239 = vmatprep.subr.bf16.mxu0 %v1803_v7  ;;  %v11915_v25 = vpack.c.bf16 %v11913_v20, %v11914_v59 }
 0x276   :  { %v9782_v28 = vpop.f32.mrb[77].mxu1  ;;  %v9784_v19 = vpop.f32.mrb[93].mxu0  ;;  %2113 = vmatmul.mubr.bf16.gmra.mrb[172].mxu1 %v8430_v3  ;;  %v11923_v3 = vpack.c.bf16 %v9630_v56, %v9626_v53  ;;  %v11925_v53 = vld [vmem:[#allocation17_spill] sm:$0xff] }
 0x277   :  { %v9789_v15 = vpop.f32.mrb[78].mxu1  ;;  %v9791_v5 = vpop.f32.mrb[94].mxu0  ;;  %7292 = vmatpush3.bf16.msra.mxu1 %v11912_v17  ;;  %1976 = vmatmul.mubr.bf16.gmra.mrb[156].mxu0 %v8427_v22  ;;  %v8468_v17 = vld [vmem:[%s11809_s4 + $0x12c] ss:$8 sps:$4 sm:$0xff]  }
 0x278   :  { %v9800_v7 = vpop.f32.mrb[79].mxu1  ;;  %v9802_v18 = vpop.f32.mrb[95].mxu0  ;;  %7240 = vmatpush3.bf16.msra.mxu0 %v11915_v25  ;;  %7293 = vmatprep.subr.bf16.mxu1 %v1813_v36  ;;  %v11919_v36 = vld [vmem:[#allocation14_spill] sm:$0xff] }
 0x279   :  { %7241 = vmatprep.subr.bf16.mxu0 %v1812_v23  ;;  %1983 = vmatprep.mubr.bf16.mxu0 %v8431_v21  ;;  %v11921_v54 = vpack.c.bf16 %v11919_v36, %v11920_v35  ;;  %v11930_v36 = vpack.c.bf16 %v9653_v61, %v9649_v47  ;;  %v8442_v35 = vld [vmem:[%s11809_s4 + $0x30] ss:$8 sps:$4 sm:$0xff]   ;;  %v11937_v61 = vpack.c.bf16 %v9675_v49, %v9669_v11  ;;  %v8446_v11 = vld [vmem:[%s11809_s4 + $0x44] ss:$8 sps:$4 sm:$0xff]  }
 0x27a   :  { %2120 = vmatprep.mubr.bf16.mxu1 %v8434_v24  ;;  %v11924_v24 = vld [vmem:[#allocation19_spill] sm:$0xff] }
 0x27b   :  { %7294 = vmatpush3.bf16.msra.mxu1 %v11918_v45  ;;  %v11926_v56 = vpack.c.bf16 %v11924_v24, %v11925_v53  ;;  %v8443_v53 = vld [vmem:[%s11809_s4 + $0x9c] ss:$8 sps:$4 sm:$0xff]  }
 0x27c   :  { %7242 = vmatpush3.bf16.msra.mxu0 %v11921_v54  ;;  %7295 = vmatprep.subr.bf16.mxu1 %v11922_v32  ;;  %v11931_v54 = vld [vmem:[#allocation23_spill] sm:$0xff]  ;;  %v11932_v32 = vld [vmem:[#allocation21_spill] sm:$0xff] }
 0x27d   :  { %v9832_v38 = vpop.f32.mrb[80].mxu1  ;;  %v9834_v23 = vpop.f32.mrb[96].mxu0  ;;  %7243 = vmatprep.subr.bf16.mxu0 %v11923_v3  ;;  %v11933_v2 = vpack.c.bf16 %v11931_v54, %v11932_v32  ;;  %v11935_v3 = vld [vmem:[#allocation20_spill] sm:$0xff] }
 0x27e   :  { %v9842_v22 = vpop.f32.mrb[81].mxu1  ;;  %v9844_v1 = vpop.f32.mrb[97].mxu0  ;;  %2121 = vmatmul.mubr.bf16.gmra.mrb[176].mxu1 %v8436_v33  ;;  %v11927_v33 = vld [vmem:[#allocation18_spill] sm:$0xff] }
 0x27f   :  { %v9849_v51 = vpop.f32.mrb[82].mxu1  ;;  %v9851_v21 = vpop.f32.mrb[98].mxu0  ;;  %7296 = vmatpush3.bf16.msra.mxu1 %v11926_v56  ;;  %1984 = vmatmul.mubr.bf16.gmra.mrb[160].mxu0 %v8433_v34  ;;  %v11929_v46 = vpack.c.bf16 %v11927_v33, %v11928_v42 }
 0x280   :  { %v9860_v59 = vpop.f32.mrb[83].mxu1  ;;  %v9862_v25 = vpop.f32.mrb[99].mxu0  ;;  %7297 = vmatprep.subr.bf16.mxu1 %v1831_v26  ;;  %1991 = vmatprep.mubr.bf16.mxu0 %v8437_v8  ;;  %v11934_v26 = vld [vmem:[#allocation22_spill] sm:$0xff] }
 0x281   :  { %7244 = vmatpush3.bf16.msra.mxu0 %v11929_v46  ;;  %2128 = vmatprep.mubr.bf16.mxu1 %v8440_v60  ;;  %v11936_v24 = vpack.c.bf16 %v11934_v26, %v11935_v3  ;;  %v11939_v60 = vpack.c.bf16 %v9671_v29, %v9667_v43  ;;  %v11941_v46 = vld [vmem:[#allocation27_spill] sm:$0xff]  ;;  %v11942_v43 = vld [vmem:[#allocation25_spill] sm:$0xff]  ;;  %v11946_v26 = vld [vmem:[#allocation24_spill] sm:$0xff] }
 0x282   :  { %7245 = vmatprep.subr.bf16.mxu0 %v11930_v36  ;;  %v11943_v29 = vpack.c.bf16 %v11941_v46, %v11942_v43  ;;  %v8445_v43 = vld [vmem:[%s11809_s4 + $0x98] ss:$8 sps:$4 sm:$0xff]  }
 0x283   :  { %7298 = vmatpush3.bf16.msra.mxu1 %v11933_v2  ;;  %v11945_v2 = vld [vmem:[#allocation26_spill] sm:$0xff] }
 0x284   :  { %7299 = vmatprep.subr.bf16.mxu1 %v11937_v61  ;;  %v11947_v3 = vpack.c.bf16 %v11945_v2, %v11946_v26 }
 0x285   :  { %7246 = vmatpush3.bf16.msra.mxu0 %v11936_v24  ;;  %v9892_v47 = vpop.f32.mrb[84].mxu1  ;;  %v9894_v8 = vpop.f32.mrb[100].mxu0 }
 0x286   :  { %11938 = vst [vmem:[#allocation11_spill] sm:$0xff] %v9894_v8  ;;  %7247 = vmatprep.subr.bf16.mxu0 %v11939_v60  ;;  %v9902_v56 = vpop.f32.mrb[85].mxu1  ;;  %v9904_v33 = vpop.f32.mrb[101].mxu0  ;;  %2129 = vmatmul.mubr.bf16.gmra.mrb[180].mxu1 %v8442_v35  ;;  %v11949_v60 = vld [vmem:[#allocation29_spill] sm:$0xff] }
 0x287   :  { %11940 = vst [vmem:[#allocation10_spill] sm:$0xff] %v9904_v33  ;;  %v9909_v49 = vpop.f32.mrb[86].mxu1  ;;  %v9911_v42 = vpop.f32.mrb[102].mxu0  ;;  %7300 = vmatpush3.bf16.msra.mxu1 %v11943_v29  ;;  %1992 = vmatmul.mubr.bf16.gmra.mrb[164].mxu0 %v8439_v52  ;;  %v1865_v52 = vld [vmem:[%s11809_s4 + $0x50] sm:$0x11]  ;;  %v6653_v29 = vcombine.high %v6641_v57, %v6641_v57 }
 0x288   :  { %v9920_v35 = vpop.f32.mrb[87].mxu1  ;;  %v9922_v32 = vpop.f32.mrb[103].mxu0  ;;  %7301 = vmatprep.subr.bf16.mxu1 %v1849_v41  ;;  %1999 = vmatprep.mubr.bf16.mxu0 %v8443_v53  ;;  %v11948_v41 = vld [vmem:[#allocation31_spill] sm:$0xff]  ;;  %v6665_v39 = vcombine.high %v1865_v52, %v1865_v52  ;;  %v6664_v54 = vcombine.low %v1865_v52, %v1865_v52 }
 0x289   :  { %11944 = vst [vmem:[#allocation15_spill] sm:$0xff] %v9922_v32  ;;  %7248 = vmatpush3.bf16.msra.mxu0 %v11947_v3  ;;  %2136 = vmatprep.mubr.bf16.mxu1 %v8446_v11  ;;  %v11950_v46 = vpack.c.bf16 %v11948_v41, %v11949_v60 }
 0x28a   :  { %7249 = vmatprep.subr.bf16.mxu0 %v1848_v16  ;;  %v11952_v16 = vld [vmem:[#allocation28_spill] sm:$0xff] }
 0x28b   :  { %7302 = vmatpush3.bf16.msra.mxu1 %v11950_v46  ;;  %v11953_v53 = vpack.c.bf16 %v11951_v13, %v11952_v16  ;;  %v8455_v13 = vld [vmem:[%s11809_s4 + $0xb4] ss:$8 sps:$4 sm:$0xff]  }
 0x28d   :  { %7250 = vmatpush3.bf16.msra.mxu0 %v11953_v53  ;;  %v9955_v2 = vpop.f32.mrb[88].mxu1  ;;  %v9957_v11 = vpop.f32.mrb[104].mxu0 }
 0x28e   :  { %11954 = vst [vmem:[#allocation13_spill] sm:$0xff] %v9957_v11  ;;  %v9959_v26 = vpop.f32.mrb[89].mxu1  ;;  %v9961_v3 = vpop.f32.mrb[105].mxu0  ;;  %2137 = vmatmul.mubr.bf16.gmra.mrb[184].mxu1 %v8448_v9 }
 0x28f   :  { %11955 = vst [vmem:[#allocation14_spill] sm:$0xff] %v9961_v3  ;;  %v9963_v41 = vpop.f32.mrb[90].mxu1  ;;  %v9965_v60 = vpop.f32.mrb[106].mxu0  ;;  %2000 = vmatmul.mubr.bf16.gmra.mrb[168].mxu0 %v8445_v43  ;;  %2144 = vmatprep.mubr.bf16.mxu1 %v6665_v39  ;;  %v6652_v43 = vcombine.low %v6641_v57, %v6641_v57  ;;  %v8458_v39 = vld [vmem:[%s11809_s4 + $0x10c] ss:$8 sps:$4 sm:$0xff]  }
 0x290   :  { %11956 = vst [vmem:[#allocation12_spill] sm:$0xff] %v9965_v60  ;;  %v9971_v16 = vpop.f32.mrb[91].mxu1  ;;  %v9973_v53 = vpop.f32.mrb[107].mxu0  ;;  %2007 = vmatprep.mubr.bf16.mxu0 %v6653_v29  ;;  %v6699_v60 = vld [vmem:[%s11809_s4 + $0x158] sm:$0x11] }
 0x291   :  { %11957 = vst [vmem:[#allocation19_spill] sm:$0xff] %v9973_v53  ;;  %v6710_v8 = vcombine.low %v6699_v60, %v6699_v60 }
 0x295   :  { %v9985_v34 = vpop.f32.mrb[92].mxu1  ;;  %v9987_v20 = vpop.f32.mrb[108].mxu0 }
 0x296   :  { %11958 = vst [vmem:[#allocation17_spill] sm:$0xff] %v9987_v20  ;;  %v9989_v29 = vpop.f32.mrb[93].mxu1  ;;  %v9991_v44 = vpop.f32.mrb[109].mxu0  ;;  %2145 = vmatmul.mubr.bf16.gmra.mrb[188].mxu1 %v6664_v54 }
 0x297   :  { %11959 = vst [vmem:[#allocation18_spill] sm:$0xff] %v9991_v44  ;;  %v9993_v61 = vpop.f32.mrb[94].mxu1  ;;  %v9995_v52 = vpop.f32.mrb[110].mxu0  ;;  %2008 = vmatmul.mubr.bf16.gmra.mrb[172].mxu0 %v6652_v43  ;;  %2413 = vmatprep.mubr.bf16.mxu1 %v8458_v39  ;;  %v8456_v43 = vld [vmem:[%s11809_s4 + $0x108] ss:$8 sps:$4 sm:$0xff]  }
 0x298   :  { %11960 = vst [vmem:[#allocation16_spill] sm:$0xff] %v9995_v52  ;;  %v10001_v12 = vpop.f32.mrb[95].mxu1  ;;  %v10003_v31 = vpop.f32.mrb[111].mxu0  ;;  %2253 = vmatprep.mubr.bf16.mxu0 %v8455_v13  ;;  %v8453_v39 = vld [vmem:[%s11809_s4 + $0xb0] ss:$8 sps:$4 sm:$0xff]  }
 0x299   :  { %11961 = vst [vmem:[#allocation23_spill] sm:$0xff] %v10003_v31  ;;  %v8459_v13 = vld [vmem:[%s11809_s4 + $0xc4] ss:$8 sps:$4 sm:$0xff]  }
 0x29d   :  { %v10021_v54 = vpop.f32.mrb[96].mxu1  ;;  %v10023_v57 = vpop.f32.mrb[112].mxu0 }
 0x29e   :  { %11962 = vst [vmem:[#allocation21_spill] sm:$0xff] %v10023_v57  ;;  %v10025_v9 = vpop.f32.mrb[97].mxu1  ;;  %v10027_v46 = vpop.f32.mrb[113].mxu0  ;;  %2414 = vmatmul.mubr.bf16.vlgmr.msra.gmra.mrb[192].mxu1 %v8456_v43 }
 0x29f   :  { %11963 = vst [vmem:[#allocation22_spill] sm:$0xff] %v10027_v46  ;;  %v10029_v24 = vpop.f32.mrb[98].mxu1  ;;  %v10031_v36 = vpop.f32.mrb[114].mxu0  ;;  %2254 = vmatmul.mubr.bf16.vlgmr.msra.gmra.mrb[176].mxu0 %v8453_v39  ;;  %2421 = vmatprep.mubr.bf16.mxu1 %v8462_v4  ;;  %v8464_v4 = vld [vmem:[%s11809_s4 + $0x118] ss:$8 sps:$4 sm:$0xff]  }
 0x2a0   :  { %11964 = vst [vmem:[#allocation20_spill] sm:$0xff] %v10031_v36  ;;  %v10037_v37 = vpop.f32.mrb[99].mxu1  ;;  %v10039_v30 = vpop.f32.mrb[115].mxu0  ;;  %2261 = vmatprep.mubr.bf16.mxu0 %v8459_v13  ;;  %v8461_v39 = vld [vmem:[%s11809_s4 + $0xc0] ss:$8 sps:$4 sm:$0xff]  }
 0x2a1   :  { %11965 = vst [vmem:[#allocation27_spill] sm:$0xff] %v10039_v30  ;;  %v8465_v13 = vld [vmem:[%s11809_s4 + $0xd4] ss:$8 sps:$4 sm:$0xff]  }
 0x2a2   :  { %v8474_v36 = vld [vmem:[%s11809_s4 + $0x13c] ss:$8 sps:$4 sm:$0xff]  }
 0x2a5   :  { %v10057_v43 = vpop.f32.mrb[100].mxu1  ;;  %v10059_v45 = vpop.f32.mrb[116].mxu0 }
 0x2a6   :  { %11966 = vst [vmem:[#allocation25_spill] sm:$0xff] %v10059_v45  ;;  %v10061_v6 = vpop.f32.mrb[101].mxu1  ;;  %v10063_v63 = vpop.f32.mrb[117].mxu0  ;;  %2422 = vmatmul.mubr.bf16.gmra.mrb[196].mxu1 %v8464_v4 }
 0x2a7   :  { %11967 = vst [vmem:[#allocation26_spill] sm:$0xff] %v10063_v63  ;;  %v10065_v46 = vpop.f32.mrb[102].mxu1  ;;  %v10067_v30 = vpop.f32.mrb[118].mxu0  ;;  %2262 = vmatmul.mubr.bf16.gmra.mrb[180].mxu0 %v8461_v39  ;;  %2429 = vmatprep.mubr.bf16.mxu1 %v8468_v17  ;;  %v8470_v17 = vld [vmem:[%s11809_s4 + $0x128] ss:$8 sps:$4 sm:$0xff]  }
 0x2a8   :  { %11968 = vst [vmem:[#allocation24_spill] sm:$0xff] %v10067_v30  ;;  %v10073_v44 = vpop.f32.mrb[103].mxu1  ;;  %v10075_v31 = vpop.f32.mrb[119].mxu0  ;;  %2269 = vmatprep.mubr.bf16.mxu0 %v8465_v13  ;;  %v8467_v39 = vld [vmem:[%s11809_s4 + $0xd0] ss:$8 sps:$4 sm:$0xff]  }
 0x2a9   :  { %11969 = vst [vmem:[#allocation31_spill] sm:$0xff] %v10075_v31  ;;  %v8471_v13 = vld [vmem:[%s11809_s4 + $0xe4] ss:$8 sps:$4 sm:$0xff]  }
 0x2ad   :  { %v1278_v4 = vpop.f32.mrb[104].mxu1  ;;  %v10093_v57 = vpop.f32.mrb[120].mxu0 }
 0x2ae   :  { %v1280_v20 = vpop.f32.mrb[105].mxu1  ;;  %v10095_v63 = vpop.f32.mrb[121].mxu0  ;;  %2430 = vmatmul.mubr.bf16.gmra.mrb[200].mxu1 %v8470_v17  ;;  %v8476_v17 = vld [vmem:[%s11809_s4 + $0x138] ss:$8 sps:$4 sm:$0xff]  }
 0x2af   :  { %v1282_v31 = vpop.f32.mrb[106].mxu1  ;;  %v10097_v45 = vpop.f32.mrb[122].mxu0  ;;  %2270 = vmatmul.mubr.bf16.gmra.mrb[184].mxu0 %v8467_v39  ;;  %2437 = vmatprep.mubr.bf16.mxu1 %v8474_v36  ;;  %v11970_v36 = vpack.c.bf16 %v9729_v58, %v9712_v55 }
 0x2b0   :  { %v1787_v30 = vpack.c.bf16 %v1282_v31, %v1278_v4  ;;  %v1284_v3 = vpop.f32.mrb[107].mxu1  ;;  %v10101_v53 = vpop.f32.mrb[123].mxu0  ;;  %2277 = vmatprep.mubr.bf16.mxu0 %v8471_v13  ;;  %v8473_v31 = vld [vmem:[%s11809_s4 + $0xe0] ss:$8 sps:$4 sm:$0xff]  }
 0x2b1   :  { %v1788_v11 = vpack.c.bf16 %v1284_v3, %v1280_v20  ;;  %v8480_v20 = vld [vmem:[%s11809_s4 + $0x14c] ss:$8 sps:$4 sm:$0xff]  }
 0x2b2   :  { %7339 = vmatprep.subr.bf16.mxu0 %v1787_v30  ;;  %v11971_v30 = vpack.c.bf16 %v9740_v48, %v9722_v10  ;;  %v8477_v3 = vld [vmem:[%s11809_s4 + $0xf4] ss:$8 sps:$4 sm:$0xff]  }
 0x2b3   :  { %7340 = vmatpush3.bf16.msra.mxu0 %v11970_v36  ;;  %7391 = vmatprep.subr.bf16.mxu1 %v1788_v11 }
 0x2b4   :  { %7392 = vmatpush3.bf16.msra.mxu1 %v11971_v30 }
 0x2b5   :  { %v1288_v4 = vpop.f32.mrb[108].mxu1  ;;  %v10123_v55 = vpop.f32.mrb[124].mxu0 }
 0x2b6   :  { %v1290_v58 = vpop.f32.mrb[109].mxu1  ;;  %v10125_v11 = vpop.f32.mrb[125].mxu0  ;;  %2438 = vmatmul.mubr.bf16.gmra.mrb[204].mxu1 %v8476_v17 }
 0x2b7   :  { %v1292_v39 = vpop.f32.mrb[110].mxu1  ;;  %v10127_v13 = vpop.f32.mrb[126].mxu0  ;;  %2278 = vmatmul.mubr.bf16.gmra.mrb[188].mxu0 %v8473_v31  ;;  %2445 = vmatprep.mubr.bf16.mxu1 %v8480_v20  ;;  %v6676_v31 = vld [vmem:[%s11809_s4 + $0x100] sm:$0x11]  ;;  %v8482_v20 = vld [vmem:[%s11809_s4 + $0x148] ss:$8 sps:$4 sm:$0xff]  }
 0x2b8   :  { %v1796_v36 = vpack.c.bf16 %v1292_v39, %v1288_v4  ;;  %v1294_v48 = vpop.f32.mrb[111].mxu1  ;;  %v10131_v30 = vpop.f32.mrb[127].mxu0  ;;  %2285 = vmatprep.mubr.bf16.mxu0 %v8477_v3  ;;  %v11972_v3 = vpack.c.bf16 %v9789_v15, %v9772_v50  ;;  %v8479_v4 = vld [vmem:[%s11809_s4 + $0xf0] ss:$8 sps:$4 sm:$0xff]   ;;  %v11973_v39 = vpack.c.bf16 %v9800_v7, %v9782_v28 }
 0x2b9   :  { %v1797_v52 = vpack.c.bf16 %v1294_v48, %v1290_v58  ;;  %v6711_v58 = vcombine.high %v6699_v60, %v6699_v60  ;;  %v6688_v48 = vcombine.high %v6676_v31, %v6676_v31 }
 0x2ba   :  { %7341 = vmatprep.subr.bf16.mxu0 %v1796_v36 }
 0x2bb   :  { %7342 = vmatpush3.bf16.msra.mxu0 %v11972_v3  ;;  %7393 = vmatprep.subr.bf16.mxu1 %v1797_v52 }
 0x2bc   :  { %7394 = vmatpush3.bf16.msra.mxu1 %v11973_v39 }
 0x2bd   :  { %v1298_v36 = vpop.f32.mrb[112].mxu1  ;;  %v10153_v17 = vpop.f32.mrb[128].mxu0 }
 0x2be   :  { %v1300_v10 = vpop.f32.mrb[113].mxu1  ;;  %v10155_v33 = vpop.f32.mrb[129].mxu0  ;;  %2446 = vmatmul.mubr.bf16.gmra.mrb[208].mxu1 %v8482_v20  ;;  %v11974_v20 = vpack.c.bf16 %v9849_v51, %v9832_v38 }
 0x2bf   :  { %v1302_v50 = vpop.f32.mrb[114].mxu1  ;;  %v10157_v15 = vpop.f32.mrb[130].mxu0  ;;  %2286 = vmatmul.mubr.bf16.gmra.mrb[192].mxu0 %v8479_v4  ;;  %2453 = vmatprep.mubr.bf16.mxu1 %v6711_v58  ;;  %v6687_v4 = vcombine.low %v6676_v31, %v6676_v31  ;;  %v8492_v58 = vld [vmem:[%s11809_s4 + $0x1bc] ss:$8 sps:$4 sm:$0xff]  }
 0x2c0   :  { %v1805_v52 = vpack.c.bf16 %v1302_v50, %v1298_v36  ;;  %v1807_v3 = vpack.c.bf16 %v10157_v15, %v10153_v17  ;;  %v1304_v32 = vpop.f32.mrb[115].mxu1  ;;  %v10161_v28 = vpop.f32.mrb[131].mxu0  ;;  %2293 = vmatprep.mubr.bf16.mxu0 %v6688_v48  ;;  %v11975_v36 = vpack.c.bf16 %v9860_v59, %v9842_v22  ;;  %v11995_v17 = vpack.c.bf16 %v9862_v25, %v9844_v1  ;;  %v8504_v1 = vld [vmem:[%s11809_s4 + $0x1d8] ss:$8 sps:$4 sm:$0xff]  }
 0x2c1   :  { %v1806_v7 = vpack.c.bf16 %v1304_v32, %v1300_v10  ;;  %v1808_v39 = vpack.c.bf16 %v10161_v28, %v10155_v33  ;;  %v8489_v32 = vld [vmem:[%s11809_s4 + $0x164] ss:$8 sps:$4 sm:$0xff]   ;;  %v11999_v28 = vld [vmem:[#allocation15_spill] sm:$0xff] }
 0x2c2   :  { %7343 = vmatprep.subr.bf16.mxu0 %v1805_v52 }
 0x2c3   :  { %7344 = vmatpush3.bf16.msra.mxu0 %v11974_v20  ;;  %7395 = vmatprep.subr.bf16.mxu1 %v1806_v7 }
 0x2c4   :  { %7396 = vmatpush3.bf16.msra.mxu1 %v11975_v36 }
 0x2c5   :  { %v1308_v10 = vpop.f32.mrb[116].mxu1  ;;  %v10177_v60 = vpop.f32.mrb[132].mxu0 }
 0x2c6   :  { %v1310_v48 = vpop.f32.mrb[117].mxu1  ;;  %v10179_v38 = vpop.f32.mrb[133].mxu0  ;;  %2454 = vmatmul.mubr.bf16.gmra.mrb[212].mxu1 %v6710_v8  ;;  %v11976_v8 = vpack.c.bf16 %v9909_v49, %v9892_v47 }
 0x2c7   :  { %v1312_v51 = vpop.f32.mrb[118].mxu1  ;;  %v10181_v31 = vpop.f32.mrb[134].mxu0  ;;  %2294 = vmatmul.mubr.bf16.gmra.mrb[196].mxu0 %v6687_v4  ;;  %2733 = vmatprep.mubr.bf16.mxu1 %v8492_v58  ;;  %v11977_v4 = vpack.c.bf16 %v9920_v35, %v9902_v56  ;;  %v11978_v35 = vpack.c.bf16 %v9963_v41, %v9955_v2 }
 0x2c8   :  { %v1814_v50 = vpack.c.bf16 %v1312_v51, %v1308_v10  ;;  %v1816_v22 = vpack.c.bf16 %v10181_v31, %v10177_v60  ;;  %v1314_v59 = vpop.f32.mrb[119].mxu1  ;;  %v10185_v52 = vpop.f32.mrb[135].mxu0  ;;  %2573 = vmatprep.mubr.bf16.mxu0 %v8489_v32 }
 0x2c9   :  { %v1815_v7 = vpack.c.bf16 %v1314_v59, %v1310_v48  ;;  %v1817_v20 = vpack.c.bf16 %v10185_v52, %v10179_v38  ;;  %v8508_v52 = vld [vmem:[%s11809_s4 + $0x1ec] ss:$8 sps:$4 sm:$0xff]  }
 0x2ca   :  { %7345 = vmatprep.subr.bf16.mxu0 %v1814_v50 }
 0x2cb   :  { %7346 = vmatpush3.bf16.msra.mxu0 %v11976_v8  ;;  %7397 = vmatprep.subr.bf16.mxu1 %v1815_v7  ;;  %v11979_v8 = vpack.c.bf16 %v9971_v16, %v9959_v26  ;;  %v11980_v16 = vpack.c.bf16 %v9993_v61, %v9985_v34 }
 0x2cc   :  { %7398 = vmatpush3.bf16.msra.mxu1 %v11977_v4 }
 0x2cd   :  { %v1318_v58 = vpop.f32.mrb[120].mxu1  ;;  %v10195_v36 = vpop.f32.mrb[136].mxu0 }
 0x2ce   :  { %v1320_v10 = vpop.f32.mrb[121].mxu1  ;;  %v10197_v51 = vpop.f32.mrb[137].mxu0 }
 0x2cf   :  { %v1322_v32 = vpop.f32.mrb[122].mxu1  ;;  %v10199_v48 = vpop.f32.mrb[138].mxu0 }
 0x2d0   :  { %v1823_v59 = vpack.c.bf16 %v1322_v32, %v1318_v58  ;;  %v1324_v47 = vpop.f32.mrb[123].mxu1  ;;  %v10203_v49 = vpop.f32.mrb[139].mxu0  ;;  %v11998_v25 = vpack.c.bf16 %v10199_v48, %v10195_v36  ;;  %v12003_v36 = vld [vmem:[#allocation12_spill] sm:$0xff]  ;;  %v12004_v48 = vld [vmem:[#allocation13_spill] sm:$0xff] }
 0x2d1   :  { %v1824_v7 = vpack.c.bf16 %v1324_v47, %v1320_v10  ;;  %v12002_v31 = vpack.c.bf16 %v10203_v49, %v10197_v51 }
 0x2d2   :  { %7347 = vmatprep.subr.bf16.mxu0 %v1823_v59 }
 0x2d3   :  { %7348 = vmatpush3.bf16.msra.mxu0 %v11978_v35  ;;  %7399 = vmatprep.subr.bf16.mxu1 %v1824_v7  ;;  %v11981_v35 = vpack.c.bf16 %v10001_v12, %v9989_v29  ;;  %v11982_v29 = vpack.c.bf16 %v10029_v24, %v10021_v54 }
 0x2d4   :  { %7400 = vmatpush3.bf16.msra.mxu1 %v11979_v8 }
 0x2d5   :  { %v1328_v4 = vpop.f32.mrb[124].mxu1  ;;  %v10213_v58 = vpop.f32.mrb[140].mxu0 }
 0x2d6   :  { %v1330_v32 = vpop.f32.mrb[125].mxu1  ;;  %v10215_v50 = vpop.f32.mrb[141].mxu0 }
 0x2d7   :  { %v1332_v10 = vpop.f32.mrb[126].mxu1  ;;  %v10217_v47 = vpop.f32.mrb[142].mxu0 }
 0x2d8   :  { %v1832_v56 = vpack.c.bf16 %v1332_v10, %v1328_v4  ;;  %v1334_v2 = vpop.f32.mrb[127].mxu1  ;;  %v10221_v41 = vpop.f32.mrb[143].mxu0 }
 0x2d9   :  { %v1833_v7 = vpack.c.bf16 %v1334_v2, %v1330_v32 }
 0x2da   :  { %7349 = vmatprep.subr.bf16.mxu0 %v1832_v56 }
 0x2db   :  { %7350 = vmatpush3.bf16.msra.mxu0 %v11980_v16  ;;  %7401 = vmatprep.subr.bf16.mxu1 %v1833_v7  ;;  %v11983_v16 = vpack.c.bf16 %v10037_v37, %v10025_v9  ;;  %v8487_v9 = vld [vmem:[%s11809_s4 + $0x160] ss:$8 sps:$4 sm:$0xff]  }
 0x2dc   :  { %7402 = vmatpush3.bf16.msra.mxu1 %v11981_v35 }
 0x2dd   :  { %v1338_v8 = vpop.f32.mrb[128].mxu1  ;;  %v10231_v4 = vpop.f32.mrb[144].mxu0 }
 0x2de   :  { %v1340_v10 = vpop.f32.mrb[129].mxu1  ;;  %v10233_v59 = vpop.f32.mrb[145].mxu0 }
 0x2df   :  { %v1342_v32 = vpop.f32.mrb[130].mxu1  ;;  %v10235_v2 = vpop.f32.mrb[146].mxu0 }
 0x2e0   :  { %v1841_v26 = vpack.c.bf16 %v1342_v32, %v1338_v8  ;;  %v1344_v34 = vpop.f32.mrb[131].mxu1  ;;  %v10239_v61 = vpop.f32.mrb[147].mxu0 }
 0x2e1   :  { %v1842_v7 = vpack.c.bf16 %v1344_v34, %v1340_v10 }
 0x2e2   :  { %7351 = vmatprep.subr.bf16.mxu0 %v1841_v26 }
 0x2e3   :  { %7352 = vmatpush3.bf16.msra.mxu0 %v11982_v29  ;;  %7403 = vmatprep.subr.bf16.mxu1 %v1842_v7  ;;  %v11984_v29 = vpack.c.bf16 %v10065_v46, %v10057_v43  ;;  %v8493_v46 = vld [vmem:[%s11809_s4 + $0x174] ss:$8 sps:$4 sm:$0xff]  }
 0x2e4   :  { %7404 = vmatpush3.bf16.msra.mxu1 %v11983_v16  ;;  %v8490_v16 = vld [vmem:[%s11809_s4 + $0x1b8] ss:$8 sps:$4 sm:$0xff]  }
 0x2e5   :  { %v1348_v35 = vpop.f32.mrb[132].mxu1  ;;  %v10249_v8 = vpop.f32.mrb[148].mxu0 }
 0x2e6   :  { %v1350_v32 = vpop.f32.mrb[133].mxu1  ;;  %v10251_v56 = vpop.f32.mrb[149].mxu0 }
 0x2e7   :  { %v1352_v10 = vpop.f32.mrb[134].mxu1  ;;  %v10253_v34 = vpop.f32.mrb[150].mxu0 }
 0x2e8   :  { %v1850_v12 = vpack.c.bf16 %v1352_v10, %v1348_v35  ;;  %v1852_v26 = vpack.c.bf16 %v10253_v34, %v10249_v8  ;;  %v1354_v24 = vpop.f32.mrb[135].mxu1  ;;  %v10257_v54 = vpop.f32.mrb[151].mxu0  ;;  %v11985_v35 = vpack.c.bf16 %v10073_v44, %v10061_v6  ;;  %v11987_v10 = vpack.c.bf16 %v10101_v53, %v10095_v63  ;;  %v8496_v6 = vld [vmem:[%s11809_s4 + $0x1cc] ss:$8 sps:$4 sm:$0xff]   ;;  %v8513_v34 = vld [vmem:[%s11809_s4 + $0x1a0] ss:$8 sps:$4 sm:$0xff]  }
 0x2e9   :  { %v1851_v7 = vpack.c.bf16 %v1354_v24, %v1350_v32  ;;  %v1853_v37 = vpack.c.bf16 %v10257_v54, %v10251_v56  ;;  %v11990_v24 = vpack.c.bf16 %v9742_v62, %v9724_v0  ;;  %v8498_v0 = vld [vmem:[%s11809_s4 + $0x1c8] ss:$8 sps:$4 sm:$0xff]   ;;  %v11993_v62 = vpack.c.bf16 %v9802_v18, %v9784_v19 }
 0x2ea   :  { %7353 = vmatprep.subr.bf16.mxu0 %v1850_v12  ;;  %v11986_v12 = vpack.c.bf16 %v10097_v45, %v10093_v57  ;;  %v11988_v45 = vpack.c.bf16 %v9731_v14, %v9714_v27  ;;  %v11989_v57 = vpack.c.bf16 %v10127_v13, %v10123_v55  ;;  %v11991_v27 = vpack.c.bf16 %v10131_v30, %v10125_v11  ;;  %v8495_v14 = vld [vmem:[%s11809_s4 + $0x170] ss:$8 sps:$4 sm:$0xff]   ;;  %v8502_v13 = vld [vmem:[%s11809_s4 + $0x1dc] ss:$8 sps:$4 sm:$0xff]   ;;  %v6745_v8 = vld [vmem:[%s11809_s4 + $0x208] sm:$0x11] }
 0x2eb   :  { %7354 = vmatpush3.bf16.msra.mxu0 %v11984_v29  ;;  %7405 = vmatprep.subr.bf16.mxu1 %v1851_v7  ;;  %v11992_v55 = vpack.c.bf16 %v9791_v5, %v9774_v40  ;;  %v8499_v40 = vld [vmem:[%s11809_s4 + $0x184] ss:$8 sps:$4 sm:$0xff]   ;;  %v11994_v19 = vpack.c.bf16 %v9851_v21, %v9834_v23  ;;  %v8501_v23 = vld [vmem:[%s11809_s4 + $0x180] ss:$8 sps:$4 sm:$0xff]   ;;  %v11996_v21 = vld [vmem:[#allocation11_spill] sm:$0xff]  ;;  %v12006_v29 = vpack.c.bf16 %v10217_v47, %v10213_v58 }
 0x2ec   :  { %7406 = vmatpush3.bf16.msra.mxu1 %v11985_v35  ;;  %7443 = vmatprep.subr.bf16.mxu0 %v11986_v12  ;;  %v12008_v35 = vld [vmem:[#allocation14_spill] sm:$0xff]  ;;  %v12012_v58 = vld [vmem:[#allocation17_spill] sm:$0xff]  ;;  %v12028_v54 = vld [vmem:[#allocation31_spill] sm:$0xff] }
 0x2ed   :  { %v10276_v32 = vpop.f32.mrb[136].mxu1  ;;  %7495 = vmatprep.subr.bf16.mxu1 %v11987_v10 }
 0x2ee   :  { %v10284_v43 = vpop.f32.mrb[137].mxu1  ;;  %2574 = vmatmul.mubr.bf16.vlgmr.msra.gmra.mrb[200].mxu0 %v8487_v9  ;;  %v12005_v9 = vpack.c.bf16 %v12003_v36, %v12004_v48 }
 0x2ef   :  { %v10289_v44 = vpop.f32.mrb[138].mxu1  ;;  %7444 = vmatpush3.bf16.msra.mxu0 %v11988_v45  ;;  %2734 = vmatmul.mubr.bf16.vlgmr.msra.gmra.mrb[216].mxu1 %v8490_v16  ;;  %v12007_v16 = vld [vmem:[#allocation19_spill] sm:$0xff]  ;;  %v12011_v45 = vld [vmem:[#allocation16_spill] sm:$0xff] }
 0x2f0   :  { %v1728_v63 = vpack.c.bf16 %v10289_v44, %v10276_v32  ;;  %v10296_v53 = vpop.f32.mrb[139].mxu1  ;;  %7445 = vmatprep.subr.bf16.mxu0 %v11989_v57  ;;  %7496 = vmatpush3.bf16.msra.mxu1 %v11990_v24  ;;  %v12009_v12 = vpack.c.bf16 %v12007_v16, %v12008_v35  ;;  %v12013_v47 = vpack.c.bf16 %v12011_v45, %v12012_v58  ;;  %v8510_v57 = vld [vmem:[%s11809_s4 + $0x1e8] ss:$8 sps:$4 sm:$0xff]  }
 0x2f1   :  { %v1719_v7 = vpack.c.bf16 %v10296_v53, %v10284_v43  ;;  %7497 = vmatprep.subr.bf16.mxu1 %v11991_v27  ;;  %2581 = vmatprep.mubr.bf16.mxu0 %v8493_v46  ;;  %v12010_v46 = vpack.c.bf16 %v10221_v41, %v10215_v50  ;;  %v12014_v24 = vpack.c.bf16 %v10235_v2, %v10231_v4  ;;  %v12015_v50 = vld [vmem:[#allocation23_spill] sm:$0xff]  ;;  %v12016_v41 = vld [vmem:[#allocation18_spill] sm:$0xff]  ;;  %v8514_v4 = vld [vmem:[%s11809_s4 + $0x1fc] ss:$8 sps:$4 sm:$0xff]  }
 0x2f2   :  { %2741 = vmatprep.mubr.bf16.mxu1 %v8496_v6  ;;  %v8507_v6 = vld [vmem:[%s11809_s4 + $0x190] ss:$8 sps:$4 sm:$0xff]   ;;  %v12017_v27 = vpack.c.bf16 %v12015_v50, %v12016_v41  ;;  %v6756_v35 = vcombine.low %v6745_v8, %v6745_v8  ;;  %v8533_v53 = vld [vmem:[%s11809_s4 + $0x234] ss:$8 sps:$4 sm:$0xff]  }
 0x2f3   :  { %7446 = vmatpush3.bf16.msra.mxu0 %v11992_v55  ;;  %v12018_v55 = vpack.c.bf16 %v10239_v61, %v10233_v59  ;;  %v8521_v50 = vld [vmem:[%s11809_s4 + $0x210] ss:$8 sps:$4 sm:$0xff]  }
 0x2f4   :  { %7447 = vmatprep.subr.bf16.mxu0 %v1807_v3  ;;  %7498 = vmatpush3.bf16.msra.mxu1 %v11993_v62  ;;  %v11997_v3 = vpack.c.bf16 %v9911_v42, %v11996_v21  ;;  %v8505_v42 = vld [vmem:[%s11809_s4 + $0x194] ss:$8 sps:$4 sm:$0xff]   ;;  %v8524_v41 = vld [vmem:[%s11809_s4 + $0x268] ss:$8 sps:$4 sm:$0xff]   ;;  %v8532_v43 = vld [vmem:[%s11809_s4 + $0x278] ss:$8 sps:$4 sm:$0xff]  }
 0x2f5   :  { %v10324_v11 = vpop.f32.mrb[140].mxu1  ;;  %7499 = vmatprep.subr.bf16.mxu1 %v1808_v39  ;;  %v12000_v39 = vld [vmem:[#allocation10_spill] sm:$0xff] }
 0x2f6   :  { %v10332_v5 = vpop.f32.mrb[141].mxu1  ;;  %2582 = vmatmul.mubr.bf16.gmra.mrb[204].mxu0 %v8495_v14  ;;  %v12001_v60 = vpack.c.bf16 %v11999_v28, %v12000_v39  ;;  %v8516_v39 = vld [vmem:[%s11809_s4 + $0x1f8] ss:$8 sps:$4 sm:$0xff]  }
 0x2f7   :  { %v10337_v30 = vpop.f32.mrb[142].mxu1  ;;  %7448 = vmatpush3.bf16.msra.mxu0 %v11994_v19  ;;  %2742 = vmatmul.mubr.bf16.gmra.mrb[220].mxu1 %v8498_v0  ;;  %v8511_v0 = vld [vmem:[%s11809_s4 + $0x1a4] ss:$8 sps:$4 sm:$0xff]  }
 0x2f8   :  { %v1746_v18 = vpack.c.bf16 %v10337_v30, %v10324_v11  ;;  %v10344_v33 = vpop.f32.mrb[143].mxu1  ;;  %7449 = vmatprep.subr.bf16.mxu0 %v1816_v22  ;;  %7500 = vmatpush3.bf16.msra.mxu1 %v11995_v17  ;;  %v12022_v17 = vld [vmem:[#allocation27_spill] sm:$0xff]  ;;  %v8541_v11 = vld [vmem:[%s11809_s4 + $0x240] ss:$8 sps:$4 sm:$0xff]  }
 0x2f9   :  { %v1737_v15 = vpack.c.bf16 %v10344_v33, %v10332_v5  ;;  %7501 = vmatprep.subr.bf16.mxu1 %v1817_v20  ;;  %2589 = vmatprep.mubr.bf16.mxu0 %v8499_v40  ;;  %v12019_v40 = vld [vmem:[#allocation20_spill] sm:$0xff]  ;;  %v8538_v5 = vld [vmem:[%s11809_s4 + $0x288] ss:$8 sps:$4 sm:$0xff]   ;;  %v8539_v33 = vld [vmem:[%s11809_s4 + $0x244] ss:$8 sps:$4 sm:$0xff]  }
 0x2fa   :  { %2749 = vmatprep.mubr.bf16.mxu1 %v8502_v13  ;;  %v12020_v13 = vld [vmem:[#allocation21_spill] sm:$0xff] }
 0x2fb   :  { %7450 = vmatpush3.bf16.msra.mxu0 %v11997_v3  ;;  %v12021_v19 = vpack.c.bf16 %v12019_v40, %v12020_v13  ;;  %v6722_v3 = vld [vmem:[%s11809_s4 + $0x1b0] sm:$0x11]  ;;  %v8544_v30 = vld [vmem:[%s11809_s4 + $0x298] ss:$8 sps:$4 sm:$0xff]  }
 0x2fc   :  { %7451 = vmatprep.subr.bf16.mxu0 %v11998_v25  ;;  %7502 = vmatpush3.bf16.msra.mxu1 %v12001_v60  ;;  %v12026_v25 = vld [vmem:[#allocation25_spill] sm:$0xff]  ;;  %v6734_v56 = vcombine.high %v6722_v3, %v6722_v3  ;;  %v6733_v16 = vcombine.low %v6722_v3, %v6722_v3 }
 0x2fd   :  { %v10372_v38 = vpop.f32.mrb[144].mxu1  ;;  %7503 = vmatprep.subr.bf16.mxu1 %v12002_v31  ;;  %v6757_v31 = vcombine.high %v6745_v8, %v6745_v8 }
 0x2fe   :  { %v10380_v22 = vpop.f32.mrb[145].mxu1  ;;  %2590 = vmatmul.mubr.bf16.gmra.mrb[208].mxu0 %v8501_v23  ;;  %v12023_v23 = vld [vmem:[#allocation22_spill] sm:$0xff] }
 0x2ff   :  { %v10385_v20 = vpop.f32.mrb[146].mxu1  ;;  %7452 = vmatpush3.bf16.msra.mxu0 %v12005_v9  ;;  %2750 = vmatmul.mubr.bf16.gmra.mrb[224].mxu1 %v8504_v1  ;;  %v12024_v21 = vpack.c.bf16 %v12022_v17, %v12023_v23  ;;  %v8529_v23 = vld [vmem:[%s11809_s4 + $0x220] ss:$8 sps:$4 sm:$0xff]  }
 0x300   :  { %v1764_v51 = vpack.c.bf16 %v10385_v20, %v10372_v38  ;;  %v10392_v49 = vpop.f32.mrb[147].mxu1  ;;  %7453 = vmatprep.subr.bf16.mxu0 %v12006_v29  ;;  %7504 = vmatpush3.bf16.msra.mxu1 %v12009_v12  ;;  %v8523_v12 = vld [vmem:[%s11809_s4 + $0x214] ss:$8 sps:$4 sm:$0xff]   ;;  %v6768_v38 = vld [vmem:[%s11809_s4 + $0x260] sm:$0x11] }
 0x301   :  { %v1755_v10 = vpack.c.bf16 %v10392_v49, %v10380_v22  ;;  %7505 = vmatprep.subr.bf16.mxu1 %v12010_v46  ;;  %2597 = vmatprep.mubr.bf16.mxu0 %v8505_v42  ;;  %v8526_v46 = vld [vmem:[%s11809_s4 + $0x26c] ss:$8 sps:$4 sm:$0xff]   ;;  %v6791_v20 = vld [vmem:[%s11809_s4 + $0x2b8] sm:$0x11]  ;;  %v8548_v49 = vld [vmem:[%s11809_s4 + $0x2a8] ss:$8 sps:$4 sm:$0xff]  }
 0x302   :  { %2757 = vmatprep.mubr.bf16.mxu1 %v8508_v52  ;;  %v8550_v22 = vld [vmem:[%s11809_s4 + $0x2ac] ss:$8 sps:$4 sm:$0xff]  }
 0x303   :  { %7454 = vmatpush3.bf16.msra.mxu0 %v12013_v47 }
 0x304   :  { %7455 = vmatprep.subr.bf16.mxu0 %v12014_v24  ;;  %7506 = vmatpush3.bf16.msra.mxu1 %v12017_v27  ;;  %v8527_v27 = vld [vmem:[%s11809_s4 + $0x224] ss:$8 sps:$4 sm:$0xff]  }
 0x305   :  { %v10420_v14 = vpop.f32.mrb[148].mxu1  ;;  %7507 = vmatprep.subr.bf16.mxu1 %v12018_v55 }
 0x306   :  { %v10428_v62 = vpop.f32.mrb[149].mxu1  ;;  %2598 = vmatmul.mubr.bf16.gmra.mrb[212].mxu0 %v8507_v6 }
 0x307   :  { %v10433_v2 = vpop.f32.mrb[150].mxu1  ;;  %7456 = vmatpush3.bf16.msra.mxu0 %v12021_v19  ;;  %2758 = vmatmul.mubr.bf16.gmra.mrb[228].mxu1 %v8510_v57 }
 0x308   :  { %v1782_v59 = vpack.c.bf16 %v10433_v2, %v10420_v14  ;;  %v10440_v61 = vpop.f32.mrb[151].mxu1  ;;  %7457 = vmatprep.subr.bf16.mxu0 %v1852_v26  ;;  %7508 = vmatpush3.bf16.msra.mxu1 %v12024_v21  ;;  %v12025_v26 = vld [vmem:[#allocation24_spill] sm:$0xff]  ;;  %v8536_v21 = vld [vmem:[%s11809_s4 + $0x28c] ss:$8 sps:$4 sm:$0xff]  }
 0x309   :  { %v1773_v1 = vpack.c.bf16 %v10440_v61, %v10428_v62  ;;  %7509 = vmatprep.subr.bf16.mxu1 %v1853_v37  ;;  %2605 = vmatprep.mubr.bf16.mxu0 %v8511_v0  ;;  %v12027_v28 = vpack.c.bf16 %v12025_v26, %v12026_v25  ;;  %v12029_v37 = vld [vmem:[#allocation26_spill] sm:$0xff]  ;;  %v8530_v0 = vld [vmem:[%s11809_s4 + $0x27c] ss:$8 sps:$4 sm:$0xff]   ;;  %v6803_v62 = vcombine.high %v6791_v20, %v6791_v20 }
 0x30a   :  { %2765 = vmatprep.mubr.bf16.mxu1 %v8514_v4  ;;  %v12030_v60 = vpack.c.bf16 %v12028_v54, %v12029_v37  ;;  %v8557_v14 = vld [vmem:[%s11809_s4 + $0x2c4] ss:$8 sps:$4 sm:$0xff]  }
 0x30b   :  { %7458 = vmatpush3.bf16.msra.mxu0 %v12027_v28  ;;  %v6802_v28 = vcombine.low %v6791_v20, %v6791_v20 }
 0x30c   :  { %7510 = vmatpush3.bf16.msra.mxu1 %v12030_v60 }
 0x30d   :  { %v7890_v42 = vpop.f32.mrb[152].mxu1 }
 0x30e   :  { %v1648_v52 = vpop.f32.mrb[153].mxu1  ;;  %2606 = vmatmul.mubr.bf16.gmra.mrb[216].mxu0 %v8513_v34  ;;  %v8535_v34 = vld [vmem:[%s11809_s4 + $0x230] ss:$8 sps:$4 sm:$0xff]  }
 0x30f   :  { %v7891_v36 = vpop.f32.mrb[154].mxu1  ;;  %2766 = vmatmul.mubr.bf16.gmra.mrb[232].mxu1 %v8516_v39  ;;  %2613 = vmatprep.mubr.bf16.mxu0 %v6734_v56 }
 0x310   :  { %v1800_v48 = vpack.c.bf16 %v7891_v36, %v7890_v42  ;;  %v1651_v9 = vpop.f32.mrb[155].mxu1  ;;  %2773 = vmatprep.mubr.bf16.mxu1 %v6757_v31 }
 0x311   :  { %v1791_v29 = vpack.c.bf16 %v1651_v9, %v1648_v52 }
 0x313   :  { %7547 = vmatprep.subr.bf16.mxu0 %v1791_v29  ;;  %v8555_v29 = vld [vmem:[%s11809_s4 + $0x2c0] ss:$8 sps:$4 sm:$0xff]  }
 0x315   :  { %v7894_v6 = vpop.f32.mrb[156].mxu1 }
 0x316   :  { %v1664_v45 = vpop.f32.mrb[157].mxu1  ;;  %2614 = vmatmul.mubr.bf16.gmra.mrb[220].mxu0 %v6733_v16 }
 0x317   :  { %v7895_v58 = vpop.f32.mrb[158].mxu1  ;;  %2774 = vmatmul.mubr.bf16.gmra.mrb[236].mxu1 %v6756_v35  ;;  %2893 = vmatprep.mubr.bf16.mxu0 %v8523_v12  ;;  %v8558_v12 = vld [vmem:[%s11809_s4 + $0x2d4] ss:$8 sps:$4 sm:$0xff]  }
 0x318   :  { %v1818_v47 = vpack.c.bf16 %v7895_v58, %v7894_v6  ;;  %v1667_v57 = vpop.f32.mrb[159].mxu1  ;;  %3053 = vmatprep.mubr.bf16.mxu1 %v8526_v46 }
 0x319   :  { %v1809_v24 = vpack.c.bf16 %v1667_v57, %v1664_v45 }
 0x31d   :  { %v7898_v55 = vpop.f32.mrb[160].mxu1 }
 0x31e   :  { %v1680_v4 = vpop.f32.mrb[161].mxu1  ;;  %2894 = vmatmul.mubr.bf16.vlgmr.msra.gmra.mrb[224].mxu0 %v8521_v50 }
 0x31f   :  { %7548 = vmatpush3.bf16.msra.mxu0 %v1719_v7  ;;  %v7899_v40 = vpop.f32.mrb[162].mxu1  ;;  %3054 = vmatmul.mubr.bf16.vlgmr.msra.gmra.mrb[240].mxu1 %v8524_v41 }
 0x320   :  { %v1836_v13 = vpack.c.bf16 %v7899_v40, %v7898_v55  ;;  %7549 = vmatprep.subr.bf16.mxu0 %v1800_v48  ;;  %v1683_v19 = vpop.f32.mrb[163].mxu1  ;;  %2901 = vmatprep.mubr.bf16.mxu0 %v8527_v27  ;;  %v12031_v48 = vmov 0  }
 0x321   :  { %v1827_v17 = vpack.c.bf16 %v1683_v19, %v1680_v4  ;;  %3061 = vmatprep.mubr.bf16.mxu1 %v8530_v0  ;;  %v8560_v4 = vld [vmem:[%s11809_s4 + $0x2d0] ss:$8 sps:$4 sm:$0xff]   ;;  %v8563_v19 = vld [vmem:[%s11809_s4 + $0x2e4] ss:$8 sps:$4 sm:$0xff]  }
 0x323   :  { %7550 = vmatpush3.bf16.msra.mxu0 %v1728_v63 }
 0x324   :  { %7551 = vmatprep.subr.bf16.mxu0 %v1809_v24 }
 0x325   :  { %v7902_v7 = vpop.f32.mrb[164].mxu1 }
 0x326   :  { %v1696_v3 = vpop.f32.mrb[165].mxu1  ;;  %2902 = vmatmul.mubr.bf16.gmra.mrb[228].mxu0 %v8529_v23 }
 0x327   :  { %7552 = vmatpush3.bf16.msra.mxu0 %v1737_v15  ;;  %v7903_v32 = vpop.f32.mrb[166].mxu1  ;;  %3062 = vmatmul.mubr.bf16.gmra.mrb[244].mxu1 %v8532_v43  ;;  %v8542_v15 = vld [vmem:[%s11809_s4 + $0x29c] ss:$8 sps:$4 sm:$0xff]  }
 0x328   :  { %v1854_v44 = vpack.c.bf16 %v7903_v32, %v7902_v7  ;;  %7553 = vmatprep.subr.bf16.mxu0 %v1818_v47  ;;  %v1699_v63 = vpop.f32.mrb[167].mxu1  ;;  %2909 = vmatprep.mubr.bf16.mxu0 %v8533_v53 }
 0x329   :  { %v1845_v8 = vpack.c.bf16 %v1699_v63, %v1696_v3  ;;  %3069 = vmatprep.mubr.bf16.mxu1 %v8536_v21 }
 0x32b   :  { %7554 = vmatpush3.bf16.msra.mxu0 %v1746_v18  ;;  %v8545_v18 = vld [vmem:[%s11809_s4 + $0x254] ss:$8 sps:$4 sm:$0xff]  }
 0x32c   :  { %7555 = vmatprep.subr.bf16.mxu0 %v1827_v17 }
 0x32e   :  { %2910 = vmatmul.mubr.bf16.gmra.mrb[232].mxu0 %v8535_v34 }
 0x32f   :  { %7556 = vmatpush3.bf16.msra.mxu0 %v1755_v10  ;;  %3070 = vmatmul.mubr.bf16.gmra.mrb[248].mxu1 %v8538_v5  ;;  %v6780_v10 = vcombine.high %v6768_v38, %v6768_v38  ;;  %v8561_v5 = vld [vmem:[%s11809_s4 + $0x2e0] ss:$8 sps:$4 sm:$0xff]  }
 0x330   :  { %7557 = vmatprep.subr.bf16.mxu0 %v1836_v13  ;;  %2917 = vmatprep.mubr.bf16.mxu0 %v8539_v33 }
 0x331   :  { %3077 = vmatprep.mubr.bf16.mxu1 %v8542_v15 }
 0x333   :  { %7558 = vmatpush3.bf16.msra.mxu0 %v1764_v51  ;;  %v8547_v51 = vld [vmem:[%s11809_s4 + $0x250] ss:$8 sps:$4 sm:$0xff]  }
 0x334   :  { %7559 = vmatprep.subr.bf16.mxu0 %v1845_v8 }
 0x336   :  { %2918 = vmatmul.mubr.bf16.gmra.mrb[236].mxu0 %v8541_v11  ;;  %v8566_v11 = vld [vmem:[%s11809_s4 + $0x2f4] ss:$8 sps:$4 sm:$0xff]  }
 0x337   :  { %7560 = vmatpush3.bf16.msra.mxu0 %v1773_v1  ;;  %3078 = vmatmul.mubr.bf16.gmra.mrb[252].mxu1 %v8544_v30  ;;  %v6779_v1 = vcombine.low %v6768_v38, %v6768_v38 }
 0x338   :  { %7561 = vmatprep.subr.bf16.mxu0 %v1854_v44  ;;  %2925 = vmatprep.mubr.bf16.mxu0 %v8545_v18 }
 0x339   :  { %3085 = vmatprep.mubr.bf16.mxu1 %v8550_v22 }
 0x33b   :  { %7562 = vmatpush3.bf16.msra.mxu0 %v1782_v59 }
 0x33e   :  { %2926 = vmatmul.mubr.bf16.gmra.mrb[240].mxu0 %v8547_v51 }
 0x33f   :  { %3086 = vmatmul.mubr.bf16.gmra.mrb[0].mxu1 %v8548_v49  ;;  %2933 = vmatprep.mubr.bf16.mxu0 %v6780_v10 }
 0x340   :  { %3093 = vmatprep.mubr.bf16.mxu1 %v6803_v62 }
 0x341   :  { %v7199_v61 = vpop.f32.mrb[168].mxu1 }
 0x342   :  { %v7147_v26 = vpop.f32.mrb[152].mxu0  ;;  %v7200_v25 = vpop.f32.mrb[169].mxu1 }
 0x343   :  { %v7148_v2 = vpop.f32.mrb[153].mxu0  ;;  %v7201_v59 = vadd.f32 %v7200_v25, %v7199_v61  ;;  %v7202_v39 = vpop.f32.mrb[170].mxu1  ;;  %v8564_v25 = vld [vmem:[%s11809_s4 + $0x2f0] ss:$8 sps:$4 sm:$0xff]  }
 0x344   :  { %v7149_v56 = vadd.f32 %v7148_v2, %v7147_v26  ;;  %v7150_v54 = vpop.f32.mrb[154].mxu0  ;;  %v7203_v37 = vpop.f32.mrb[171].mxu1  ;;  %v8569_v2 = vld [vmem:[%s11809_s4 + $0x304] ss:$8 sps:$4 sm:$0xff]  }
 0x345   :  { %v7151_v60 = vpop.f32.mrb[155].mxu0  ;;  %v7204_v31 = vadd.f32 %v7203_v37, %v7202_v39 }
 0x346   :  { %2934 = vmatmul.mubr.bf16.gmra.mrb[244].mxu0 %v6779_v1  ;;  %v7152_v42 = vadd.f32 %v7151_v60, %v7150_v54  ;;  %v10564_v52 = vadd.f32 %v7201_v59, %v7149_v56 }
 0x347   :  { %3094 = vmatmul.mubr.bf16.gmra.mrb[4].mxu1 %v6802_v28  ;;  %3213 = vmatprep.mubr.bf16.mxu0 %v8557_v14 }
 0x348   :  { %v10566_v36 = vadd.f32 %v7204_v31, %v7152_v42  ;;  %3581 = vmatprep.mubr.bf16.mxu1 %v12031_v48 }
 0x349   :  { %v7205_v9 = vpop.f32.mrb[172].mxu1 }
 0x34a   :  { %v7153_v16 = vpop.f32.mrb[156].mxu0  ;;  %v7206_v35 = vpop.f32.mrb[173].mxu1 }
 0x34b   :  { %v7154_v46 = vpop.f32.mrb[157].mxu0  ;;  %v7207_v6 = vadd.f32 %v7206_v35, %v7205_v9  ;;  %v7208_v45 = vpop.f32.mrb[174].mxu1 }
 0x34c   :  { %v7155_v58 = vadd.f32 %v7154_v46, %v7153_v16  ;;  %v7156_v47 = vpop.f32.mrb[158].mxu0  ;;  %v7209_v57 = vpop.f32.mrb[175].mxu1  ;;  %v6814_v16 = vld [vmem:[%s11809_s4 + $0x310] sm:$0x11]  ;;  %v8567_v46 = vld [vmem:[%s11809_s4 + $0x300] ss:$8 sps:$4 sm:$0xff]  }
 0x34d   :  { %v7157_v24 = vpop.f32.mrb[159].mxu0  ;;  %v7210_v50 = vadd.f32 %v7209_v57, %v7208_v45 }
 0x34e   :  { %3214 = vmatmul.mubr.bf16.vlgmr.msra.gmra.mrb[248].mxu0 %v8555_v29  ;;  %v7158_v41 = vadd.f32 %v7157_v24, %v7156_v47  ;;  %v10575_v27 = vadd.f32 %v7207_v6, %v7155_v58  ;;  %v6826_v58 = vcombine.high %v6814_v16, %v6814_v16 }
 0x34f   :  { %3221 = vmatprep.mubr.bf16.mxu0 %v8558_v12 }
 0x350   :  { %v10577_v55 = vadd.f32 %v7210_v50, %v7158_v41 }
 0x351   :  { %v7211_v0 = vpop.f32.mrb[176].mxu1 }
 0x352   :  { %v7159_v40 = vpop.f32.mrb[160].mxu0  ;;  %v7212_v13 = vpop.f32.mrb[177].mxu1 }
 0x353   :  { %v7160_v17 = vpop.f32.mrb[161].mxu0  ;;  %v7213_v23 = vadd.f32 %v7212_v13, %v7211_v0  ;;  %v7214_v43 = vpop.f32.mrb[178].mxu1 }
 0x354   :  { %v7161_v53 = vadd.f32 %v7160_v17, %v7159_v40  ;;  %v7162_v7 = vpop.f32.mrb[162].mxu0  ;;  %v7215_v21 = vpop.f32.mrb[179].mxu1 }
 0x355   :  { %v7163_v3 = vpop.f32.mrb[163].mxu0  ;;  %v7216_v32 = vadd.f32 %v7215_v21, %v7214_v43 }
 0x356   :  { %3222 = vmatmul.mubr.bf16.gmra.mrb[252].mxu0 %v8560_v4  ;;  %v7164_v44 = vadd.f32 %v7163_v3, %v7162_v7  ;;  %v10585_v63 = vadd.f32 %v7213_v23, %v7161_v53 }
 0x357   :  { %3229 = vmatprep.mubr.bf16.mxu0 %v8563_v19  ;;  %v6825_v19 = vcombine.low %v6814_v16, %v6814_v16 }
 0x358   :  { %v10587_v8 = vadd.f32 %v7216_v32, %v7164_v44 }
 0x359   :  { %v7217_v34 = vpop.f32.mrb[180].mxu1 }
 0x35a   :  { %v7165_v33 = vpop.f32.mrb[164].mxu0  ;;  %v7218_v15 = vpop.f32.mrb[181].mxu1 }
 0x35b   :  { %v7166_v30 = vpop.f32.mrb[165].mxu0  ;;  %v7219_v18 = vadd.f32 %v7218_v15, %v7217_v34  ;;  %v7220_v22 = vpop.f32.mrb[182].mxu1 }
 0x35c   :  { %v7167_v38 = vadd.f32 %v7166_v30, %v7165_v33  ;;  %v7168_v20 = vpop.f32.mrb[166].mxu0  ;;  %v7221_v51 = vpop.f32.mrb[183].mxu1 }
 0x35d   :  { %v7169_v49 = vpop.f32.mrb[167].mxu0  ;;  %v7222_v10 = vadd.f32 %v7221_v51, %v7220_v22 }
 0x35e   :  { %3230 = vmatmul.mubr.bf16.gmra.mrb[0].mxu0 %v8561_v5  ;;  %v7170_v62 = vadd.f32 %v7169_v49, %v7168_v20  ;;  %v10595_v61 = vadd.f32 %v7219_v18, %v7167_v38 }
 0x35f   :  { %3237 = vmatprep.mubr.bf16.mxu0 %v8566_v11 }
 0x360   :  { %v10597_v1 = vadd.f32 %v7222_v10, %v7170_v62 }
 0x361   :  { %v7223_v26 = vpop.f32.mrb[184].mxu1 }
 0x362   :  { %v7171_v28 = vpop.f32.mrb[168].mxu0  ;;  %v7224_v14 = vpop.f32.mrb[185].mxu1 }
 0x363   :  { %v7172_v59 = vpop.f32.mrb[169].mxu0  ;;  %v7225_v39 = vadd.f32 %v7224_v14, %v7223_v26  ;;  %v7226_v56 = vpop.f32.mrb[186].mxu1 }
 0x364   :  { %v7173_v54 = vadd.f32 %v7172_v59, %v7171_v28  ;;  %v7174_v37 = vpop.f32.mrb[170].mxu0  ;;  %v7227_v60 = vpop.f32.mrb[187].mxu1 }
 0x365   :  { %v7175_v31 = vpop.f32.mrb[171].mxu0  ;;  %v7228_v42 = vadd.f32 %v7227_v60, %v7226_v56 }
 0x366   :  { %3238 = vmatmul.mubr.bf16.gmra.mrb[4].mxu0 %v8564_v25  ;;  %v7176_v9 = vadd.f32 %v7175_v31, %v7174_v37  ;;  %v10605_v29 = vadd.f32 %v7225_v39, %v7173_v54 }
 0x367   :  { %3245 = vmatprep.mubr.bf16.mxu0 %v8569_v2 }
 0x368   :  { %v10610_v35 = vadd.f32 %v7228_v42, %v7176_v9 }
 0x369   :  { %v7229_v12 = vpop.f32.mrb[188].mxu1 }
 0x36a   :  { %v7177_v6 = vpop.f32.mrb[172].mxu0  ;;  %v7230_v45 = vpop.f32.mrb[189].mxu1 }
 0x36b   :  { %v7178_v47 = vpop.f32.mrb[173].mxu0  ;;  %v7231_v57 = vadd.f32 %v7230_v45, %v7229_v12  ;;  %v7232_v24 = vpop.f32.mrb[190].mxu1 }
 0x36c   :  { %v7179_v50 = vadd.f32 %v7178_v47, %v7177_v6  ;;  %v7180_v41 = vpop.f32.mrb[174].mxu0  ;;  %v7233_v0 = vpop.f32.mrb[191].mxu1 }
 0x36d   :  { %v7181_v4 = vpop.f32.mrb[175].mxu0 }
 0x36e   :  { %3246 = vmatmul.mubr.bf16.gmra.mrb[8].mxu0 %v8567_v46  ;;  %v10615_v40 = vadd.f32 %v7231_v57, %v7179_v50 }
 0x36f   :  { %3253 = vmatprep.mubr.bf16.mxu0 %v6826_v58 }
 0x371   :  { %v7303_v13 = vpop.f32.mrb[192].mxu1 }
 0x372   :  { %v7251_v17 = vpop.f32.mrb[176].mxu0  ;;  %v7304_v23 = vpop.f32.mrb[193].mxu1 }
 0x373   :  { %v7252_v43 = vpop.f32.mrb[177].mxu0  ;;  %v7305_v53 = vadd.f32 %v7304_v23, %v7303_v13  ;;  %v7306_v7 = vpop.f32.mrb[194].mxu1 }
 0x374   :  { %v7253_v21 = vadd.f32 %v7252_v43, %v7251_v17  ;;  %v7254_v3 = vpop.f32.mrb[178].mxu0  ;;  %v7307_v32 = vpop.f32.mrb[195].mxu1 }
 0x375   :  { %v7255_v44 = vpop.f32.mrb[179].mxu0  ;;  %v7308_v34 = vadd.f32 %v7307_v32, %v7306_v7 }
 0x376   :  { %3254 = vmatmul.mubr.bf16.gmra.mrb[12].mxu0 %v6825_v19  ;;  %v2301_v5 = vadd.f32 %v7253_v21, %v10564_v52  ;;  %v7256_v33 = vadd.f32 %v7255_v44, %v7254_v3 }
 0x377   :  { %3672 = vmatprep.mubr.bf16.mxu0 %v12031_v48 }
 0x378   :  { %v2302_v15 = vadd.f32 %v7256_v33, %v10566_v36  ;;  %v10620_v11 = vadd.f32 %v7305_v53, %v2301_v5 }
 0x379   :  { %v7309_v30 = vpop.f32.mrb[196].mxu1 }
 0x37a   :  { %v10622_v18 = vadd.f32 %v7308_v34, %v2302_v15  ;;  %v7257_v22 = vpop.f32.mrb[180].mxu0  ;;  %v7310_v38 = vpop.f32.mrb[197].mxu1 }
 0x37b   :  { %v7258_v20 = vpop.f32.mrb[181].mxu0  ;;  %v7311_v51 = vadd.f32 %v7310_v38, %v7309_v30  ;;  %v7312_v49 = vpop.f32.mrb[198].mxu1 }
 0x37c   :  { %v7259_v10 = vadd.f32 %v7258_v20, %v7257_v22  ;;  %v7260_v62 = vpop.f32.mrb[182].mxu0  ;;  %v7313_v26 = vpop.f32.mrb[199].mxu1 }
 0x37d   :  { %v7261_v25 = vpop.f32.mrb[183].mxu0  ;;  %v7314_v52 = vadd.f32 %v7313_v26, %v7312_v49 }
 0x37e   :  { %v2303_v28 = vadd.f32 %v7259_v10, %v10575_v27  ;;  %v7262_v14 = vadd.f32 %v7261_v25, %v7260_v62 }
 0x380   :  { %v2304_v36 = vadd.f32 %v7262_v14, %v10577_v55  ;;  %v10626_v2 = vadd.f32 %v7311_v51, %v2303_v28 }
 0x381   :  { %v7315_v59 = vpop.f32.mrb[200].mxu1 }
 0x382   :  { %v10628_v39 = vadd.f32 %v7314_v52, %v2304_v36  ;;  %v7263_v56 = vpop.f32.mrb[184].mxu0  ;;  %v7316_v54 = vpop.f32.mrb[201].mxu1 }
 0x383   :  { %v7264_v37 = vpop.f32.mrb[185].mxu0  ;;  %v7317_v60 = vadd.f32 %v7316_v54, %v7315_v59  ;;  %v7318_v31 = vpop.f32.mrb[202].mxu1 }
 0x384   :  { %v7265_v42 = vadd.f32 %v7264_v37, %v7263_v56  ;;  %v7266_v9 = vpop.f32.mrb[186].mxu0  ;;  %v7319_v16 = vpop.f32.mrb[203].mxu1  ;;  %v8577_v37 = vld [vmem:[#allocation5 + $0xc] ss:$36 sps:$4 sm:$0xff]  }
 0x385   :  { %v7267_v12 = vpop.f32.mrb[187].mxu0  ;;  %v7320_v46 = vadd.f32 %v7319_v16, %v7318_v31  ;;  %3640 = vmatprep.subr.bf16.mxu0 %v8577_v37  ;;  %v8578_v16 = vld [vmem:[#allocation5 + $0x48] ss:$36 sps:$4 sm:$0xff]  }
 0x386   :  { %v2305_v27 = vadd.f32 %v7265_v42, %v10585_v63  ;;  %v7268_v6 = vadd.f32 %v7267_v12, %v7266_v9  ;;  %v8580_v42 = vld [vmem:[#allocation5 + $0x4c] ss:$36 sps:$4 sm:$0xff]   ;;  %v8583_v9 = vld [vmem:[#allocation5 + $0x54] ss:$36 sps:$4 sm:$0xff]  }
 0x387   :  { %v8581_v12 = vld [vmem:[#allocation5 + $0x50] ss:$36 sps:$4 sm:$0xff]  }
 0x388   :  { %v2306_v55 = vadd.f32 %v7268_v6, %v10587_v8  ;;  %v10632_v45 = vadd.f32 %v7317_v60, %v2305_v27  ;;  %v8572_v60 = vld [vmem:[#allocation5] ss:$36 sps:$4 sm:$0xff]   ;;  %v8584_v27 = vld [vmem:[#allocation5 + $0x90] ss:$36 sps:$4 sm:$0xff]   ;;  %v8587_v6 = vld [vmem:[#allocation5 + $0x98] ss:$36 sps:$4 sm:$0xff]  }
 0x389   :  { %v7321_v58 = vpop.f32.mrb[204].mxu1 }
 0x38a   :  { %v10634_v47 = vadd.f32 %v7320_v46, %v2306_v55  ;;  %v7269_v57 = vpop.f32.mrb[188].mxu0  ;;  %v7322_v24 = vpop.f32.mrb[205].mxu1  ;;  %v8586_v46 = vld [vmem:[#allocation5 + $0x94] ss:$36 sps:$4 sm:$0xff]   ;;  %v8592_v55 = vld [vmem:[#allocation5 + $0xdc] ss:$36 sps:$4 sm:$0xff]  }
 0x38b   :  { %v7270_v50 = vpop.f32.mrb[189].mxu0  ;;  %v7323_v41 = vadd.f32 %v7322_v24, %v7321_v58  ;;  %v7324_v0 = vpop.f32.mrb[206].mxu1  ;;  %v8595_v58 = vld [vmem:[#allocation5 + $0xe4] ss:$36 sps:$4 sm:$0xff]  }
 0x38c   :  { %v7271_v4 = vadd.f32 %v7270_v50, %v7269_v57  ;;  %v7272_v13 = vpop.f32.mrb[190].mxu0  ;;  %v7325_v19 = vpop.f32.mrb[207].mxu1  ;;  %v8590_v57 = vld [vmem:[#allocation5 + $0xd8] ss:$36 sps:$4 sm:$0xff]   ;;  %v8593_v24 = vld [vmem:[#allocation5 + $0xe0] ss:$36 sps:$4 sm:$0xff]  }
 0x38d   :  { %v7273_v17 = vpop.f32.mrb[191].mxu0  ;;  %v7326_v23 = vadd.f32 %v7325_v19, %v7324_v0 }
 0x38e   :  { %v2307_v63 = vadd.f32 %v7271_v4, %v10595_v61  ;;  %v7274_v43 = vadd.f32 %v7273_v17, %v7272_v13 }
 0x390   :  { %v2308_v8 = vadd.f32 %v7274_v43, %v10597_v1  ;;  %v10638_v53 = vadd.f32 %v7323_v41, %v2307_v63 }
 0x391   :  { %v7327_v7 = vpop.f32.mrb[208].mxu1 }
 0x392   :  { %v10640_v21 = vadd.f32 %v7326_v23, %v2308_v8  ;;  %v7275_v3 = vpop.f32.mrb[192].mxu0  ;;  %v7328_v32 = vpop.f32.mrb[209].mxu1 }
 0x393   :  { %v7276_v44 = vpop.f32.mrb[193].mxu0  ;;  %v7329_v34 = vadd.f32 %v7328_v32, %v7327_v7  ;;  %v7330_v5 = vpop.f32.mrb[210].mxu1 }
 0x394   :  { %v7277_v33 = vadd.f32 %v7276_v44, %v7275_v3  ;;  %v7278_v15 = vpop.f32.mrb[194].mxu0  ;;  %v7331_v30 = vpop.f32.mrb[211].mxu1 }
 0x395   :  { %v7279_v22 = vpop.f32.mrb[195].mxu0  ;;  %v7332_v38 = vadd.f32 %v7331_v30, %v7330_v5 }
 0x396   :  { %v2309_v61 = vadd.f32 %v7277_v33, %v10605_v29  ;;  %v7280_v20 = vadd.f32 %v7279_v22, %v7278_v15  ;;  %v8574_v29 = vld [vmem:[#allocation5 + $0x4] ss:$36 sps:$4 sm:$0xff]  }
 0x397   :  { %3549 = vmatprep.subr.bf16.mxu1 %v8574_v29 }
 0x398   :  { %v2310_v1 = vadd.f32 %v7280_v20, %v10610_v35  ;;  %v10644_v51 = vadd.f32 %v7329_v34, %v2309_v61  ;;  %v8575_v35 = vld [vmem:[#allocation5 + $0x8] ss:$36 sps:$4 sm:$0xff]   ;;  %3550 = vmatpush1.bf16.msra.mxu1 %v8572_v60 }
 0x399   :  { %v7333_v49 = vpop.f32.mrb[212].mxu1  ;;  %3641 = vmatpush1.bf16.msra.mxu0 %v8575_v35  ;;  %3551 = vmatprep.subr.bf16.mxu1 %v8580_v42 }
 0x39a   :  { %v10646_v10 = vadd.f32 %v7332_v38, %v2310_v1  ;;  %v7281_v62 = vpop.f32.mrb[196].mxu0  ;;  %v7334_v26 = vpop.f32.mrb[213].mxu1  ;;  %3642 = vmatprep.subr.bf16.mxu0 %v8583_v9 }
 0x39b   :  { %v7282_v25 = vpop.f32.mrb[197].mxu0  ;;  %v7335_v52 = vadd.f32 %v7334_v26, %v7333_v49  ;;  %v7336_v28 = vpop.f32.mrb[214].mxu1 }
 0x39c   :  { %v7283_v14 = vadd.f32 %v7282_v25, %v7281_v62  ;;  %v7284_v36 = vpop.f32.mrb[198].mxu0  ;;  %v7337_v59 = vpop.f32.mrb[215].mxu1  ;;  %3552 = vmatpush1.bf16.msra.mxu1 %v8578_v16  ;;  %v8598_v25 = vld [vmem:[#allocation5 + $0x14] ss:$36 sps:$4 sm:$0xff]  }
 0x39d   :  { %v7285_v56 = vpop.f32.mrb[199].mxu0  ;;  %3643 = vmatpush1.bf16.msra.mxu0 %v8581_v12  ;;  %3553 = vmatprep.subr.bf16.mxu1 %v8586_v46 }
 0x39e   :  { %v2311_v54 = vadd.f32 %v7283_v14, %v10615_v40  ;;  %v8589_v40 = vld [vmem:[#allocation5 + $0x9c] ss:$36 sps:$4 sm:$0xff]  }
 0x39f   :  { %3644 = vmatprep.subr.bf16.mxu0 %v8589_v40 }
 0x3a0   :  { %v10649_v31 = vadd.f32 %v7335_v52, %v2311_v54  ;;  %3554 = vmatpush1.bf16.msra.mxu1 %v8584_v27 }
 0x3a1   :  { %3645 = vmatpush1.bf16.msra.mxu0 %v8587_v6  ;;  %3555 = vmatprep.subr.bf16.mxu1 %v8592_v55 }
 0x3a2   :  { %3646 = vmatprep.subr.bf16.mxu0 %v8595_v58 }
 0x3a4   :  { %3556 = vmatpush1.bf16.msra.mxu1 %v8590_v57 }
 0x3a5   :  { %3647 = vmatpush1.bf16.msra.mxu0 %v8593_v24  ;;  %3731 = vmatprep.subr.bf16.mxu1 %v8598_v25 }
 0x3c1   :  { %v7355_v50 = vpop.f32.mrb[200].mxu0 }
 0x3c2   :  { %v7356_v41 = vpop.f32.mrb[201].mxu0  ;;  %v7407_v0 = vpop.f32.mrb[216].mxu1 }
 0x3c3   :  { %v7357_v4 = vadd.f32 %v7356_v41, %v7355_v50  ;;  %v7358_v13 = vpop.f32.mrb[202].mxu0  ;;  %v7408_v19 = vpop.f32.mrb[217].mxu1 }
 0x3c4   :  { %v7359_v17 = vpop.f32.mrb[203].mxu0  ;;  %v7409_v23 = vadd.f32 %v7408_v19, %v7407_v0  ;;  %v7410_v63 = vpop.f32.mrb[218].mxu1 }
 0x3c5   :  { %v2621_v43 = vadd.f32 %v7357_v4, %v10620_v11  ;;  %v7360_v8 = vadd.f32 %v7359_v17, %v7358_v13  ;;  %v7411_v7 = vpop.f32.mrb[219].mxu1 }
 0x3c6   :  { %v7412_v3 = vadd.f32 %v7411_v7, %v7410_v63 }
 0x3c7   :  { %v2622_v32 = vadd.f32 %v7360_v8, %v10622_v18  ;;  %v10653_v44 = vadd.f32 %v7409_v23, %v2621_v43  ;;  %v8601_v18 = vld [vmem:[#allocation5 + $0x1c] ss:$36 sps:$4 sm:$0xff]  }
 0x3c8   :  { %3822 = vmatprep.subr.bf16.mxu0 %v8601_v18 }
 0x3c9   :  { %v10655_v34 = vadd.f32 %v7412_v3, %v2622_v32  ;;  %v7361_v5 = vpop.f32.mrb[204].mxu0 }
 0x3ca   :  { %v7362_v33 = vpop.f32.mrb[205].mxu0  ;;  %v7413_v15 = vpop.f32.mrb[220].mxu1 }
 0x3cb   :  { %v7363_v30 = vadd.f32 %v7362_v33, %v7361_v5  ;;  %v7364_v22 = vpop.f32.mrb[206].mxu0  ;;  %v7414_v38 = vpop.f32.mrb[221].mxu1 }
 0x3cc   :  { %v7365_v61 = vpop.f32.mrb[207].mxu0  ;;  %v7415_v20 = vadd.f32 %v7414_v38, %v7413_v15  ;;  %v7416_v1 = vpop.f32.mrb[222].mxu1 }
 0x3cd   :  { %v2623_v11 = vadd.f32 %v7363_v30, %v10626_v2  ;;  %v7366_v49 = vadd.f32 %v7365_v61, %v7364_v22  ;;  %v7417_v62 = vpop.f32.mrb[223].mxu1 }
 0x3ce   :  { %v7418_v26 = vadd.f32 %v7417_v62, %v7416_v1 }
 0x3cf   :  { %v2624_v52 = vadd.f32 %v7366_v49, %v10628_v39  ;;  %v10659_v28 = vadd.f32 %v7415_v20, %v2623_v11 }
 0x3d1   :  { %v10661_v14 = vadd.f32 %v7418_v26, %v2624_v52  ;;  %v7367_v36 = vpop.f32.mrb[208].mxu0 }
 0x3d2   :  { %v7368_v59 = vpop.f32.mrb[209].mxu0  ;;  %v7419_v56 = vpop.f32.mrb[224].mxu1 }
 0x3d3   :  { %v7369_v54 = vadd.f32 %v7368_v59, %v7367_v36  ;;  %v7370_v29 = vpop.f32.mrb[210].mxu0  ;;  %v7420_v37 = vpop.f32.mrb[225].mxu1 }
 0x3d4   :  { %v7371_v2 = vpop.f32.mrb[211].mxu0  ;;  %v7421_v60 = vadd.f32 %v7420_v37, %v7419_v56  ;;  %v7422_v35 = vpop.f32.mrb[226].mxu1 }
 0x3d5   :  { %v2625_v42 = vadd.f32 %v7369_v54, %v10632_v45  ;;  %v7372_v9 = vadd.f32 %v7371_v2, %v7370_v29  ;;  %v7423_v16 = vpop.f32.mrb[227].mxu1 }
 0x3d6   :  { %v7424_v39 = vadd.f32 %v7423_v16, %v7422_v35 }
 0x3d7   :  { %v2626_v12 = vadd.f32 %v7372_v9, %v10634_v47  ;;  %v10665_v46 = vadd.f32 %v7421_v60, %v2625_v42 }
 0x3d9   :  { %v10667_v40 = vadd.f32 %v7424_v39, %v2626_v12  ;;  %v7373_v27 = vpop.f32.mrb[212].mxu0 }
 0x3da   :  { %v7374_v6 = vpop.f32.mrb[213].mxu0  ;;  %v7425_v55 = vpop.f32.mrb[228].mxu1 }
 0x3db   :  { %v7375_v58 = vadd.f32 %v7374_v6, %v7373_v27  ;;  %v7376_v57 = vpop.f32.mrb[214].mxu0  ;;  %v7426_v24 = vpop.f32.mrb[229].mxu1 }
 0x3dc   :  { %v7377_v50 = vpop.f32.mrb[215].mxu0  ;;  %v7427_v41 = vadd.f32 %v7426_v24, %v7425_v55  ;;  %v7428_v0 = vpop.f32.mrb[230].mxu1 }
 0x3dd   :  { %v2627_v45 = vadd.f32 %v7375_v58, %v10638_v53  ;;  %v7378_v4 = vadd.f32 %v7377_v50, %v7376_v57  ;;  %v7429_v13 = vpop.f32.mrb[231].mxu1 }
 0x3de   :  { %v7430_v19 = vadd.f32 %v7429_v13, %v7428_v0 }
 0x3df   :  { %v2628_v47 = vadd.f32 %v7378_v4, %v10640_v21  ;;  %v10671_v17 = vadd.f32 %v7427_v41, %v2627_v45 }
 0x3e1   :  { %v10673_v23 = vadd.f32 %v7430_v19, %v2628_v47  ;;  %v7379_v63 = vpop.f32.mrb[216].mxu0 }
 0x3e2   :  { %v7380_v43 = vpop.f32.mrb[217].mxu0  ;;  %v7431_v8 = vpop.f32.mrb[232].mxu1 }
 0x3e3   :  { %v7381_v7 = vadd.f32 %v7380_v43, %v7379_v63  ;;  %v7382_v3 = vpop.f32.mrb[218].mxu0  ;;  %v7432_v32 = vpop.f32.mrb[233].mxu1 }
 0x3e4   :  { %v7383_v5 = vpop.f32.mrb[219].mxu0  ;;  %v7433_v33 = vadd.f32 %v7432_v32, %v7431_v8  ;;  %v7434_v15 = vpop.f32.mrb[234].mxu1 }
 0x3e5   :  { %v2629_v53 = vadd.f32 %v7381_v7, %v10644_v51  ;;  %v7384_v30 = vadd.f32 %v7383_v5, %v7382_v3  ;;  %v7435_v22 = vpop.f32.mrb[235].mxu1 }
 0x3e6   :  { %v7436_v38 = vadd.f32 %v7435_v22, %v7434_v15 }
 0x3e7   :  { %v2630_v21 = vadd.f32 %v7384_v30, %v10646_v10  ;;  %v10677_v61 = vadd.f32 %v7433_v33, %v2629_v53 }
 0x3e9   :  { %v10679_v20 = vadd.f32 %v7436_v38, %v2630_v21  ;;  %v7385_v1 = vpop.f32.mrb[220].mxu0 }
 0x3ea   :  { %v7386_v11 = vpop.f32.mrb[221].mxu0  ;;  %v7437_v49 = vpop.f32.mrb[236].mxu1 }
 0x3eb   :  { %v7387_v62 = vadd.f32 %v7386_v11, %v7385_v1  ;;  %v7438_v26 = vpop.f32.mrb[237].mxu1  ;;  %v7388_v25 = vpop.f32.mrb[222].mxu0 }
 0x3ec   :  { %v7439_v18 = vadd.f32 %v7438_v26, %v7437_v49  ;;  %v7389_v52 = vpop.f32.mrb[223].mxu0  ;;  %v7440_v36 = vpop.f32.mrb[238].mxu1 }
 0x3ed   :  { %v2631_v51 = vadd.f32 %v7387_v62, %v10649_v31  ;;  %v7441_v59 = vpop.f32.mrb[239].mxu1 }
 0x3ef   :  { %v10682_v56 = vadd.f32 %v7439_v18, %v2631_v51 }
 0x3f1   :  { %v7459_v54 = vpop.f32.mrb[224].mxu0 }
 0x3f2   :  { %v7460_v10 = vpop.f32.mrb[225].mxu0  ;;  %v7511_v29 = vpop.f32.mrb[240].mxu1 }
 0x3f3   :  { %v7461_v37 = vadd.f32 %v7460_v10, %v7459_v54  ;;  %v7462_v2 = vpop.f32.mrb[226].mxu0  ;;  %v7512_v60 = vpop.f32.mrb[241].mxu1 }
 0x3f4   :  { %v7463_v35 = vpop.f32.mrb[227].mxu0  ;;  %v7513_v42 = vadd.f32 %v7512_v60, %v7511_v29  ;;  %v7514_v9 = vpop.f32.mrb[242].mxu1 }
 0x3f5   :  { %v2941_v16 = vadd.f32 %v7461_v37, %v10653_v44  ;;  %v7464_v39 = vadd.f32 %v7463_v35, %v7462_v2  ;;  %v7515_v12 = vpop.f32.mrb[243].mxu1 }
 0x3f6   :  { %v7516_v27 = vadd.f32 %v7515_v12, %v7514_v9 }
 0x3f7   :  { %v2942_v6 = vadd.f32 %v7464_v39, %v10655_v34  ;;  %v10686_v31 = vadd.f32 %v7513_v42, %v2941_v16 }
 0x3f9   :  { %v10688_v55 = vadd.f32 %v7516_v27, %v2942_v6  ;;  %v7465_v58 = vpop.f32.mrb[228].mxu0 }
 0x3fa   :  { %v7466_v57 = vpop.f32.mrb[229].mxu0  ;;  %v7517_v24 = vpop.f32.mrb[244].mxu1 }
 0x3fb   :  { %v7467_v50 = vadd.f32 %v7466_v57, %v7465_v58  ;;  %v7468_v41 = vpop.f32.mrb[230].mxu0  ;;  %v7518_v0 = vpop.f32.mrb[245].mxu1 }
 0x3fc   :  { %v7469_v45 = vpop.f32.mrb[231].mxu0  ;;  %v7519_v4 = vadd.f32 %v7518_v0, %v7517_v24  ;;  %v7520_v13 = vpop.f32.mrb[246].mxu1 }
 0x3fd   :  { %v2943_v44 = vadd.f32 %v7467_v50, %v10659_v28  ;;  %v7470_v19 = vadd.f32 %v7469_v45, %v7468_v41  ;;  %v7521_v47 = vpop.f32.mrb[247].mxu1 }
 0x3fe   :  { %v7522_v63 = vadd.f32 %v7521_v47, %v7520_v13 }
 0x3ff   :  { %v2944_v34 = vadd.f32 %v7470_v19, %v10661_v14  ;;  %v10692_v43 = vadd.f32 %v7519_v4, %v2943_v44 }
 0x401   :  { %v10694_v8 = vadd.f32 %v7522_v63, %v2944_v34  ;;  %v7471_v7 = vpop.f32.mrb[232].mxu0 }
 0x402   :  { %v7472_v3 = vpop.f32.mrb[233].mxu0  ;;  %v7523_v32 = vpop.f32.mrb[248].mxu1 }
 0x403   :  { %v7473_v5 = vadd.f32 %v7472_v3, %v7471_v7  ;;  %v7474_v33 = vpop.f32.mrb[234].mxu0  ;;  %v7524_v15 = vpop.f32.mrb[249].mxu1 }
 0x404   :  { %v7475_v53 = vpop.f32.mrb[235].mxu0  ;;  %v7525_v30 = vadd.f32 %v7524_v15, %v7523_v32  ;;  %v7526_v22 = vpop.f32.mrb[250].mxu1 }
 0x405   :  { %v2945_v28 = vadd.f32 %v7473_v5, %v10665_v46  ;;  %v7476_v38 = vadd.f32 %v7475_v53, %v7474_v33  ;;  %v7527_v21 = vpop.f32.mrb[251].mxu1  ;;  %v10720_v53 = vld [vmem:[%s11810_s5] ss:$0 sm:$0xff] }
 0x406   :  { %v7528_v1 = vadd.f32 %v7527_v21, %v7526_v22 }
 0x407   :  { %v2946_v14 = vadd.f32 %v7476_v38, %v10667_v40  ;;  %v10698_v11 = vadd.f32 %v7525_v30, %v2945_v28 }
 0x409   :  { %v10700_v49 = vadd.f32 %v7528_v1, %v2946_v14  ;;  %v7477_v62 = vpop.f32.mrb[236].mxu0 }
 0x40a   :  { %v7478_v26 = vpop.f32.mrb[237].mxu0  ;;  %v7529_v25 = vpop.f32.mrb[252].mxu1 }
 0x40b   :  { %v7479_v18 = vadd.f32 %v7478_v26, %v7477_v62  ;;  %v7480_v52 = vpop.f32.mrb[238].mxu0  ;;  %v7530_v36 = vpop.f32.mrb[253].mxu1 }
 0x40c   :  { %v7481_v51 = vpop.f32.mrb[239].mxu0  ;;  %v7531_v59 = vadd.f32 %v7530_v36, %v7529_v25  ;;  %v7532_v54 = vpop.f32.mrb[254].mxu1 }
 0x40d   :  { %v2947_v46 = vadd.f32 %v7479_v18, %v10671_v17  ;;  %v7482_v10 = vadd.f32 %v7481_v51, %v7480_v52  ;;  %v7533_v29 = vpop.f32.mrb[255].mxu1 }
 0x40e   :  { %v7534_v37 = vadd.f32 %v7533_v29, %v7532_v54  ;;  %v8599_v54 = vld [vmem:[#allocation5 + $0x18] ss:$36 sps:$4 sm:$0xff]  }
 0x40f   :  { %v2948_v40 = vadd.f32 %v7482_v10, %v10673_v23  ;;  %v10704_v2 = vadd.f32 %v7531_v59, %v2947_v46  ;;  %v8604_v46 = vld [vmem:[#allocation5 + $0x5c] ss:$36 sps:$4 sm:$0xff]   ;;  %v8607_v10 = vld [vmem:[#allocation5 + $0x64] ss:$36 sps:$4 sm:$0xff]  }
 0x411   :  { %v10706_v60 = vadd.f32 %v7534_v37, %v2948_v40  ;;  %v7483_v35 = vpop.f32.mrb[240].mxu0  ;;  %v8602_v40 = vld [vmem:[#allocation5 + $0x58] ss:$36 sps:$4 sm:$0xff]  }
 0x412   :  { %v7484_v42 = vpop.f32.mrb[241].mxu0  ;;  %v7535_v9 = vpop.f32.mrb[0].mxu1 }
 0x413   :  { %v7485_v16 = vadd.f32 %v7484_v42, %v7483_v35  ;;  %v7486_v39 = vpop.f32.mrb[242].mxu0  ;;  %v7536_v12 = vpop.f32.mrb[1].mxu1  ;;  %v8605_v35 = vld [vmem:[#allocation5 + $0x60] ss:$36 sps:$4 sm:$0xff]  }
 0x414   :  { %v7487_v27 = vpop.f32.mrb[243].mxu0  ;;  %v7537_v6 = vadd.f32 %v7536_v12, %v7535_v9  ;;  %v7538_v58 = vpop.f32.mrb[2].mxu1  ;;  %v8613_v9 = vld [vmem:[#allocation5 + $0xac] ss:$36 sps:$4 sm:$0xff]  }
 0x415   :  { %v2949_v17 = vadd.f32 %v7485_v16, %v10677_v61  ;;  %v7488_v57 = vadd.f32 %v7487_v27, %v7486_v39  ;;  %v7539_v24 = vpop.f32.mrb[3].mxu1 }
 0x416   :  { %v7540_v50 = vadd.f32 %v7539_v24, %v7538_v58  ;;  %v8608_v24 = vld [vmem:[#allocation5 + $0xa0] ss:$36 sps:$4 sm:$0xff]  }
 0x417   :  { %v2950_v23 = vadd.f32 %v7488_v57, %v10679_v20  ;;  %v10710_v41 = vadd.f32 %v7537_v6, %v2949_v17 }
 0x419   :  { %v10712_v0 = vadd.f32 %v7540_v50, %v2950_v23  ;;  %v7489_v45 = vpop.f32.mrb[244].mxu0  ;;  %v8611_v50 = vld [vmem:[#allocation5 + $0xa8] ss:$36 sps:$4 sm:$0xff]  }
 0x41a   :  { %v7490_v4 = vpop.f32.mrb[245].mxu0  ;;  %v7541_v13 = vpop.f32.mrb[4].mxu1  ;;  %v8616_v23 = vld [vmem:[#allocation5 + $0xec] ss:$36 sps:$4 sm:$0xff]  }
 0x41b   :  { %v7491_v44 = vadd.f32 %v7490_v4, %v7489_v45  ;;  %v7542_v19 = vpop.f32.mrb[5].mxu1  ;;  %v7492_v47 = vpop.f32.mrb[246].mxu0  ;;  %v8619_v45 = vld [vmem:[#allocation5 + $0xf4] ss:$36 sps:$4 sm:$0xff]  }
 0x41c   :  { %v7543_v63 = vadd.f32 %v7542_v19, %v7541_v13  ;;  %v7493_v34 = vpop.f32.mrb[247].mxu0  ;;  %v7544_v7 = vpop.f32.mrb[6].mxu1  ;;  %v8614_v19 = vld [vmem:[#allocation5 + $0xe8] ss:$36 sps:$4 sm:$0xff]   ;;  %v8617_v47 = vld [vmem:[#allocation5 + $0xf0] ss:$36 sps:$4 sm:$0xff]  }
 0x41d   :  { %v2951_v61 = vadd.f32 %v7491_v44, %v10682_v56  ;;  %v7545_v3 = vpop.f32.mrb[7].mxu1 }
 0x41f   :  { %v10715_v32 = vadd.f32 %v7543_v63, %v2951_v61 }
 0x421   :  { %v7563_v5 = vpop.f32.mrb[248].mxu0 }
 0x422   :  { %v7564_v20 = vpop.f32.mrb[249].mxu0 }
 0x423   :  { %v7565_v33 = vadd.f32 %v7564_v20, %v7563_v5  ;;  %v7566_v15 = vpop.f32.mrb[250].mxu0 }
 0x424   :  { %v7567_v30 = vpop.f32.mrb[251].mxu0 }
 0x425   :  { %v3261_v22 = vadd.f32 %v7565_v33, %v10686_v31  ;;  %v7568_v28 = vadd.f32 %v7567_v30, %v7566_v15  ;;  %v8596_v31 = vld [vmem:[#allocation5 + $0x10] ss:$36 sps:$4 sm:$0xff]  }
 0x427   :  { %v3279_v38 = vadd.f32 %v10720_v53, %v3261_v22  ;;  %v3262_v56 = vadd.f32 %v7568_v28, %v10688_v55 }
 0x429   :  { %v3280_v21 = vadd.f32 %v10720_v53, %v3262_v56  ;;  %v7569_v1 = vpop.f32.mrb[252].mxu0  ;;  %v3290_v62 = vmax.f32 %v3279_v38, 0.0 }
 0x42a   :  { %v7570_v14 = vpop.f32.mrb[253].mxu0 }
 0x42b   :  { %v3291_v26 = vmax.f32 %v3280_v21, 0.0  ;;  %v7571_v25 = vadd.f32 %v7570_v14, %v7569_v1  ;;  %v7572_v18 = vpop.f32.mrb[254].mxu0 }
 0x42c   :  { %v7573_v52 = vpop.f32.mrb[255].mxu0 }
 0x42d   :  { %v10726_v36 = vpack.c.bf16 %v3291_v26, %v3290_v62  ;;  %v3263_v51 = vadd.f32 %v7571_v25, %v10692_v43  ;;  %v7574_v59 = vadd.f32 %v7573_v52, %v7572_v18 }
 0x42f   :  { %v3281_v55 = vadd.f32 %v10720_v53, %v3263_v51  ;;  %v3264_v29 = vadd.f32 %v7574_v59, %v10694_v8  ;;  %6864 = vmatmul.mubr.msk.bf16.vlgmr.msra.gmra.mrb[8].mxu1 %vm729_vm1, %v10726_v36  ;;  %6870 = vmatmul.mubr.msk.bf16.vlgmr.msra.gmra.mrb[16].mxu0 %vm729_vm1, %v10726_v36  ;;  %v8610_v8 = vld [vmem:[#allocation5 + $0xa4] ss:$36 sps:$4 sm:$0xff]  }
 0x430   :  { %3591 = vmatprep.mubr.bf16.mxu1 %v12031_v48  ;;  %3682 = vmatprep.mubr.bf16.mxu0 %v12031_v48 }
 0x431   :  { %v3282_v43 = vadd.f32 %v10720_v53, %v3264_v29  ;;  %v7575_v37 = vpop.f32.mrb[0].mxu0  ;;  %3732 = vmatpush1.bf16.msra.mxu1 %v8596_v31  ;;  %3823 = vmatpush1.bf16.msra.mxu0 %v8599_v54  ;;  %v3292_v16 = vmax.f32 %v3281_v55, 0.0 }
 0x432   :  { %v7576_v42 = vpop.f32.mrb[1].mxu0  ;;  %3733 = vmatprep.subr.bf16.mxu1 %v8604_v46  ;;  %3824 = vmatprep.subr.bf16.mxu0 %v8607_v10 }
 0x433   :  { %v3293_v39 = vmax.f32 %v3282_v43, 0.0  ;;  %v7577_v12 = vadd.f32 %v7576_v42, %v7575_v37  ;;  %v7578_v27 = vpop.f32.mrb[2].mxu0  ;;  %v8793_v42 = vmov 0.0  }
 0x434   :  { %v7579_v6 = vpop.f32.mrb[3].mxu0 }
 0x435   :  { %v10738_v58 = vpack.c.bf16 %v3293_v39, %v3292_v16  ;;  %v3265_v17 = vadd.f32 %v7577_v12, %v10698_v11  ;;  %v7580_v57 = vadd.f32 %v7579_v6, %v7578_v27  ;;  %3734 = vmatpush1.bf16.msra.mxu1 %v8602_v40  ;;  %3825 = vmatpush1.bf16.msra.mxu0 %v8605_v35  ;;  %v8623_v35 = vld [vmem:[#allocation5 + $0xf8] ss:$36 sps:$4 sm:$0xff]  }
 0x436   :  { %3735 = vmatprep.subr.bf16.mxu1 %v8610_v8  ;;  %3826 = vmatprep.subr.bf16.mxu0 %v8613_v9 }
 0x437   :  { %v3283_v4 = vadd.f32 %v10720_v53, %v3265_v17  ;;  %v3266_v13 = vadd.f32 %v7580_v57, %v10700_v49  ;;  %6865 = vmatmul.mubr.msk.bf16.gmra.mrb[12].mxu1 %vm729_vm1, %v10738_v58  ;;  %6871 = vmatmul.mubr.msk.bf16.gmra.mrb[20].mxu0 %vm729_vm1, %v10738_v58  ;;  %v8620_v49 = vld [vmem:[#allocation5 + $0x20] ss:$36 sps:$4 sm:$0xff]  }
 0x438   :  { %3601 = vmatprep.mubr.bf16.mxu1 %v12031_v48  ;;  %3692 = vmatprep.mubr.bf16.mxu0 %v12031_v48 }
 0x439   :  { %v3284_v11 = vadd.f32 %v10720_v53, %v3266_v13  ;;  %v7581_v44 = vpop.f32.mrb[4].mxu0  ;;  %3736 = vmatpush1.bf16.msra.mxu1 %v8608_v24  ;;  %3827 = vmatpush1.bf16.msra.mxu0 %v8611_v50  ;;  %v3294_v34 = vmax.f32 %v3283_v4, 0.0 }
 0x43a   :  { %v7582_v63 = vpop.f32.mrb[5].mxu0  ;;  %3737 = vmatprep.subr.bf16.mxu1 %v8616_v23  ;;  %3828 = vmatprep.subr.bf16.mxu0 %v8619_v45 }
 0x43b   :  { %v3295_v7 = vmax.f32 %v3284_v11, 0.0  ;;  %v7583_v61 = vadd.f32 %v7582_v63, %v7581_v44  ;;  %v7584_v3 = vpop.f32.mrb[6].mxu0 }
 0x43c   :  { %v7585_v5 = vpop.f32.mrb[7].mxu0 }
 0x43d   :  { %v10750_v20 = vpack.c.bf16 %v3295_v7, %v3294_v34  ;;  %v3267_v33 = vadd.f32 %v7583_v61, %v10704_v2  ;;  %v7586_v15 = vadd.f32 %v7585_v5, %v7584_v3  ;;  %3738 = vmatpush1.bf16.msra.mxu1 %v8614_v19  ;;  %3829 = vmatpush1.bf16.msra.mxu0 %v8617_v47 }
 0x43e   :  { %7904 = vmatprep.subr.bf16.mxu1 %v8620_v49  ;;  %7948 = vmatprep.subr.bf16.mxu0 %v8793_v42 }
 0x43f   :  { %v3285_v30 = vadd.f32 %v10720_v53, %v3267_v33  ;;  %v3268_v22 = vadd.f32 %v7586_v15, %v10706_v60  ;;  %6866 = vmatmul.mubr.msk.bf16.gmra.mrb[16].mxu1 %vm729_vm1, %v10750_v20  ;;  %6872 = vmatmul.mubr.msk.bf16.gmra.mrb[24].mxu0 %vm729_vm1, %v10750_v20 }
 0x440   :  { %3611 = vmatprep.mubr.bf16.mxu1 %v12031_v48  ;;  %3702 = vmatprep.mubr.bf16.mxu0 %v12031_v48 }
 0x441   :  { %v3286_v2 = vadd.f32 %v10720_v53, %v3268_v22  ;;  %v7587_v28 = vpop.f32.mrb[8].mxu0  ;;  %v3296_v56 = vmax.f32 %v3285_v30, 0.0 }
 0x442   :  { %v7588_v38 = vpop.f32.mrb[9].mxu0 }
 0x443   :  { %v3297_v21 = vmax.f32 %v3286_v2, 0.0  ;;  %v7589_v1 = vadd.f32 %v7588_v38, %v7587_v28  ;;  %v7590_v14 = vpop.f32.mrb[10].mxu0 }
 0x444   :  { %v7591_v62 = vpop.f32.mrb[11].mxu0 }
 0x445   :  { %v10762_v60 = vpack.c.bf16 %v3297_v21, %v3296_v56  ;;  %v3269_v26 = vadd.f32 %v7589_v1, %v10710_v41  ;;  %v7592_v25 = vadd.f32 %v7591_v62, %v7590_v14 }
 0x447   :  { %v3287_v18 = vadd.f32 %v10720_v53, %v3269_v26  ;;  %v3270_v52 = vadd.f32 %v7592_v25, %v10712_v0  ;;  %6867 = vmatmul.mubr.msk.bf16.gmra.mrb[20].mxu1 %vm729_vm1, %v10762_v60  ;;  %6873 = vmatmul.mubr.msk.bf16.gmra.mrb[28].mxu0 %vm729_vm1, %v10762_v60 }
 0x448   :  { %3621 = vmatprep.mubr.bf16.mxu1 %v12031_v48  ;;  %3712 = vmatprep.mubr.bf16.mxu0 %v12031_v48 }
 0x449   :  { %v3288_v51 = vadd.f32 %v10720_v53, %v3270_v52  ;;  %v7593_v59 = vpop.f32.mrb[12].mxu0  ;;  %v3298_v41 = vmax.f32 %v3287_v18, 0.0 }
 0x44a   :  { %v7594_v31 = vpop.f32.mrb[13].mxu0 }
 0x44b   :  { %v3299_v54 = vmax.f32 %v3288_v51, 0.0  ;;  %v7595_v46 = vadd.f32 %v7594_v31, %v7593_v59  ;;  %v7596_v10 = vpop.f32.mrb[14].mxu0 }
 0x44c   :  { %v7597_v55 = vpop.f32.mrb[15].mxu0 }
 0x44d   :  { %v3305_v0 = vpack.c.bf16 %v3299_v54, %v3298_v41  ;;  %v3271_v29 = vadd.f32 %v7595_v46, %v10715_v32  ;;  %v8621_v32 = vld [vmem:[#allocation5 + $0x68] ss:$36 sps:$4 sm:$0xff]  }
 0x44f   :  { %v3289_v43 = vadd.f32 %v10720_v53, %v3271_v29  ;;  %6868 = vmatmul.mubr.msk.bf16.gmra.mrb[24].mxu1 %vm729_vm1, %v3305_v0  ;;  %6874 = vmatmul.mubr.msk.bf16.gmra.mrb[32].mxu0 %vm729_vm1, %v3305_v0  ;;  %v8622_v53 = vld [vmem:[#allocation5 + $0xb0] ss:$36 sps:$4 sm:$0xff]  }
 0x450   :  { %3631 = vmatprep.mubr.bf16.mxu1 %v12031_v48  ;;  %3722 = vmatprep.mubr.bf16.mxu0 %v12031_v48 }
 0x451   :  { %v3300_v37 = vmax.f32 %v3289_v43, 0.0 }
 0x453   :  { %v3306_v40 = vpack.c.bf16 %v3300_v37, %v3300_v37 }
 0x457   :  { %6869 = vmatmul.mubr.msk.bf16.gmra.mrb[28].mxu1 %vm729_vm1, %v3306_v40  ;;  %6875 = vmatmul.mubr.msk.bf16.gmra.mrb[36].mxu0 %vm729_vm1, %v3306_v40 }
 0x458   :  { %3763 = vmatprep.mubr.bf16.mxu1 %v12031_v48  ;;  %3854 = vmatprep.mubr.bf16.mxu0 %v12031_v48 }
 0x45f   :  { %6876 = vmatmul.mubr.msk.bf16.vlgmr.msra.gmra.mrb[32].mxu1 %vm729_vm1, %v10726_v36  ;;  %6882 = vmatmul.mubr.msk.bf16.vlgmr.msra.gmra.mrb[40].mxu0 %vm729_vm1, %v10726_v36 }
 0x460   :  { %3773 = vmatprep.mubr.bf16.mxu1 %v12031_v48  ;;  %3864 = vmatprep.mubr.bf16.mxu0 %v12031_v48 }
 0x461   :  { %7905 = vmatpush3.bf16.msra.mxu1 %v8620_v49 }
 0x462   :  { %7906 = vmatprep.subr.bf16.mxu1 %v8621_v32 }
 0x465   :  { %7907 = vmatpush3.bf16.msra.mxu1 %v8621_v32 }
 0x466   :  { %7908 = vmatprep.subr.bf16.mxu1 %v8622_v53 }
 0x467   :  { %6877 = vmatmul.mubr.msk.bf16.gmra.mrb[36].mxu1 %vm729_vm1, %v10738_v58  ;;  %6883 = vmatmul.mubr.msk.bf16.gmra.mrb[44].mxu0 %vm729_vm1, %v10738_v58 }
 0x468   :  { %3783 = vmatprep.mubr.bf16.mxu1 %v12031_v48  ;;  %3874 = vmatprep.mubr.bf16.mxu0 %v12031_v48 }
 0x469   :  { %7909 = vmatpush3.bf16.msra.mxu1 %v8622_v53 }
 0x46a   :  { %7910 = vmatprep.subr.bf16.mxu1 %v8623_v35 }
 0x46d   :  { %7911 = vmatpush3.bf16.msra.mxu1 %v8623_v35  ;;  %v10901_v35 = vsel %vm4081_vm3, 65535, %v12031_v48 }
 0x46e   :  { %7924 = vmatprep.subr.bf16.mxu1 %v8793_v42 }
 0x46f   :  { %6878 = vmatmul.mubr.msk.bf16.gmra.mrb[40].mxu1 %vm729_vm1, %v10750_v20  ;;  %6884 = vmatmul.mubr.msk.bf16.gmra.mrb[48].mxu0 %vm729_vm1, %v10750_v20 }
 0x470   :  { %3793 = vmatprep.mubr.bf16.mxu1 %v12031_v48  ;;  %3884 = vmatprep.mubr.bf16.mxu0 %v12031_v48 }
 0x477   :  { %6879 = vmatmul.mubr.msk.bf16.gmra.mrb[44].mxu1 %vm729_vm1, %v10762_v60  ;;  %6885 = vmatmul.mubr.msk.bf16.gmra.mrb[52].mxu0 %vm729_vm1, %v10762_v60 }
 0x478   :  { %3803 = vmatprep.mubr.bf16.mxu1 %v12031_v48  ;;  %3894 = vmatprep.mubr.bf16.mxu0 %v12031_v48 }
 0x47f   :  { %6880 = vmatmul.mubr.msk.bf16.gmra.mrb[48].mxu1 %vm729_vm1, %v3305_v0  ;;  %6886 = vmatmul.mubr.msk.bf16.gmra.mrb[56].mxu0 %vm729_vm1, %v3305_v0 }
 0x480   :  { %3813 = vmatprep.mubr.bf16.mxu1 %v12031_v48  ;;  %3904 = vmatprep.mubr.bf16.mxu0 %v12031_v48 }
 0x487   :  { %6881 = vmatmul.mubr.msk.bf16.gmra.mrb[52].mxu1 %vm729_vm1, %v3306_v40  ;;  %6887 = vmatmul.mubr.msk.bf16.gmra.mrb[60].mxu0 %vm729_vm1, %v3306_v40 }
 0x488   :  { %7912 = vmatprep.mubr.msk.bf16.mxu1 %vm729_vm1, %v10726_v36  ;;  %7960 = vmatprep.mubr.msk.bf16.mxu0 %vm8794_vm2, %v8793_v42 }
 0x48f   :  { %7913 = vmatmul.mubr.msk.bf16.vlgmr.msra.gmra.mrb[56].mxu1 %vm729_vm1, %v10738_v58 }
 0x490   :  { %7916 = vmatprep.mubr.msk.bf16.mxu1 %vm729_vm1, %v10750_v20 }
 0x497   :  { %7917 = vmatmul.mubr.msk.bf16.gmra.mrb[60].mxu1 %vm729_vm1, %v10762_v60 }
 0x498   :  { %7920 = vmatprep.mubr.msk.bf16.mxu1 %vm729_vm1, %v3305_v0 }
 0x49f   :  { %7921 = vmatmul.mubr.msk.bf16.gmra.mrb[64].mxu1 %vm729_vm1, %v3306_v40 }
 0x4a0   :  { %7936 = vmatprep.mubr.msk.bf16.mxu1 %vm8794_vm2, %v8793_v42 }
 0x502   :  { %v3583_v36 = vpop.f32.mrb[8].mxu1  ;;  %v10830_v8 = vpop.f32.mrb[16].mxu0 }
 0x503   :  { %v3585_v9 = vpop.f32.mrb[9].mxu1  ;;  %v10832_v16 = vpop.f32.mrb[17].mxu0 }
 0x504   :  { %v3587_v39 = vpop.f32.mrb[10].mxu1  ;;  %v10834_v12 = vpop.f32.mrb[18].mxu0 }
 0x505   :  { %v3993_v27 = vpack.c.bf16 %v3587_v39, %v3583_v36  ;;  %v3995_v6 = vpack.c.bf16 %v10834_v12, %v10830_v8  ;;  %v3589_v58 = vpop.f32.mrb[11].mxu1  ;;  %v10838_v17 = vpop.f32.mrb[19].mxu0 }
 0x506   :  { %v3994_v57 = vpack.c.bf16 %v3589_v58, %v3585_v9  ;;  %v3996_v24 = vpack.c.bf16 %v10838_v17, %v10832_v16  ;;  %v8626_v17 = vld [vmem:[%s11812_s7 + $0x1c] sm:$0xff]  }
 0x507   :  { %7949 = vmatpush3.bf16.msra.mxu0 %v3993_v27 }
 0x508   :  { %7925 = vmatpush3.bf16.msra.mxu1 %v3994_v57  ;;  %7950 = vmatprep.subr.bf16.mxu0 %v8793_v42 }
 0x509   :  { %7926 = vmatprep.subr.bf16.mxu1 %v8793_v42 }
 0x50a   :  { %v3593_v50 = vpop.f32.mrb[12].mxu1  ;;  %v10844_v23 = vpop.f32.mrb[20].mxu0 }
 0x50b   :  { %v3595_v45 = vpop.f32.mrb[13].mxu1  ;;  %v10846_v4 = vpop.f32.mrb[21].mxu0 }
 0x50c   :  { %v3597_v13 = vpop.f32.mrb[14].mxu1  ;;  %v10848_v11 = vpop.f32.mrb[22].mxu0 }
 0x50d   :  { %v4002_v44 = vpack.c.bf16 %v3597_v13, %v3593_v50  ;;  %v4004_v19 = vpack.c.bf16 %v10848_v11, %v10844_v23  ;;  %v3599_v47 = vpop.f32.mrb[15].mxu1  ;;  %v10852_v63 = vpop.f32.mrb[23].mxu0 }
 0x50e   :  { %v4003_v49 = vpack.c.bf16 %v3599_v47, %v3595_v45  ;;  %v4005_v34 = vpack.c.bf16 %v10852_v63, %v10846_v4 }
 0x50f   :  { %7951 = vmatpush3.bf16.msra.mxu0 %v4002_v44 }
 0x510   :  { %7927 = vmatpush3.bf16.msra.mxu1 %v4003_v49  ;;  %7952 = vmatprep.subr.bf16.mxu0 %v8793_v42  ;;  %v8625_v49 = vld [vmem:[%s11812_s7] sm:$0xff]  }
 0x511   :  { %7928 = vmatprep.subr.bf16.mxu1 %v8793_v42 }
 0x512   :  { %v3603_v7 = vpop.f32.mrb[16].mxu1  ;;  %v10858_v61 = vpop.f32.mrb[24].mxu0 }
 0x513   :  { %v3605_v3 = vpop.f32.mrb[17].mxu1  ;;  %v10860_v5 = vpop.f32.mrb[25].mxu0 }
 0x514   :  { %v3607_v20 = vpop.f32.mrb[18].mxu1  ;;  %v10862_v33 = vpop.f32.mrb[26].mxu0 }
 0x515   :  { %v4011_v15 = vpack.c.bf16 %v3607_v20, %v3603_v7  ;;  %v4013_v30 = vpack.c.bf16 %v10862_v33, %v10858_v61  ;;  %v3609_v22 = vpop.f32.mrb[19].mxu1  ;;  %v10866_v2 = vpop.f32.mrb[27].mxu0  ;;  %v8624_v7 = vld [vmem:[%s11812_s7 + $0x14] sm:$0xff]  }
 0x516   :  { %v4012_v28 = vpack.c.bf16 %v3609_v22, %v3605_v3  ;;  %v4014_v38 = vpack.c.bf16 %v10866_v2, %v10860_v5  ;;  %v8628_v2 = vld [vmem:[%s11812_s7 + $0x24] ss:$0 sps:$4 sm:$0x33]  }
 0x517   :  { %7953 = vmatpush3.bf16.msra.mxu0 %v4011_v15 }
 0x518   :  { %7929 = vmatpush3.bf16.msra.mxu1 %v4012_v28  ;;  %7954 = vmatprep.subr.bf16.mxu0 %v8793_v42 }
 0x519   :  { %7930 = vmatprep.subr.bf16.mxu1 %v8793_v42 }
 0x51a   :  { %v3613_v56 = vpop.f32.mrb[20].mxu1  ;;  %v10872_v21 = vpop.f32.mrb[28].mxu0 }
 0x51b   :  { %v3615_v1 = vpop.f32.mrb[21].mxu1  ;;  %v10874_v14 = vpop.f32.mrb[29].mxu0 }
 0x51c   :  { %v3617_v62 = vpop.f32.mrb[22].mxu1  ;;  %v10876_v60 = vpop.f32.mrb[30].mxu0 }
 0x51d   :  { %v4020_v26 = vpack.c.bf16 %v3617_v62, %v3613_v56  ;;  %v4022_v25 = vpack.c.bf16 %v10876_v60, %v10872_v21  ;;  %v3619_v18 = vpop.f32.mrb[23].mxu1  ;;  %v10880_v52 = vpop.f32.mrb[31].mxu0 }
 0x51e   :  { %v4021_v51 = vpack.c.bf16 %v3619_v18, %v3615_v1  ;;  %v4023_v59 = vpack.c.bf16 %v10880_v52, %v10874_v14 }
 0x51f   :  { %7955 = vmatpush3.bf16.msra.mxu0 %v4020_v26 }
 0x520   :  { %7931 = vmatpush3.bf16.msra.mxu1 %v4021_v51  ;;  %7956 = vmatprep.subr.bf16.mxu0 %v8793_v42 }
 0x521   :  { %7932 = vmatprep.subr.bf16.mxu1 %v8793_v42 }
 0x522   :  { %v3623_v31 = vpop.f32.mrb[24].mxu1  ;;  %v10886_v41 = vpop.f32.mrb[32].mxu0 }
 0x523   :  { %v3625_v54 = vpop.f32.mrb[25].mxu1  ;;  %v10888_v46 = vpop.f32.mrb[33].mxu0 }
 0x524   :  { %v3627_v10 = vpop.f32.mrb[26].mxu1  ;;  %v10890_v55 = vpop.f32.mrb[34].mxu0 }
 0x525   :  { %v4029_v0 = vpack.c.bf16 %v3627_v10, %v3623_v31  ;;  %v4031_v29 = vpack.c.bf16 %v10890_v55, %v10886_v41  ;;  %v3629_v43 = vpop.f32.mrb[27].mxu1  ;;  %v10894_v37 = vpop.f32.mrb[35].mxu0 }
 0x526   :  { %v4030_v40 = vpack.c.bf16 %v3629_v43, %v3625_v54  ;;  %v4032_v32 = vpack.c.bf16 %v10894_v37, %v10888_v46  ;;  %v8630_v37 = vld [vmem:[%s11812_s7 + $0x28] sm:$0xff]  }
 0x527   :  { %7957 = vmatpush3.bf16.msra.mxu0 %v4029_v0 }
 0x528   :  { %7933 = vmatpush3.bf16.msra.mxu1 %v4030_v40  ;;  %7958 = vmatprep.subr.bf16.mxu0 %v8793_v42 }
 0x529   :  { %7934 = vmatprep.subr.bf16.mxu1 %v8793_v42 }
 0x52a   :  { %v3633_v53 = vpop.f32.mrb[28].mxu1  ;;  %v10903_v36 = vpop.f32.mrb[36].mxu0 }
 0x52b   :  { %v4038_v9 = vpack.c.bf16 %v3633_v53, %v3633_v53  ;;  %v3635_v39 = vpop.f32.mrb[29].mxu1  ;;  %v10905_v27 = vpop.f32.mrb[37].mxu0  ;;  %v4040_v31 = vpack.c.bf16 %v10903_v36, %v10903_v36 }
 0x52c   :  { %v4039_v58 = vpack.c.bf16 %v3635_v39, %v3635_v39  ;;  %v3637_v57 = vpop.f32.mrb[30].mxu1  ;;  %v3728_v50 = vpop.f32.mrb[38].mxu0 }
 0x52d   :  { %v4166_v45 = vand.u32 %v10901_v35, %v4038_v9  ;;  %v3638_v13 = vpop.f32.mrb[31].mxu1  ;;  %v3729_v44 = vpop.f32.mrb[39].mxu0  ;;  %v4253_v41 = vand.u32 %v10901_v35, %v4040_v31 }
 0x52e   :  { %v4085_v47 = vand.u32 %v10901_v35, %v4039_v58 }
 0x52f   :  { %7959 = vmatpush3.bf16.msra.mxu0 %v4166_v45 }
 0x530   :  { %7935 = vmatpush3.bf16.msra.mxu1 %v4085_v47  ;;  %7996 = vmatprep.subr.bf16.mxu0 %v8793_v42  ;;  %v8633_v47 = vld [vmem:[%s11812_s7 + $0x44] sm:$0xff]  }
 0x531   :  { %7972 = vmatprep.subr.bf16.mxu1 %v8793_v42 }
 0x532   :  { %v10917_v3 = vpop.f32.mrb[32].mxu1  ;;  %v10919_v20 = vpop.f32.mrb[40].mxu0  ;;  %7961 = vmatmul.mubr.msk.bf16.vlgmr.msra.gmra.mrb[64].mxu0 %vm4071_vm4, %v8625_v49  ;;  %v8632_v49 = vld [vmem:[%s11812_s7 + $0x30] sm:$0xff]  }
 0x533   :  { %v10922_v15 = vpop.f32.mrb[33].mxu1  ;;  %v10924_v22 = vpop.f32.mrb[41].mxu0  ;;  %7937 = vmatmul.mubr.msk.bf16.vlgmr.msra.gmra.mrb[68].mxu1 %vm4071_vm4, %v8624_v7  ;;  %7997 = vmatpush3.bf16.msra.mxu0 %v3996_v24 }
 0x534   :  { %v10930_v28 = vpop.f32.mrb[34].mxu1  ;;  %v10932_v56 = vpop.f32.mrb[42].mxu0  ;;  %7973 = vmatpush3.bf16.msra.mxu1 %v3995_v6  ;;  %7998 = vmatprep.subr.bf16.mxu0 %v8793_v42  ;;  %v8627_v6 = vld [vmem:[%s11812_s7 + $0x8] sm:$0xff]  }
 0x535   :  { %v3997_v1 = vpack.c.bf16 %v10930_v28, %v10917_v3  ;;  %v3999_v62 = vpack.c.bf16 %v10932_v56, %v10919_v20  ;;  %v10942_v26 = vpop.f32.mrb[35].mxu1  ;;  %v10944_v16 = vpop.f32.mrb[43].mxu0  ;;  %7974 = vmatprep.subr.bf16.mxu1 %v8793_v42  ;;  %7940 = vmatprep.mubr.msk.bf16.mxu1 %vm8794_vm2, %v8793_v42  ;;  %v8638_v20 = vld [vmem:[%s11812_s7 + $0x58] sm:$0xff]  }
 0x536   :  { %v3998_v8 = vpack.c.bf16 %v10942_v26, %v10922_v15  ;;  %v4000_v12 = vpack.c.bf16 %v10944_v16, %v10924_v22  ;;  %7964 = vmatprep.mubr.msk.bf16.mxu0 %vm8794_vm2, %v8793_v42  ;;  %v8639_v22 = vld [vmem:[%s11812_s7 + $0x6c] sm:$0xff]  }
 0x537   :  { %7999 = vmatpush3.bf16.msra.mxu0 %v4005_v34 }
 0x538   :  { %7975 = vmatpush3.bf16.msra.mxu1 %v4004_v19  ;;  %8000 = vmatprep.subr.bf16.mxu0 %v8793_v42 }
 0x539   :  { %7976 = vmatprep.subr.bf16.mxu1 %v8793_v42 }
 0x53a   :  { %v10969_v24 = vpop.f32.mrb[36].mxu1  ;;  %v10971_v18 = vpop.f32.mrb[44].mxu0  ;;  %7965 = vmatmul.mubr.msk.bf16.gmra.mrb[68].mxu0 %vm4071_vm4, %v8627_v6 }
 0x53b   :  { %v10974_v4 = vpop.f32.mrb[37].mxu1  ;;  %v10976_v63 = vpop.f32.mrb[45].mxu0  ;;  %7941 = vmatmul.mubr.msk.bf16.gmra.mrb[72].mxu1 %vm4071_vm4, %v8626_v17  ;;  %8001 = vmatpush3.bf16.msra.mxu0 %v4014_v38  ;;  %v4041_v38 = vpack.c.bf16 %v10905_v27, %v10905_v27 }
 0x53c   :  { %v10982_v23 = vpop.f32.mrb[38].mxu1  ;;  %v10984_v11 = vpop.f32.mrb[46].mxu0  ;;  %7977 = vmatpush3.bf16.msra.mxu1 %v4013_v30  ;;  %8002 = vmatprep.subr.bf16.mxu0 %v8793_v42  ;;  %v8629_v30 = vld [vmem:[%s11812_s7 + $0x10] ss:$0 sps:$4 sm:$0x33]  }
 0x53d   :  { %v4006_v19 = vpack.c.bf16 %v10982_v23, %v10969_v24  ;;  %v4008_v34 = vpack.c.bf16 %v10984_v11, %v10971_v18  ;;  %v10994_v51 = vpop.f32.mrb[39].mxu1  ;;  %v10996_v5 = vpop.f32.mrb[47].mxu0  ;;  %7978 = vmatprep.subr.bf16.mxu1 %v8793_v42  ;;  %7944 = vmatprep.mubr.msk.bf16.mxu1 %vm8794_vm2, %v8793_v42  ;;  %v8640_v11 = vld [vmem:[%s11812_s7 + $0x60] ss:$0 sps:$4 sm:$0x33]  }
 0x53e   :  { %v4007_v61 = vpack.c.bf16 %v10994_v51, %v10974_v4  ;;  %v4009_v33 = vpack.c.bf16 %v10996_v5, %v10976_v63  ;;  %7968 = vmatprep.mubr.msk.bf16.mxu0 %vm8794_vm2, %v8793_v42  ;;  %v8634_v51 = vld [vmem:[%s11812_s7 + $0x38] ss:$0 sps:$4 sm:$0x33]  }
 0x53f   :  { %8003 = vmatpush3.bf16.msra.mxu0 %v4023_v59 }
 0x540   :  { %7979 = vmatpush3.bf16.msra.mxu1 %v4022_v25  ;;  %8004 = vmatprep.subr.bf16.mxu0 %v8793_v42  ;;  %v4345_v25 = vand.u32 %v10901_v35, %v4041_v38 }
 0x541   :  { %7980 = vmatprep.subr.bf16.mxu1 %v8793_v42 }
 0x542   :  { %v11025_v14 = vpop.f32.mrb[40].mxu1  ;;  %v11027_v52 = vpop.f32.mrb[48].mxu0  ;;  %7969 = vmatmul.mubr.msk.bf16.gmra.mrb[72].mxu0 %vm4071_vm4, %v8629_v30 }
 0x543   :  { %v3787_v59 = vpop.f32.mrb[41].mxu1  ;;  %v11030_v54 = vpop.f32.mrb[49].mxu0  ;;  %7945 = vmatmul.mubr.msk.bf16.gmra.mrb[76].mxu1 %vm4071_vm4, %v8628_v2  ;;  %8005 = vmatpush3.bf16.msra.mxu0 %v4032_v32 }
 0x544   :  { %v3789_v21 = vpop.f32.mrb[42].mxu1  ;;  %v11036_v60 = vpop.f32.mrb[50].mxu0  ;;  %7981 = vmatpush3.bf16.msra.mxu1 %v4031_v29  ;;  %8006 = vmatprep.subr.bf16.mxu0 %v8793_v42  ;;  %v8631_v29 = vld [vmem:[%s11812_s7 + $0x3c] sm:$0xff]  }
 0x545   :  { %v4015_v10 = vpack.c.bf16 %v3789_v21, %v11025_v14  ;;  %v4017_v0 = vpack.c.bf16 %v11036_v60, %v11027_v52  ;;  %v3791_v43 = vpop.f32.mrb[43].mxu1  ;;  %v11046_v40 = vpop.f32.mrb[51].mxu0  ;;  %7982 = vmatprep.subr.bf16.mxu1 %v8793_v42  ;;  %7984 = vmatprep.mubr.msk.bf16.mxu1 %vm8794_vm2, %v8793_v42 }
 0x546   :  { %v4016_v46 = vpack.c.bf16 %v3791_v43, %v3787_v59  ;;  %v4018_v55 = vpack.c.bf16 %v11046_v40, %v11030_v54  ;;  %8008 = vmatprep.mubr.msk.bf16.mxu0 %vm8794_vm2, %v8793_v42 }
 0x547   :  { %8007 = vmatpush3.bf16.msra.mxu0 %v4345_v25 }
 0x548   :  { %7983 = vmatpush3.bf16.msra.mxu1 %v4253_v41  ;;  %8044 = vmatprep.subr.bf16.mxu0 %v8793_v42 }
 0x549   :  { %8020 = vmatprep.subr.bf16.mxu1 %v8793_v42 }
 0x54a   :  { %v3795_v32 = vpop.f32.mrb[44].mxu1  ;;  %v11064_v53 = vpop.f32.mrb[52].mxu0  ;;  %8009 = vmatmul.mubr.msk.bf16.vlgmr.msra.gmra.mrb[76].mxu0 %vm4071_vm4, %v8631_v29  ;;  %v8637_v29 = vld [vmem:[%s11812_s7 + $0x64] sm:$0xff]  }
 0x54b   :  { %v3797_v36 = vpop.f32.mrb[45].mxu1  ;;  %v11067_v9 = vpop.f32.mrb[53].mxu0  ;;  %7985 = vmatmul.mubr.msk.bf16.vlgmr.msra.gmra.mrb[80].mxu1 %vm4071_vm4, %v8630_v37  ;;  %8045 = vmatpush3.bf16.msra.mxu0 %v3998_v8 }
 0x54c   :  { %v3799_v39 = vpop.f32.mrb[46].mxu1  ;;  %v11073_v27 = vpop.f32.mrb[54].mxu0  ;;  %8021 = vmatpush3.bf16.msra.mxu1 %v3997_v1  ;;  %8046 = vmatprep.subr.bf16.mxu0 %v8793_v42 }
 0x54d   :  { %v4024_v58 = vpack.c.bf16 %v3799_v39, %v3795_v32  ;;  %v4026_v57 = vpack.c.bf16 %v11073_v27, %v11064_v53  ;;  %v3801_v50 = vpop.f32.mrb[47].mxu1  ;;  %v11081_v45 = vpop.f32.mrb[55].mxu0  ;;  %8022 = vmatprep.subr.bf16.mxu1 %v8793_v42  ;;  %7988 = vmatprep.mubr.msk.bf16.mxu1 %vm8794_vm2, %v8793_v42  ;;  %v8643_v27 = vld [vmem:[%s11812_s7 + $0x8c] sm:$0xff]  }
 0x54e   :  { %v4025_v13 = vpack.c.bf16 %v3801_v50, %v3797_v36  ;;  %v4027_v44 = vpack.c.bf16 %v11081_v45, %v11067_v9  ;;  %8012 = vmatprep.mubr.msk.bf16.mxu0 %vm8794_vm2, %v8793_v42  ;;  %v8642_v9 = vld [vmem:[%s11812_s7 + $0x78] sm:$0xff]  }
 0x54f   :  { %8047 = vmatpush3.bf16.msra.mxu0 %v4007_v61  ;;  %v8645_v45 = vld [vmem:[%s11812_s7 + $0x94] sm:$0xff]  }
 0x550   :  { %8023 = vmatpush3.bf16.msra.mxu1 %v4006_v19  ;;  %8048 = vmatprep.subr.bf16.mxu0 %v8793_v42  ;;  %v8635_v19 = vld [vmem:[%s11812_s7 + $0x4c] ss:$0 sps:$4 sm:$0x33]  }
 0x551   :  { %8024 = vmatprep.subr.bf16.mxu1 %v8793_v42 }
 0x552   :  { %v3805_v7 = vpop.f32.mrb[48].mxu1  ;;  %v11101_v3 = vpop.f32.mrb[56].mxu0  ;;  %8013 = vmatmul.mubr.msk.bf16.gmra.mrb[80].mxu0 %vm4071_vm4, %v8633_v47 }
 0x553   :  { %v3807_v15 = vpop.f32.mrb[49].mxu1  ;;  %v11104_v28 = vpop.f32.mrb[57].mxu0  ;;  %7989 = vmatmul.mubr.msk.bf16.gmra.mrb[84].mxu1 %vm4071_vm4, %v8632_v49  ;;  %8049 = vmatpush3.bf16.msra.mxu0 %v4016_v46  ;;  %v8636_v46 = vld [vmem:[%s11812_s7 + $0x50] sm:$0xff]  }
 0x554   :  { %v3809_v1 = vpop.f32.mrb[50].mxu1  ;;  %v11107_v26 = vpop.f32.mrb[58].mxu0  ;;  %8025 = vmatpush3.bf16.msra.mxu1 %v4015_v10  ;;  %8050 = vmatprep.subr.bf16.mxu0 %v8793_v42 }
 0x555   :  { %v4033_v8 = vpack.c.bf16 %v3809_v1, %v3805_v7  ;;  %v4035_v6 = vpack.c.bf16 %v11107_v26, %v11101_v3  ;;  %v3811_v17 = vpop.f32.mrb[51].mxu1  ;;  %v11112_v24 = vpop.f32.mrb[59].mxu0  ;;  %8026 = vmatprep.subr.bf16.mxu1 %v8793_v42  ;;  %7992 = vmatprep.mubr.msk.bf16.mxu1 %vm8794_vm2, %v8793_v42  ;;  %v8648_v7 = vld [vmem:[%s11812_s7 + $0xa0] sm:$0xff]   ;;  %v8649_v3 = vld [vmem:[%s11812_s7 + $0xa8] sm:$0xff]   ;;  %v8654_v26 = vld [vmem:[#allocation7 + $0x8] ss:$36 sps:$4 sm:$0xff]  }
 0x556   :  { %v4034_v4 = vpack.c.bf16 %v3811_v17, %v3807_v15  ;;  %v4036_v23 = vpack.c.bf16 %v11112_v24, %v11104_v28  ;;  %8016 = vmatprep.mubr.msk.bf16.mxu0 %vm8794_vm2, %v8793_v42  ;;  %v8653_v15 = vld [vmem:[#allocation7 + $0x4] ss:$36 sps:$4 sm:$0xff]   ;;  %v8656_v28 = vld [vmem:[#allocation7 + $0xc] ss:$36 sps:$4 sm:$0xff]  }
 0x557   :  { %8051 = vmatpush3.bf16.msra.mxu0 %v4025_v13  ;;  %v8646_v13 = vld [vmem:[%s11812_s7 + $0x88] ss:$0 sps:$4 sm:$0x33]   ;;  %v8657_v17 = vld [vmem:[#allocation7 + $0x48] ss:$36 sps:$4 sm:$0xff]  }
 0x558   :  { %8027 = vmatpush3.bf16.msra.mxu1 %v4024_v58  ;;  %8052 = vmatprep.subr.bf16.mxu0 %v8793_v42  ;;  %v8651_v1 = vld [vmem:[#allocation7] ss:$36 sps:$4 sm:$0xff]   ;;  %v8660_v24 = vld [vmem:[#allocation7 + $0x50] ss:$36 sps:$4 sm:$0xff]  }
 0x559   :  { %8028 = vmatprep.subr.bf16.mxu1 %v8793_v42 }
 0x55a   :  { %v3815_v61 = vpop.f32.mrb[52].mxu1  ;;  %v11129_v30 = vpop.f32.mrb[60].mxu0  ;;  %8017 = vmatmul.mubr.msk.bf16.gmra.mrb[84].mxu0 %vm4071_vm4, %v8635_v19  ;;  %v8663_v19 = vld [vmem:[#allocation7 + $0x90] ss:$36 sps:$4 sm:$0xff]  }
 0x55b   :  { %v4042_v2 = vpack.c.bf16 %v3815_v61, %v3815_v61  ;;  %v3817_v38 = vpop.f32.mrb[53].mxu1  ;;  %v11132_v31 = vpop.f32.mrb[61].mxu0  ;;  %7993 = vmatmul.mubr.msk.bf16.gmra.mrb[88].mxu1 %vm4071_vm4, %v8634_v51  ;;  %8053 = vmatpush3.bf16.msra.mxu0 %v4034_v4  ;;  %v4044_v5 = vpack.c.bf16 %v11129_v30, %v11129_v30  ;;  %v8665_v4 = vld [vmem:[#allocation7 + $0x94] ss:$36 sps:$4 sm:$0xff]   ;;  %v8671_v61 = vld [vmem:[#allocation7 + $0xdc] ss:$36 sps:$4 sm:$0xff]  }
 0x55c   :  { %v4043_v14 = vpack.c.bf16 %v3817_v38, %v3817_v38  ;;  %v3819_v59 = vpop.f32.mrb[54].mxu1  ;;  %v3910_v21 = vpop.f32.mrb[62].mxu0  ;;  %8029 = vmatpush3.bf16.msra.mxu1 %v4033_v8  ;;  %8054 = vmatprep.subr.bf16.mxu0 %v8793_v42  ;;  %v8659_v8 = vld [vmem:[#allocation7 + $0x4c] ss:$36 sps:$4 sm:$0xff]   ;;  %v8666_v51 = vld [vmem:[#allocation7 + $0x98] ss:$36 sps:$4 sm:$0xff]  }
 0x55d   :  { %v4437_v25 = vand.u32 %v10901_v35, %v4042_v2  ;;  %v3820_v10 = vpop.f32.mrb[55].mxu1  ;;  %v3911_v43 = vpop.f32.mrb[63].mxu0  ;;  %8030 = vmatprep.subr.bf16.mxu1 %v8793_v42  ;;  %8032 = vmatprep.mubr.msk.bf16.mxu1 %vm8794_vm2, %v8793_v42  ;;  %v4621_v40 = vand.u32 %v10901_v35, %v4044_v5  ;;  %v8674_v30 = vld [vmem:[#allocation7 + $0xe4] ss:$36 sps:$4 sm:$0xff]   ;;  %v8669_v2 = vld [vmem:[#allocation7 + $0xd8] ss:$36 sps:$4 sm:$0xff]  }
 0x55e   :  { %v4529_v41 = vand.u32 %v10901_v35, %v4043_v14  ;;  %8056 = vmatprep.mubr.msk.bf16.mxu0 %vm8794_vm2, %v8793_v42  ;;  %v8672_v38 = vld [vmem:[#allocation7 + $0xe0] ss:$36 sps:$4 sm:$0xff]  }
 0x55f   :  { %v8680_v14 = vld [vmem:[#allocation7 + $0x1c] ss:$36 sps:$4 sm:$0xff]  }
 0x560   :  { %8031 = vmatpush3.bf16.msra.mxu1 %v4437_v25  ;;  %8055 = vmatpush3.bf16.msra.mxu0 %v4529_v41 }
 0x561   :  { %8068 = vmatprep.subr.bf16.mxu1 %v8793_v42  ;;  %8092 = vmatprep.subr.bf16.mxu0 %v8793_v42 }
 0x562   :  { %v11151_v37 = vpop.f32.mrb[56].mxu1 }
 0x563   :  { %v11153_v32 = vpop.f32.mrb[57].mxu1  ;;  %8033 = vmatmul.mubr.msk.bf16.vlgmr.msra.gmra.mrb[92].mxu1 %vm4071_vm4, %v8636_v46  ;;  %8057 = vmatmul.mubr.msk.bf16.vlgmr.msra.gmra.mrb[88].mxu0 %vm4071_vm4, %v8637_v29 }
 0x564   :  { %v11157_v36 = vpop.f32.mrb[58].mxu1  ;;  %8069 = vmatpush3.bf16.msra.mxu1 %v3999_v62  ;;  %8093 = vmatpush3.bf16.msra.mxu0 %v4000_v12 }
 0x565   :  { %v4010_v39 = vpack.c.bf16 %v11157_v36, %v11151_v37  ;;  %v3950_v58 = vpop.f32.mrb[59].mxu1  ;;  %8070 = vmatprep.subr.bf16.mxu1 %v8793_v42  ;;  %8094 = vmatprep.subr.bf16.mxu0 %v8793_v42 }
 0x566   :  { %v4001_v50 = vpack.c.bf16 %v3950_v58, %v11153_v32  ;;  %8036 = vmatprep.mubr.msk.bf16.mxu1 %vm8794_vm2, %v8793_v42  ;;  %8060 = vmatprep.mubr.msk.bf16.mxu0 %vm8794_vm2, %v8793_v42 }
 0x568   :  { %8071 = vmatpush3.bf16.msra.mxu1 %v4008_v34  ;;  %8095 = vmatpush3.bf16.msra.mxu0 %v4009_v33  ;;  %v8641_v34 = vld [vmem:[%s11812_s7 + $0x74] ss:$0 sps:$4 sm:$0x33]   ;;  %v4045_v33 = vpack.c.bf16 %v11132_v31, %v11132_v31  ;;  %v8677_v31 = vld [vmem:[#allocation7 + $0x14] ss:$36 sps:$4 sm:$0xff]  }
 0x569   :  { %8072 = vmatprep.subr.bf16.mxu1 %v8793_v42  ;;  %8096 = vmatprep.subr.bf16.mxu0 %v8793_v42 }
 0x56a   :  { %v7918_v56 = vpop.f32.mrb[60].mxu1 }
 0x56b   :  { %v3963_v62 = vpop.f32.mrb[61].mxu1  ;;  %8037 = vmatmul.mubr.msk.bf16.gmra.mrb[96].mxu1 %vm4071_vm4, %v8638_v20  ;;  %8061 = vmatmul.mubr.msk.bf16.gmra.mrb[92].mxu0 %vm4071_vm4, %v8639_v22 }
 0x56c   :  { %v7919_v16 = vpop.f32.mrb[62].mxu1  ;;  %8073 = vmatpush3.bf16.msra.mxu1 %v4017_v0  ;;  %8097 = vmatpush3.bf16.msra.mxu0 %v4018_v55  ;;  %v4713_v55 = vand.u32 %v10901_v35, %v4045_v33 }
 0x56d   :  { %v4028_v12 = vpack.c.bf16 %v7919_v16, %v7918_v56  ;;  %v3966_v18 = vpop.f32.mrb[63].mxu1  ;;  %8074 = vmatprep.subr.bf16.mxu1 %v8793_v42  ;;  %8098 = vmatprep.subr.bf16.mxu0 %v8793_v42 }
 0x56e   :  { %v4019_v63 = vpack.c.bf16 %v3966_v18, %v3963_v62  ;;  %8040 = vmatprep.mubr.msk.bf16.mxu1 %vm8794_vm2, %v8793_v42  ;;  %8064 = vmatprep.mubr.msk.bf16.mxu0 %vm8794_vm2, %v8793_v42 }
 0x570   :  { %8075 = vmatpush3.bf16.msra.mxu1 %v4026_v57  ;;  %8099 = vmatpush3.bf16.msra.mxu0 %v4027_v44  ;;  %v8644_v57 = vld [vmem:[%s11812_s7 + $0x80] sm:$0xff]   ;;  %v8647_v44 = vld [vmem:[%s11812_s7 + $0x9c] ss:$0 sps:$4 sm:$0x33]  }
 0x571   :  { %8076 = vmatprep.subr.bf16.mxu1 %v8793_v42  ;;  %8100 = vmatprep.subr.bf16.mxu0 %v8793_v42 }
 0x572   :  { %v7922_v52 = vpop.f32.mrb[64].mxu1 }
 0x573   :  { %v3979_v54 = vpop.f32.mrb[65].mxu1  ;;  %8041 = vmatmul.mubr.msk.bf16.gmra.mrb[100].mxu1 %vm4071_vm4, %v8640_v11  ;;  %8065 = vmatmul.mubr.msk.bf16.gmra.mrb[96].mxu0 %vm4071_vm4, %v8641_v34  ;;  %v4046_v47 = vpack.c.bf16 %v7922_v52, %v7922_v52 }
 0x574   :  { %v7923_v60 = vpop.f32.mrb[66].mxu1  ;;  %8077 = vmatpush3.bf16.msra.mxu1 %v4035_v6  ;;  %8101 = vmatpush3.bf16.msra.mxu0 %v4036_v23  ;;  %v8662_v6 = vld [vmem:[#allocation7 + $0x54] ss:$36 sps:$4 sm:$0xff]   ;;  %v8668_v23 = vld [vmem:[#allocation7 + $0x9c] ss:$36 sps:$4 sm:$0xff]  }
 0x575   :  { %v3982_v0 = vpop.f32.mrb[67].mxu1  ;;  %8078 = vmatprep.subr.bf16.mxu1 %v8793_v42  ;;  %8102 = vmatprep.subr.bf16.mxu0 %v8793_v42  ;;  %v4805_v49 = vand.u32 %v10901_v35, %v4046_v47  ;;  %v8650_v35 = vld [vmem:[%s11812_s7 + $0xb0] ss:$0 sps:$4 sm:$0x33]  }
 0x576   :  { %v4037_v53 = vpack.c.bf16 %v3982_v0, %v3979_v54  ;;  %8080 = vmatprep.mubr.msk.bf16.mxu1 %vm8794_vm2, %v8793_v42  ;;  %8104 = vmatprep.mubr.msk.bf16.mxu0 %vm8794_vm2, %v8793_v42 }
 0x578   :  { %8079 = vmatpush3.bf16.msra.mxu1 %v4621_v40  ;;  %8103 = vmatpush3.bf16.msra.mxu0 %v4713_v55 }
 0x579   :  { %8116 = vmatprep.subr.bf16.mxu1 %v8793_v42  ;;  %5121 = vmatprep.subr.bf16.mxu0 %v8653_v15 }
 0x57b   :  { %8081 = vmatmul.mubr.msk.bf16.vlgmr.msra.gmra.mrb[104].mxu1 %vm4071_vm4, %v8642_v9  ;;  %8105 = vmatmul.mubr.msk.bf16.vlgmr.msra.gmra.mrb[100].mxu0 %vm4071_vm4, %v8643_v27 }
 0x57c   :  { %8117 = vmatpush3.bf16.msra.mxu1 %v4001_v50  ;;  %8084 = vmatprep.mubr.msk.bf16.mxu1 %vm8794_vm2, %v8793_v42 }
 0x57d   :  { %8118 = vmatprep.subr.bf16.mxu1 %v8793_v42  ;;  %8108 = vmatprep.mubr.msk.bf16.mxu0 %vm8794_vm2, %v8793_v42 }
 0x57e   :  { %5122 = vmatpush1.bf16.msra.mxu0 %v8651_v1 }
 0x57f   :  { %5123 = vmatprep.subr.bf16.mxu0 %v8659_v8 }
 0x580   :  { %8119 = vmatpush3.bf16.msra.mxu1 %v4010_v39 }
 0x581   :  { %8120 = vmatprep.subr.bf16.mxu1 %v8793_v42 }
 0x582   :  { %5124 = vmatpush1.bf16.msra.mxu0 %v8657_v17 }
 0x583   :  { %8085 = vmatmul.mubr.msk.bf16.gmra.mrb[108].mxu1 %vm4071_vm4, %v8644_v57  ;;  %8109 = vmatmul.mubr.msk.bf16.gmra.mrb[104].mxu0 %vm4071_vm4, %v8645_v45 }
 0x584   :  { %8121 = vmatpush3.bf16.msra.mxu1 %v4019_v63  ;;  %8088 = vmatprep.mubr.msk.bf16.mxu1 %vm8794_vm2, %v8793_v42 }
 0x585   :  { %8122 = vmatprep.subr.bf16.mxu1 %v8793_v42  ;;  %8112 = vmatprep.mubr.msk.bf16.mxu0 %vm8794_vm2, %v8793_v42 }
 0x586   :  { %5125 = vmatprep.subr.bf16.mxu0 %v8665_v4 }
 0x587   :  { %5126 = vmatpush1.bf16.msra.mxu0 %v8663_v19 }
 0x588   :  { %8123 = vmatpush3.bf16.msra.mxu1 %v4028_v12  ;;  %5127 = vmatprep.subr.bf16.mxu0 %v8671_v61 }
 0x589   :  { %8124 = vmatprep.subr.bf16.mxu1 %v8793_v42 }
 0x58b   :  { %8089 = vmatmul.mubr.msk.bf16.gmra.mrb[112].mxu1 %vm4071_vm4, %v8646_v13  ;;  %8113 = vmatmul.mubr.msk.bf16.gmra.mrb[108].mxu0 %vm4071_vm4, %v8647_v44 }
 0x58c   :  { %8125 = vmatpush3.bf16.msra.mxu1 %v4037_v53  ;;  %8128 = vmatprep.mubr.msk.bf16.mxu1 %vm8794_vm2, %v8793_v42 }
 0x58d   :  { %8126 = vmatprep.subr.bf16.mxu1 %v8793_v42  ;;  %5153 = vmatprep.mubr.bf16.mxu0 %v12031_v48 }
 0x58e   :  { %5128 = vmatpush1.bf16.msra.mxu0 %v8669_v2 }
 0x58f   :  { %5243 = vmatprep.subr.bf16.mxu0 %v8677_v31 }
 0x590   :  { %8127 = vmatpush3.bf16.msra.mxu1 %v4805_v49 }
 0x591   :  { %5182 = vmatprep.subr.bf16.mxu1 %v8656_v28 }
 0x593   :  { %8129 = vmatmul.mubr.msk.bf16.vlgmr.msra.gmra.mrb[116].mxu1 %vm4071_vm4, %v8648_v7 }
 0x594   :  { %8132 = vmatprep.mubr.msk.bf16.mxu1 %vm8794_vm2, %v8793_v42  ;;  %5183 = vmatpush1.bf16.msra.mxu1 %v8654_v26 }
 0x595   :  { %5184 = vmatprep.subr.bf16.mxu1 %v8662_v6 }
 0x598   :  { %5185 = vmatpush1.bf16.msra.mxu1 %v8660_v24 }
 0x599   :  { %5186 = vmatprep.subr.bf16.mxu1 %v8668_v23 }
 0x59b   :  { %8133 = vmatmul.mubr.msk.bf16.gmra.mrb[120].mxu1 %vm4071_vm4, %v8649_v3 }
 0x59c   :  { %8136 = vmatprep.mubr.msk.bf16.mxu1 %vm8794_vm2, %v8793_v42  ;;  %5187 = vmatpush1.bf16.msra.mxu1 %v8666_v51 }
 0x59d   :  { %5188 = vmatprep.subr.bf16.mxu1 %v8674_v30 }
 0x5a0   :  { %5189 = vmatpush1.bf16.msra.mxu1 %v8672_v38 }
 0x5a1   :  { %5304 = vmatprep.subr.bf16.mxu1 %v8680_v14 }
 0x5a3   :  { %8137 = vmatmul.mubr.msk.bf16.gmra.mrb[124].mxu1 %vm4071_vm4, %v8650_v35 }
 0x5a4   :  { %5214 = vmatprep.mubr.bf16.mxu1 %v12031_v48 }
 0x605   :  { %v4202_v59 = vpop.f32.mrb[64].mxu0 }
 0x606   :  { %v4121_v21 = vpop.f32.mrb[68].mxu1  ;;  %v7962_v25 = vpop.f32.mrb[65].mxu0 }
 0x607   :  { %v7938_v10 = vpop.f32.mrb[69].mxu1  ;;  %v4203_v43 = vadd.f32 %v4202_v59, %v4121_v21  ;;  %v4205_v41 = vpop.f32.mrb[66].mxu0 }
 0x608   :  { %v4124_v46 = vpop.f32.mrb[70].mxu1  ;;  %v7963_v29 = vpop.f32.mrb[67].mxu0 }
 0x609   :  { %v7939_v37 = vpop.f32.mrb[71].mxu1  ;;  %v4206_v32 = vadd.f32 %v4205_v41, %v4124_v46 }
 0x60d   :  { %v4210_v36 = vpop.f32.mrb[68].mxu0 }
 0x60e   :  { %v4129_v39 = vpop.f32.mrb[72].mxu1  ;;  %v7966_v58 = vpop.f32.mrb[69].mxu0 }
 0x60f   :  { %v7942_v50 = vpop.f32.mrb[73].mxu1  ;;  %v4211_v20 = vadd.f32 %v4210_v36, %v4129_v39  ;;  %v4213_v22 = vpop.f32.mrb[70].mxu0 }
 0x610   :  { %v4132_v56 = vpop.f32.mrb[74].mxu1  ;;  %v7967_v62 = vpop.f32.mrb[71].mxu0 }
 0x611   :  { %v7943_v16 = vpop.f32.mrb[75].mxu1  ;;  %v4214_v12 = vadd.f32 %v4213_v22, %v4132_v56 }
 0x615   :  { %v4218_v18 = vpop.f32.mrb[72].mxu0 }
 0x616   :  { %v4137_v63 = vpop.f32.mrb[76].mxu1  ;;  %v7970_v11 = vpop.f32.mrb[73].mxu0 }
 0x617   :  { %v7946_v34 = vpop.f32.mrb[77].mxu1  ;;  %v4219_v5 = vadd.f32 %v4218_v18, %v4137_v63  ;;  %v4221_v33 = vpop.f32.mrb[74].mxu0 }
 0x618   :  { %v4140_v52 = vpop.f32.mrb[78].mxu1  ;;  %v7971_v54 = vpop.f32.mrb[75].mxu0 }
 0x619   :  { %v7947_v60 = vpop.f32.mrb[79].mxu1 }
 0x61d   :  { %v4381_v0 = vpop.f32.mrb[76].mxu0 }
 0x61e   :  { %v4289_v40 = vpop.f32.mrb[80].mxu1  ;;  %v8010_v55 = vpop.f32.mrb[77].mxu0 }
 0x61f   :  { %v4311_v53 = vadd.f32 %v4289_v40, %v4203_v43  ;;  %v7986_v9 = vpop.f32.mrb[81].mxu1  ;;  %v4384_v27 = vpop.f32.mrb[78].mxu0 }
 0x620   :  { %v4292_v57 = vpop.f32.mrb[82].mxu1  ;;  %v8011_v45 = vpop.f32.mrb[79].mxu0 }
 0x621   :  { %v4312_v13 = vadd.f32 %v4292_v57, %v4206_v32  ;;  %v4403_v44 = vadd.f32 %v4381_v0, %v4311_v53  ;;  %v7987_v47 = vpop.f32.mrb[83].mxu1 }
 0x623   :  { %v4404_v49 = vadd.f32 %v4384_v27, %v4312_v13 }
 0x625   :  { %v4389_v7 = vpop.f32.mrb[80].mxu0 }
 0x626   :  { %v4297_v3 = vpop.f32.mrb[84].mxu1  ;;  %v8014_v35 = vpop.f32.mrb[81].mxu0 }
 0x627   :  { %v4313_v15 = vadd.f32 %v4297_v3, %v4211_v20  ;;  %v7990_v28 = vpop.f32.mrb[85].mxu1  ;;  %v4392_v1 = vpop.f32.mrb[82].mxu0 }
 0x628   :  { %v4300_v26 = vpop.f32.mrb[86].mxu1  ;;  %v8015_v8 = vpop.f32.mrb[83].mxu0 }
 0x629   :  { %v4314_v6 = vadd.f32 %v4300_v26, %v4214_v12  ;;  %v4405_v17 = vadd.f32 %v4389_v7, %v4313_v15  ;;  %v7991_v24 = vpop.f32.mrb[87].mxu1 }
 0x62b   :  { %v4406_v4 = vadd.f32 %v4392_v1, %v4314_v6 }
 0x62d   :  { %v4397_v23 = vpop.f32.mrb[84].mxu0 }
 0x62e   :  { %v4305_v19 = vpop.f32.mrb[88].mxu1  ;;  %v8018_v51 = vpop.f32.mrb[85].mxu0 }
 0x62f   :  { %v4315_v61 = vadd.f32 %v4305_v19, %v4219_v5  ;;  %v7994_v30 = vpop.f32.mrb[89].mxu1  ;;  %v4400_v2 = vpop.f32.mrb[86].mxu0 }
 0x630   :  { %v4308_v38 = vpop.f32.mrb[90].mxu1  ;;  %v8019_v31 = vpop.f32.mrb[87].mxu0 }
 0x631   :  { %v4407_v14 = vadd.f32 %v4397_v23, %v4315_v61  ;;  %v7995_v59 = vpop.f32.mrb[91].mxu1 }
 0x636   :  { %v4473_v21 = vpop.f32.mrb[92].mxu1  ;;  %v4565_v25 = vpop.f32.mrb[88].mxu0 }
 0x637   :  { %v4495_v10 = vadd.f32 %v4473_v21, %v4403_v44  ;;  %v8034_v43 = vpop.f32.mrb[93].mxu1  ;;  %v8058_v41 = vpop.f32.mrb[89].mxu0 }
 0x638   :  { %v4476_v46 = vpop.f32.mrb[94].mxu1  ;;  %v4568_v29 = vpop.f32.mrb[90].mxu0 }
 0x639   :  { %v4496_v37 = vadd.f32 %v4476_v46, %v4404_v49  ;;  %v4587_v32 = vadd.f32 %v4565_v25, %v4495_v10  ;;  %v8035_v36 = vpop.f32.mrb[95].mxu1  ;;  %v8059_v39 = vpop.f32.mrb[91].mxu0 }
 0x63b   :  { %v4588_v58 = vadd.f32 %v4568_v29, %v4496_v37  ;;  %v6988_v37 = vld [vmem:[%s11813_s8] ss:$0 sm:$0xff] }
 0x63e   :  { %v4481_v50 = vpop.f32.mrb[96].mxu1  ;;  %v4573_v20 = vpop.f32.mrb[92].mxu0 }
 0x63f   :  { %v4497_v22 = vadd.f32 %v4481_v50, %v4405_v17  ;;  %v8038_v56 = vpop.f32.mrb[97].mxu1  ;;  %v8062_v62 = vpop.f32.mrb[93].mxu0 }
 0x640   :  { %v4484_v16 = vpop.f32.mrb[98].mxu1  ;;  %v4576_v12 = vpop.f32.mrb[94].mxu0 }
 0x641   :  { %v4498_v18 = vadd.f32 %v4484_v16, %v4406_v4  ;;  %v4589_v63 = vadd.f32 %v4573_v20, %v4497_v22  ;;  %v8039_v11 = vpop.f32.mrb[99].mxu1  ;;  %v8063_v34 = vpop.f32.mrb[95].mxu0 }
 0x642   :  { %v8675_v11 = vld [vmem:[#allocation7 + $0x10] ss:$36 sps:$4 sm:$0xff]   ;;  %v8678_v34 = vld [vmem:[#allocation7 + $0x18] ss:$36 sps:$4 sm:$0xff]  }
 0x643   :  { %v4590_v5 = vadd.f32 %v4576_v12, %v4498_v18 }
 0x646   :  { %v4489_v33 = vpop.f32.mrb[100].mxu1  ;;  %v4581_v52 = vpop.f32.mrb[96].mxu0 }
 0x647   :  { %v4499_v54 = vadd.f32 %v4489_v33, %v4407_v14  ;;  %v8042_v60 = vpop.f32.mrb[101].mxu1  ;;  %v8066_v0 = vpop.f32.mrb[97].mxu0  ;;  %v8683_v33 = vld [vmem:[#allocation7 + $0x5c] ss:$36 sps:$4 sm:$0xff]  }
 0x648   :  { %v4492_v40 = vpop.f32.mrb[102].mxu1  ;;  %v4584_v55 = vpop.f32.mrb[98].mxu0 }
 0x649   :  { %v4591_v53 = vadd.f32 %v4581_v52, %v4499_v54  ;;  %v8043_v9 = vpop.f32.mrb[103].mxu1  ;;  %v8067_v27 = vpop.f32.mrb[99].mxu0  ;;  %v8686_v52 = vld [vmem:[#allocation7 + $0x64] ss:$36 sps:$4 sm:$0xff]   ;;  %v8681_v55 = vld [vmem:[#allocation7 + $0x58] ss:$36 sps:$4 sm:$0xff]  }
 0x64a   :  { %v8689_v9 = vld [vmem:[#allocation7 + $0xa4] ss:$36 sps:$4 sm:$0xff]   ;;  %v8692_v27 = vld [vmem:[#allocation7 + $0xac] ss:$36 sps:$4 sm:$0xff]  }
 0x64e   :  { %v4657_v57 = vpop.f32.mrb[104].mxu1  ;;  %v4749_v45 = vpop.f32.mrb[100].mxu0 }
 0x64f   :  { %v4679_v13 = vadd.f32 %v4657_v57, %v4587_v32  ;;  %v8082_v44 = vpop.f32.mrb[105].mxu1  ;;  %v8106_v47 = vpop.f32.mrb[101].mxu0 }
 0x650   :  { %v4660_v49 = vpop.f32.mrb[106].mxu1  ;;  %v4752_v7 = vpop.f32.mrb[102].mxu0 }
 0x651   :  { %v4680_v3 = vadd.f32 %v4660_v49, %v4588_v58  ;;  %v4771_v35 = vadd.f32 %v4749_v45, %v4679_v13  ;;  %v8083_v15 = vpop.f32.mrb[107].mxu1  ;;  %v8107_v28 = vpop.f32.mrb[103].mxu0  ;;  %v8687_v49 = vld [vmem:[#allocation7 + $0xa0] ss:$36 sps:$4 sm:$0xff]  }
 0x652   :  { %v8698_v15 = vld [vmem:[#allocation7 + $0xf4] ss:$36 sps:$4 sm:$0xff]  }
 0x653   :  { %v4772_v1 = vadd.f32 %v4752_v7, %v4680_v3  ;;  %v8690_v7 = vld [vmem:[#allocation7 + $0xa8] ss:$36 sps:$4 sm:$0xff]  }
 0x656   :  { %v4665_v26 = vpop.f32.mrb[108].mxu1  ;;  %v4757_v8 = vpop.f32.mrb[104].mxu0 }
 0x657   :  { %v4681_v6 = vadd.f32 %v4665_v26, %v4589_v63  ;;  %v8086_v17 = vpop.f32.mrb[109].mxu1  ;;  %v8110_v24 = vpop.f32.mrb[105].mxu0 }
 0x658   :  { %v4668_v4 = vpop.f32.mrb[110].mxu1  ;;  %v4760_v23 = vpop.f32.mrb[106].mxu0  ;;  %v8696_v17 = vld [vmem:[#allocation7 + $0xf0] ss:$36 sps:$4 sm:$0xff]  }
 0x659   :  { %v4682_v19 = vadd.f32 %v4668_v4, %v4590_v5  ;;  %v4773_v51 = vadd.f32 %v4757_v8, %v4681_v6  ;;  %v8087_v61 = vpop.f32.mrb[111].mxu1  ;;  %v8111_v30 = vpop.f32.mrb[107].mxu0  ;;  %v8693_v6 = vld [vmem:[#allocation7 + $0xe8] ss:$36 sps:$4 sm:$0xff]   ;;  %v8699_v4 = vld [vmem:[#allocation7 + $0x20] ss:$36 sps:$4 sm:$0xff]  }
 0x65b   :  { %v4774_v2 = vadd.f32 %v4760_v23, %v4682_v19  ;;  %v8700_v23 = vld [vmem:[#allocation7 + $0x68] ss:$36 sps:$4 sm:$0xff]   ;;  %v8701_v19 = vld [vmem:[#allocation7 + $0xb0] ss:$36 sps:$4 sm:$0xff]  }
 0x65e   :  { %v4673_v38 = vpop.f32.mrb[112].mxu1  ;;  %v4765_v31 = vpop.f32.mrb[108].mxu0 }
 0x65f   :  { %v4683_v14 = vadd.f32 %v4673_v38, %v4591_v53  ;;  %v8090_v59 = vpop.f32.mrb[113].mxu1  ;;  %v8114_v21 = vpop.f32.mrb[109].mxu0  ;;  %v8684_v53 = vld [vmem:[#allocation7 + $0x60] ss:$36 sps:$4 sm:$0xff]  }
 0x660   :  { %v4676_v25 = vpop.f32.mrb[114].mxu1  ;;  %v4768_v10 = vpop.f32.mrb[110].mxu0 }
 0x661   :  { %v4775_v43 = vadd.f32 %v4765_v31, %v4683_v14  ;;  %v8091_v41 = vpop.f32.mrb[115].mxu1  ;;  %v8115_v46 = vpop.f32.mrb[111].mxu0 }
 0x666   :  { %v4841_v29 = vpop.f32.mrb[116].mxu1 }
 0x667   :  { %v4863_v32 = vadd.f32 %v4841_v29, %v4771_v35  ;;  %v8130_v36 = vpop.f32.mrb[117].mxu1  ;;  %v8695_v35 = vld [vmem:[#allocation7 + $0xec] ss:$36 sps:$4 sm:$0xff]  }
 0x668   :  { %v4844_v39 = vpop.f32.mrb[118].mxu1 }
 0x669   :  { %v4875_v58 = vadd.f32 %v6988_v37, %v4863_v32  ;;  %v4864_v50 = vadd.f32 %v4844_v39, %v4772_v1  ;;  %v8131_v20 = vpop.f32.mrb[119].mxu1 }
 0x66b   :  { %v4876_v22 = vadd.f32 %v6988_v37, %v4864_v50  ;;  %v4880_v56 = vmax.f32 %v4875_v58, 0.0 }
 0x66d   :  { %v4881_v62 = vmax.f32 %v4876_v22, 0.0 }
 0x66e   :  { %v4849_v16 = vpop.f32.mrb[120].mxu1 }
 0x66f   :  { %v11298_v12 = vpack.c.bf16 %v4881_v62, %v4880_v56  ;;  %v4865_v18 = vadd.f32 %v4849_v16, %v4773_v51  ;;  %v8134_v63 = vpop.f32.mrb[121].mxu1  ;;  %v8702_v51 = vld [vmem:[#allocation7 + $0xf8] ss:$36 sps:$4 sm:$0xff]  }
 0x670   :  { %v4852_v5 = vpop.f32.mrb[122].mxu1 }
 0x671   :  { %v4877_v54 = vadd.f32 %v6988_v37, %v4865_v18  ;;  %v4866_v60 = vadd.f32 %v4852_v5, %v4774_v2  ;;  %7025 = vmatmul.mubr.msk.bf16.vlgmr.msra.gmra.mrb[112].mxu0 %vm729_vm1, %v11298_v12  ;;  %7028 = vmatmul.mubr.msk.bf16.vlgmr.msra.gmra.mrb[128].mxu1 %vm729_vm1, %v11298_v12  ;;  %v8135_v0 = vpop.f32.mrb[123].mxu1 }
 0x672   :  { %5163 = vmatprep.mubr.bf16.mxu0 %v12031_v48  ;;  %5224 = vmatprep.mubr.bf16.mxu1 %v12031_v48 }
 0x673   :  { %v4878_v40 = vadd.f32 %v6988_v37, %v4866_v60  ;;  %5244 = vmatpush1.bf16.msra.mxu0 %v8675_v11  ;;  %5305 = vmatpush1.bf16.msra.mxu1 %v8678_v34  ;;  %v4882_v57 = vmax.f32 %v4877_v54, 0.0  ;;  %v8703_v60 = vld [vmem:[%s11815_s10] sm:$0xff]  }
 0x674   :  { %5245 = vmatprep.subr.bf16.mxu0 %v8683_v33  ;;  %5306 = vmatprep.subr.bf16.mxu1 %v8686_v52 }
 0x675   :  { %v4883_v45 = vmax.f32 %v4878_v40, 0.0  ;;  %v8704_v40 = vld [vmem:[%s11815_s10 + $0x8] sm:$0xff]  }
 0x676   :  { %v4857_v13 = vpop.f32.mrb[124].mxu1 }
 0x677   :  { %v4886_v44 = vpack.c.bf16 %v4883_v45, %v4882_v57  ;;  %v4867_v47 = vadd.f32 %v4857_v13, %v4775_v43  ;;  %5246 = vmatpush1.bf16.msra.mxu0 %v8681_v55  ;;  %5307 = vmatpush1.bf16.msra.mxu1 %v8684_v53  ;;  %v8138_v3 = vpop.f32.mrb[125].mxu1 }
 0x678   :  { %5247 = vmatprep.subr.bf16.mxu0 %v8689_v9  ;;  %5308 = vmatprep.subr.bf16.mxu1 %v8692_v27  ;;  %v4860_v28 = vpop.f32.mrb[126].mxu1 }
 0x679   :  { %v4879_v1 = vadd.f32 %v6988_v37, %v4867_v47  ;;  %7026 = vmatmul.mubr.msk.bf16.gmra.mrb[116].mxu0 %vm729_vm1, %v4886_v44  ;;  %7029 = vmatmul.mubr.msk.bf16.gmra.mrb[132].mxu1 %vm729_vm1, %v4886_v44  ;;  %v8139_v26 = vpop.f32.mrb[127].mxu1 }
 0x67a   :  { %5173 = vmatprep.mubr.bf16.mxu0 %v12031_v48  ;;  %5234 = vmatprep.mubr.bf16.mxu1 %v12031_v48 }
 0x67b   :  { %v4884_v8 = vmax.f32 %v4879_v1, 0.0  ;;  %5248 = vmatpush1.bf16.msra.mxu0 %v8687_v49  ;;  %5309 = vmatpush1.bf16.msra.mxu1 %v8690_v7  ;;  %v8705_v1 = vld [vmem:[%s11815_s10 + $0x18] sm:$0xff]  }
 0x67c   :  { %5249 = vmatprep.subr.bf16.mxu0 %v8695_v35  ;;  %5310 = vmatprep.subr.bf16.mxu1 %v8698_v15 }
 0x67d   :  { %v4887_v24 = vpack.c.bf16 %v4884_v8, %v4884_v8 }
 0x67f   :  { %5250 = vmatpush1.bf16.msra.mxu0 %v8693_v6  ;;  %5311 = vmatpush1.bf16.msra.mxu1 %v8696_v17  ;;  %v8706_v17 = vld [vmem:[%s11815_s10 + $0x10] sm:$0xff]  }
 0x680   :  { %8140 = vmatprep.subr.bf16.mxu0 %v8793_v42  ;;  %8160 = vmatprep.subr.bf16.mxu1 %v8793_v42 }
 0x681   :  { %7027 = vmatmul.mubr.msk.bf16.gmra.mrb[120].mxu0 %vm729_vm1, %v4887_v24  ;;  %7030 = vmatmul.mubr.msk.bf16.gmra.mrb[136].mxu1 %vm729_vm1, %v4887_v24 }
 0x682   :  { %5275 = vmatprep.mubr.bf16.mxu0 %v12031_v48  ;;  %5336 = vmatprep.mubr.bf16.mxu1 %v12031_v48 }
 0x689   :  { %7031 = vmatmul.mubr.msk.bf16.vlgmr.msra.gmra.mrb[124].mxu0 %vm729_vm1, %v11298_v12  ;;  %7034 = vmatmul.mubr.msk.bf16.vlgmr.msra.gmra.mrb[140].mxu1 %vm729_vm1, %v11298_v12 }
 0x68a   :  { %5285 = vmatprep.mubr.bf16.mxu0 %v12031_v48  ;;  %5346 = vmatprep.mubr.bf16.mxu1 %v12031_v48 }
 0x68b   :  { %8141 = vmatpush3.bf16.msra.mxu0 %v8699_v4 }
 0x68c   :  { %8142 = vmatprep.subr.bf16.mxu0 %v8793_v42 }
 0x68f   :  { %8143 = vmatpush3.bf16.msra.mxu0 %v8700_v23 }
 0x690   :  { %8144 = vmatprep.subr.bf16.mxu0 %v8793_v42 }
 0x691   :  { %7032 = vmatmul.mubr.msk.bf16.gmra.mrb[128].mxu0 %vm729_vm1, %v4886_v44  ;;  %7035 = vmatmul.mubr.msk.bf16.gmra.mrb[144].mxu1 %vm729_vm1, %v4886_v44 }
 0x692   :  { %5295 = vmatprep.mubr.bf16.mxu0 %v12031_v48  ;;  %5356 = vmatprep.mubr.bf16.mxu1 %v12031_v48 }
 0x693   :  { %8145 = vmatpush3.bf16.msra.mxu0 %v8701_v19 }
 0x694   :  { %8146 = vmatprep.subr.bf16.mxu0 %v8793_v42 }
 0x697   :  { %8147 = vmatpush3.bf16.msra.mxu0 %v8702_v51 }
 0x698   :  { %8170 = vmatprep.subr.bf16.mxu0 %v8793_v42 }
 0x699   :  { %7033 = vmatmul.mubr.msk.bf16.gmra.mrb[132].mxu0 %vm729_vm1, %v4887_v24  ;;  %7036 = vmatmul.mubr.msk.bf16.gmra.mrb[148].mxu1 %vm729_vm1, %v4887_v24 }
 0x69a   :  { %8148 = vmatprep.mubr.msk.bf16.mxu0 %vm8794_vm2, %v8793_v42  ;;  %8166 = vmatprep.mubr.msk.bf16.mxu1 %vm8794_vm2, %v8793_v42 }
 0x6a1   :  { %8149 = vmatmul.mubr.msk.bf16.vlgmr.msra.gmra.mrb[136].mxu0 %vm729_vm1, %v11298_v12 }
 0x6a2   :  { %8152 = vmatprep.mubr.msk.bf16.mxu0 %vm8794_vm2, %v8793_v42 }
 0x6a9   :  { %8153 = vmatmul.mubr.msk.bf16.gmra.mrb[140].mxu0 %vm729_vm1, %v4886_v44 }
 0x6aa   :  { %8156 = vmatprep.mubr.msk.bf16.mxu0 %vm8794_vm2, %v8793_v42 }
 0x6b1   :  { %8157 = vmatmul.mubr.msk.bf16.gmra.mrb[144].mxu0 %vm729_vm1, %v4887_v24 }
 0x6b2   :  { %8176 = vmatprep.mubr.msk.bf16.mxu0 %vm8794_vm2, %v8793_v42 }
 0x744   :  { %v5155_v48 = vpop.f32.mrb[112].mxu0  ;;  %v5216_v61 = vpop.f32.mrb[128].mxu1 }
 0x745   :  { %v5157_v30 = vpop.f32.mrb[113].mxu0  ;;  %v5218_v2 = vpop.f32.mrb[129].mxu1 }
 0x746   :  { %v5159_v38 = vpop.f32.mrb[114].mxu0  ;;  %v5220_v31 = vpop.f32.mrb[130].mxu1 }
 0x747   :  { %v5421_v14 = vpack.c.bf16 %v5159_v38, %v5155_v48  ;;  %v5423_v59 = vpack.c.bf16 %v5220_v31, %v5216_v61  ;;  %v5161_v21 = vpop.f32.mrb[115].mxu0  ;;  %v5222_v25 = vpop.f32.mrb[131].mxu1 }
 0x748   :  { %v5422_v10 = vpack.c.bf16 %v5161_v21, %v5157_v30  ;;  %v5424_v43 = vpack.c.bf16 %v5222_v25, %v5218_v2 }
 0x749   :  { %8171 = vmatpush3.bf16.msra.mxu0 %v5421_v14 }
 0x74a   :  { %8161 = vmatpush3.bf16.msra.mxu1 %v5422_v10  ;;  %8172 = vmatprep.subr.bf16.mxu0 %v8793_v42 }
 0x74b   :  { %8162 = vmatprep.subr.bf16.mxu1 %v8793_v42 }
 0x74c   :  { %v5165_v41 = vpop.f32.mrb[116].mxu0  ;;  %v5226_v46 = vpop.f32.mrb[132].mxu1 }
 0x74d   :  { %v5167_v29 = vpop.f32.mrb[117].mxu0  ;;  %v5228_v37 = vpop.f32.mrb[133].mxu1 }
 0x74e   :  { %v5169_v32 = vpop.f32.mrb[118].mxu0  ;;  %v5230_v36 = vpop.f32.mrb[134].mxu1 }
 0x74f   :  { %v5430_v39 = vpack.c.bf16 %v5169_v32, %v5165_v41  ;;  %v5432_v58 = vpack.c.bf16 %v5230_v36, %v5226_v46  ;;  %v5171_v50 = vpop.f32.mrb[119].mxu0  ;;  %v5232_v20 = vpop.f32.mrb[135].mxu1  ;;  %v8707_v36 = vld [vmem:[%s11815_s10 + $0x20] sm:$0xff]  }
 0x750   :  { %v5431_v22 = vpack.c.bf16 %v5171_v50, %v5167_v29  ;;  %v5433_v56 = vpack.c.bf16 %v5232_v20, %v5228_v37 }
 0x751   :  { %8173 = vmatpush3.bf16.msra.mxu0 %v5430_v39  ;;  %v8708_v39 = vld [vmem:[%s11815_s10 + $0x28] sm:$0xff]  }
 0x752   :  { %8163 = vmatpush3.bf16.msra.mxu1 %v5431_v22  ;;  %8174 = vmatprep.subr.bf16.mxu0 %v8793_v42 }
 0x753   :  { %8164 = vmatprep.subr.bf16.mxu1 %v8793_v42 }
 0x754   :  { %v5175_v62 = vpop.f32.mrb[120].mxu0  ;;  %v5236_v16 = vpop.f32.mrb[136].mxu1 }
 0x755   :  { %v5439_v12 = vpack.c.bf16 %v5175_v62, %v5175_v62  ;;  %v5177_v18 = vpop.f32.mrb[121].mxu0  ;;  %v5238_v63 = vpop.f32.mrb[137].mxu1  ;;  %v5441_v3 = vpack.c.bf16 %v5236_v16, %v5236_v16 }
 0x756   :  { %v5440_v11 = vpack.c.bf16 %v5177_v18, %v5177_v18  ;;  %v5179_v34 = vpop.f32.mrb[122].mxu0  ;;  %v5240_v5 = vpop.f32.mrb[138].mxu1  ;;  %v5442_v13 = vpack.c.bf16 %v5238_v63, %v5238_v63 }
 0x757   :  { %v5516_v33 = vsel %vm5462_vm5, %v5439_v12, 0  ;;  %v5180_v52 = vpop.f32.mrb[123].mxu0  ;;  %v5241_v54 = vpop.f32.mrb[139].mxu1  ;;  %v5571_v26 = vsel %vm5462_vm5, %v5441_v3, 0  ;;  %v8710_v34 = vld [vmem:[%s11815_s10 + $0x38] sm:$0xff]  }
 0x758   :  { %v5464_v0 = vsel %vm5462_vm5, %v5440_v11, 0  ;;  %8175 = vmatpush3.bf16.msra.mxu0 %v5516_v33  ;;  %v5628_v28 = vsel %vm5462_vm5, %v5442_v13, 0  ;;  %v8709_v11 = vld [vmem:[%s11815_s10 + $0x30] sm:$0xff]  }
 0x759   :  { %8165 = vmatpush3.bf16.msra.mxu1 %v5464_v0  ;;  %8190 = vmatprep.subr.bf16.mxu0 %v8793_v42 }
 0x75a   :  { %8180 = vmatprep.subr.bf16.mxu1 %v8793_v42 }
 0x75b   :  { %8177 = vmatmul.mubr.msk.bf16.vlgmr.msra.gmra.mrb[148].mxu0 %vm5458_vm6, %v8703_v60 }
 0x75c   :  { %v5277_v55 = vpop.f32.mrb[124].mxu0  ;;  %v11361_v53 = vpop.f32.mrb[140].mxu1  ;;  %8191 = vmatpush3.bf16.msra.mxu0 %v5424_v43  ;;  %8167 = vmatmul.mubr.msk.bf16.vlgmr.msra.gmra.mrb[152].mxu1 %vm5458_vm6, %v8704_v40 }
 0x75d   :  { %v5279_v9 = vpop.f32.mrb[125].mxu0  ;;  %v11364_v27 = vpop.f32.mrb[141].mxu1  ;;  %8181 = vmatpush3.bf16.msra.mxu1 %v5423_v59  ;;  %8192 = vmatprep.subr.bf16.mxu0 %v8793_v42 }
 0x75e   :  { %v5281_v57 = vpop.f32.mrb[126].mxu0  ;;  %v11367_v45 = vpop.f32.mrb[142].mxu1  ;;  %8182 = vmatprep.subr.bf16.mxu1 %v8793_v42  ;;  %8196 = vmatprep.mubr.msk.bf16.mxu0 %vm8794_vm2, %v8793_v42 }
 0x75f   :  { %v5425_v44 = vpack.c.bf16 %v5281_v57, %v5277_v55  ;;  %v5427_v47 = vpack.c.bf16 %v11367_v45, %v11361_v53  ;;  %v5283_v49 = vpop.f32.mrb[127].mxu0  ;;  %v11374_v7 = vpop.f32.mrb[143].mxu1  ;;  %8186 = vmatprep.mubr.msk.bf16.mxu1 %vm8794_vm2, %v8793_v42 }
 0x760   :  { %v5426_v35 = vpack.c.bf16 %v5283_v49, %v5279_v9  ;;  %v5428_v15 = vpack.c.bf16 %v11374_v7, %v11364_v27  ;;  %8193 = vmatpush3.bf16.msra.mxu0 %v5433_v56  ;;  %v8711_v27 = vld [vmem:[%s11815_s10 + $0x40] sm:$0xff]  }
 0x761   :  { %8183 = vmatpush3.bf16.msra.mxu1 %v5432_v58  ;;  %8194 = vmatprep.subr.bf16.mxu0 %v8793_v42 }
 0x762   :  { %8184 = vmatprep.subr.bf16.mxu1 %v8793_v42 }
 0x764   :  { %v5287_v8 = vpop.f32.mrb[128].mxu0  ;;  %v5348_v6 = vpop.f32.mrb[144].mxu1  ;;  %8195 = vmatpush3.bf16.msra.mxu0 %v5628_v28 }
 0x765   :  { %v5289_v24 = vpop.f32.mrb[129].mxu0  ;;  %v5350_v4 = vpop.f32.mrb[145].mxu1  ;;  %8185 = vmatpush3.bf16.msra.mxu1 %v5571_v26  ;;  %8210 = vmatprep.subr.bf16.mxu0 %v8793_v42 }
 0x766   :  { %v5291_v23 = vpop.f32.mrb[130].mxu0  ;;  %v5352_v19 = vpop.f32.mrb[146].mxu1  ;;  %8200 = vmatprep.subr.bf16.mxu1 %v8793_v42 }
 0x767   :  { %v5434_v51 = vpack.c.bf16 %v5291_v23, %v5287_v8  ;;  %v5436_v48 = vpack.c.bf16 %v5352_v19, %v5348_v6  ;;  %v5293_v61 = vpop.f32.mrb[131].mxu0  ;;  %v5354_v30 = vpop.f32.mrb[147].mxu1  ;;  %8197 = vmatmul.mubr.msk.bf16.vlgmr.msra.gmra.mrb[152].mxu0 %vm5458_vm6, %v8705_v1 }
 0x768   :  { %v5435_v2 = vpack.c.bf16 %v5293_v61, %v5289_v24  ;;  %v5437_v38 = vpack.c.bf16 %v5354_v30, %v5350_v4  ;;  %8211 = vmatpush3.bf16.msra.mxu0 %v5426_v35  ;;  %8187 = vmatmul.mubr.msk.bf16.vlgmr.msra.gmra.mrb[156].mxu1 %vm5458_vm6, %v8706_v17 }
 0x769   :  { %8201 = vmatpush3.bf16.msra.mxu1 %v5425_v44  ;;  %8212 = vmatprep.subr.bf16.mxu0 %v8793_v42 }
 0x76a   :  { %8202 = vmatprep.subr.bf16.mxu1 %v8793_v42  ;;  %8206 = vmatprep.mubr.msk.bf16.mxu1 %vm8794_vm2, %v8793_v42 }
 0x76b   :  { %8216 = vmatprep.mubr.msk.bf16.mxu0 %vm8794_vm2, %v8793_v42 }
 0x76c   :  { %v5297_v31 = vpop.f32.mrb[132].mxu0  ;;  %v5358_v14 = vpop.f32.mrb[148].mxu1  ;;  %8213 = vmatpush3.bf16.msra.mxu0 %v5435_v2 }
 0x76d   :  { %v5443_v59 = vpack.c.bf16 %v5297_v31, %v5297_v31  ;;  %v5299_v21 = vpop.f32.mrb[133].mxu0  ;;  %v5360_v25 = vpop.f32.mrb[149].mxu1  ;;  %8203 = vmatpush3.bf16.msra.mxu1 %v5434_v51  ;;  %8214 = vmatprep.subr.bf16.mxu0 %v8793_v42  ;;  %v5445_v62 = vpack.c.bf16 %v5358_v14, %v5358_v14 }
 0x76e   :  { %v5444_v10 = vpack.c.bf16 %v5299_v21, %v5299_v21  ;;  %v5301_v43 = vpop.f32.mrb[134].mxu0  ;;  %v5362_v41 = vpop.f32.mrb[150].mxu1  ;;  %8204 = vmatprep.subr.bf16.mxu1 %v8793_v42  ;;  %v5446_v16 = vpack.c.bf16 %v5360_v25, %v5360_v25 }
 0x76f   :  { %v5685_v46 = vsel %vm5462_vm5, %v5443_v59, 0  ;;  %v5302_v29 = vpop.f32.mrb[135].mxu0  ;;  %v5363_v37 = vpop.f32.mrb[151].mxu1  ;;  %v5799_v12 = vsel %vm5462_vm5, %v5445_v62, 0 }
 0x770   :  { %v5742_v32 = vsel %vm5462_vm5, %v5444_v10, 0  ;;  %v5856_v18 = vsel %vm5462_vm5, %v5446_v16, 0  ;;  %v8795_v16 = vmov 1983009808  }
 0x771   :  { %8205 = vmatpush3.bf16.msra.mxu1 %v5685_v46  ;;  %8215 = vmatpush3.bf16.msra.mxu0 %v5742_v32 }
 0x772   :  { %8220 = vmatprep.subr.bf16.mxu1 %v8793_v42  ;;  %8230 = vmatprep.subr.bf16.mxu0 %v8793_v42 }
 0x774   :  { %v5399_v58 = vpop.f32.mrb[136].mxu0  ;;  %8207 = vmatmul.mubr.msk.bf16.vlgmr.msra.gmra.mrb[160].mxu1 %vm5458_vm6, %v8707_v36  ;;  %8217 = vmatmul.mubr.msk.bf16.vlgmr.msra.gmra.mrb[156].mxu0 %vm5458_vm6, %v8708_v39 }
 0x775   :  { %v8150_v50 = vpop.f32.mrb[137].mxu0  ;;  %8221 = vmatpush3.bf16.msra.mxu1 %v5427_v47  ;;  %8231 = vmatpush3.bf16.msra.mxu0 %v5428_v15 }
 0x776   :  { %v5402_v20 = vpop.f32.mrb[138].mxu0  ;;  %8222 = vmatprep.subr.bf16.mxu1 %v8793_v42  ;;  %8232 = vmatprep.subr.bf16.mxu0 %v8793_v42 }
 0x777   :  { %v5429_v22 = vpack.c.bf16 %v5402_v20, %v5399_v58  ;;  %v8151_v56 = vpop.f32.mrb[139].mxu0  ;;  %8226 = vmatprep.mubr.msk.bf16.mxu1 %vm8794_vm2, %v8793_v42  ;;  %8236 = vmatprep.mubr.msk.bf16.mxu0 %vm8794_vm2, %v8793_v42 }
 0x779   :  { %8223 = vmatpush3.bf16.msra.mxu1 %v5436_v48  ;;  %8233 = vmatpush3.bf16.msra.mxu0 %v5437_v38 }
 0x77a   :  { %8224 = vmatprep.subr.bf16.mxu1 %v8793_v42  ;;  %8234 = vmatprep.subr.bf16.mxu0 %v8793_v42 }
 0x77c   :  { %v5407_v63 = vpop.f32.mrb[140].mxu0 }
 0x77d   :  { %v8154_v5 = vpop.f32.mrb[141].mxu0  ;;  %8225 = vmatpush3.bf16.msra.mxu1 %v5799_v12  ;;  %8235 = vmatpush3.bf16.msra.mxu0 %v5856_v18  ;;  %v5973_v12 = vunpack.c.l.s4 %v8795_v16  ;;  %v5975_v18 = vlaneseq  ;;  %v6189_v16 = vld [vmem:[%s11817_s12 + $0x1a8] sm:$0xff] }
 0x77e   :  { %v5410_v33 = vpop.f32.mrb[142].mxu0  ;;  %8240 = vmatprep.subr.bf16.mxu1 %v8793_v42  ;;  %v7074_v5 = vld [vmem:[%s11816_s11] ss:$0 sm:$0xff]  ;;  %s8797_s11 = smov 64  }
 0x77f   :  { %v5438_v52 = vpack.c.bf16 %v5410_v33, %v5407_v63  ;;  %v8155_v54 = vpop.f32.mrb[143].mxu0  ;;  %v5974_v63 = vunpack.c.0.s8 %v5973_v12 }
 0x780   :  { %8227 = vmatmul.mubr.msk.bf16.vlgmr.msra.gmra.mrb[164].mxu1 %vm5458_vm6, %v8709_v11  ;;  %8237 = vmatmul.mubr.msk.bf16.vlgmr.msra.gmra.mrb[160].mxu0 %vm5458_vm6, %v8710_v34  ;;  %v5976_v11 = vshrl.u32 %v5975_v18, 7  ;;  %v6172_v18 = vld [vmem:[%s11817_s12 + $0x120] sm:$0xff] }
 0x781   :  { %8241 = vmatpush3.bf16.msra.mxu1 %v5429_v22  ;;  %8246 = vmatprep.mubr.msk.bf16.mxu1 %vm8794_vm2, %v8793_v42 }
 0x782   :  { %8242 = vmatprep.subr.bf16.mxu1 %v8793_v42 }
 0x784   :  { %v5415_v60 = vpop.f32.mrb[144].mxu0 }
 0x785   :  { %v5447_v0 = vpack.c.bf16 %v5415_v60, %v5415_v60  ;;  %v8158_v40 = vpop.f32.mrb[145].mxu0  ;;  %8243 = vmatpush3.bf16.msra.mxu1 %v5438_v52 }
 0x786   :  { %v5418_v55 = vpop.f32.mrb[146].mxu0  ;;  %8244 = vmatprep.subr.bf16.mxu1 %v8793_v42  ;;  %v11448_v40 = vsub.s32 %v5974_v63, %v5976_v11  ;;  %v6173_v63 = vld [vmem:[%s11817_s12 + $0x128] sm:$0xff] }
 0x787   :  { %v5913_v53 = vsel %vm5462_vm5, %v5447_v0, 0  ;;  %v8159_v9 = vpop.f32.mrb[147].mxu0 }
 0x789   :  { %8245 = vmatpush3.bf16.msra.mxu1 %v5913_v53 }
 0x78c   :  { %8247 = vmatmul.mubr.msk.bf16.vlgmr.msra.gmra.mrb[168].mxu1 %vm5458_vm6, %v8711_v27 }
 0x82e   :  { %v5552_v57 = vpop.f32.mrb[148].mxu0 }
 0x82f   :  { %v5500_v45 = vpop.f32.mrb[152].mxu1  ;;  %v8178_v13 = vpop.f32.mrb[149].mxu0 }
 0x830   :  { %v8168_v44 = vpop.f32.mrb[153].mxu1  ;;  %v5553_v47 = vadd.f32 %v5552_v57, %v5500_v45  ;;  %v5555_v49 = vpop.f32.mrb[150].mxu0 }
 0x831   :  { %v5503_v7 = vpop.f32.mrb[154].mxu1  ;;  %v8179_v3 = vpop.f32.mrb[151].mxu0 }
 0x832   :  { %v8169_v35 = vpop.f32.mrb[155].mxu1  ;;  %v5556_v15 = vadd.f32 %v5555_v49, %v5503_v7 }
 0x83a   :  { %v5664_v28 = vpop.f32.mrb[152].mxu0 }
 0x83b   :  { %v5607_v1 = vpop.f32.mrb[156].mxu1  ;;  %v8198_v26 = vpop.f32.mrb[153].mxu0 }
 0x83c   :  { %v5614_v8 = vadd.f32 %v5607_v1, %v5553_v47  ;;  %v8188_v6 = vpop.f32.mrb[157].mxu1  ;;  %v5667_v17 = vpop.f32.mrb[154].mxu0  ;;  %v6153_v1 = vld [vmem:[%s11817_s12 + $0x88] sm:$0xff] }
 0x83d   :  { %v5610_v24 = vpop.f32.mrb[158].mxu1  ;;  %v8199_v4 = vpop.f32.mrb[155].mxu0  ;;  %v6137_v6 = vld [vmem:[%s11817_s12 + $0x8] sm:$0xff] }
 0x83e   :  { %v5615_v23 = vadd.f32 %v5610_v24, %v5556_v15  ;;  %v5671_v19 = vadd.f32 %v5664_v28, %v5614_v8  ;;  %v8189_v51 = vpop.f32.mrb[159].mxu1  ;;  %v6152_v28 = vld [vmem:[%s11817_s12 + $0x80] sm:$0xff] }
 0x83f   :  { %v8273_v26 = vpack.c.bf16 %v6153_v1, %v6152_v28  ;;  %v6136_v8 = vld [vmem:[%s11817_s12] sm:$0xff] }
 0x840   :  { %v5672_v48 = vadd.f32 %v5667_v17, %v5615_v23  ;;  %v8275_v24 = vpack.c.bf16 %v6137_v6, %v6136_v8  ;;  %v6184_v4 = vld [vmem:[%s11817_s12 + $0x180] sm:$0xff]  ;;  %v6185_v23 = vld [vmem:[%s11817_s12 + $0x188] sm:$0xff] }
 0x841   :  { %8274 = vmatprep.subr.bf16.mxu0 %v8273_v26  ;;  %v6168_v51 = vld [vmem:[%s11817_s12 + $0x100] sm:$0xff]  ;;  %v6193_v6 = vld [vmem:[%s11817_s12 + $0x1c8] sm:$0xff] }
 0x842   :  { %8276 = vmatpush3.bf16.msra.mxu0 %v8275_v24  ;;  %v6144_v28 = vld [vmem:[%s11817_s12 + $0x40] sm:$0xff] }
 0x843   :  { %v6192_v8 = vld [vmem:[%s11817_s12 + $0x1c0] sm:$0xff] }
 0x844   :  { %v8321_v24 = vpack.c.bf16 %v6193_v6, %v6192_v8 }
 0x847   :  { %v5721_v61 = vpop.f32.mrb[160].mxu1  ;;  %v5778_v30 = vpop.f32.mrb[156].mxu0 }
 0x848   :  { %v5728_v2 = vadd.f32 %v5721_v61, %v5671_v19  ;;  %v8208_v38 = vpop.f32.mrb[161].mxu1  ;;  %v8218_v31 = vpop.f32.mrb[157].mxu0  ;;  %v8305_v19 = vpack.c.bf16 %v6185_v23, %v6184_v4  ;;  %v6176_v4 = vld [vmem:[%s11817_s12 + $0x140] sm:$0xff]  ;;  %v6177_v23 = vld [vmem:[%s11817_s12 + $0x148] sm:$0xff] }
 0x849   :  { %v5724_v14 = vpop.f32.mrb[162].mxu1  ;;  %v5781_v59 = vpop.f32.mrb[158].mxu0  ;;  %v6155_v38 = vld [vmem:[%s11817_s12 + $0x98] sm:$0xff] }
 0x84a   :  { %v5729_v21 = vadd.f32 %v5724_v14, %v5672_v48  ;;  %v5785_v25 = vadd.f32 %v5778_v30, %v5728_v2  ;;  %v8209_v10 = vpop.f32.mrb[163].mxu1  ;;  %v8219_v43 = vpop.f32.mrb[159].mxu0  ;;  %v6169_v48 = vld [vmem:[%s11817_s12 + $0x108] sm:$0xff]  ;;  %v6154_v2 = vld [vmem:[%s11817_s12 + $0x90] sm:$0xff]  ;;  %8306 = vmatprep.subr.bf16.mxu1 %v8305_v19 }
 0x84b   :  { %v8307_v30 = vpack.c.bf16 %v6169_v48, %v6168_v51  ;;  %v8277_v31 = vpack.c.bf16 %v6155_v38, %v6154_v2  ;;  %v6138_v14 = vld [vmem:[%s11817_s12 + $0x10] sm:$0xff]  ;;  %v6187_v43 = vld [vmem:[%s11817_s12 + $0x198] sm:$0xff]  ;;  %v8323_v51 = vpack.c.bf16 %v6177_v23, %v6176_v4 }
 0x84c   :  { %v5786_v41 = vadd.f32 %v5781_v59, %v5729_v21  ;;  %v6139_v59 = vld [vmem:[%s11817_s12 + $0x18] sm:$0xff]  ;;  %v6186_v10 = vld [vmem:[%s11817_s12 + $0x190] sm:$0xff] }
 0x84d   :  { %8308 = vmatpush3.bf16.msra.mxu1 %v8307_v30  ;;  %8278 = vmatprep.subr.bf16.mxu0 %v8277_v31  ;;  %v6162_v48 = vld [vmem:[%s11817_s12 + $0xd0] sm:$0xff]  ;;  %v6163_v30 = vld [vmem:[%s11817_s12 + $0xd8] sm:$0xff] }
 0x84e   :  { %v8293_v2 = vpack.c.bf16 %v6163_v30, %v6162_v48  ;;  %v6146_v38 = vld [vmem:[%s11817_s12 + $0x50] sm:$0xff]  ;;  %v6147_v31 = vld [vmem:[%s11817_s12 + $0x58] sm:$0xff] }
 0x853   :  { %v5835_v46 = vpop.f32.mrb[164].mxu1  ;;  %v5892_v29 = vpop.f32.mrb[160].mxu0 }
 0x854   :  { %v5842_v37 = vadd.f32 %v5835_v46, %v5785_v25  ;;  %v8228_v32 = vpop.f32.mrb[165].mxu1  ;;  %v8238_v36 = vpop.f32.mrb[161].mxu0  ;;  %v8279_v25 = vpack.c.bf16 %v6139_v59, %v6138_v14  ;;  %v6170_v46 = vld [vmem:[%s11817_s12 + $0x110] sm:$0xff] }
 0x855   :  { %v5838_v39 = vpop.f32.mrb[166].mxu1  ;;  %v5895_v58 = vpop.f32.mrb[162].mxu0  ;;  %v6156_v36 = vld [vmem:[%s11817_s12 + $0xa0] sm:$0xff]  ;;  %v6194_v14 = vld [vmem:[%s11817_s12 + $0x1d0] sm:$0xff] }
 0x856   :  { %v5843_v50 = vadd.f32 %v5838_v39, %v5786_v41  ;;  %v5899_v20 = vadd.f32 %v5892_v29, %v5842_v37  ;;  %v8229_v22 = vpop.f32.mrb[167].mxu1  ;;  %v8239_v56 = vpop.f32.mrb[163].mxu0  ;;  %v8309_v41 = vpack.c.bf16 %v6187_v43, %v6186_v10  ;;  %v6171_v29 = vld [vmem:[%s11817_s12 + $0x118] sm:$0xff]  ;;  %8280 = vmatpush3.bf16.msra.mxu0 %v8279_v25  ;;  %v6157_v39 = vld [vmem:[%s11817_s12 + $0xa8] sm:$0xff]  ;;  %v8295_v25 = vpack.c.bf16 %v6147_v31, %v6146_v38  ;;  %v6178_v43 = vld [vmem:[%s11817_s12 + $0x150] sm:$0xff] }
 0x857   :  { %v8311_v32 = vpack.c.bf16 %v6171_v29, %v6170_v46  ;;  %v6195_v10 = vld [vmem:[%s11817_s12 + $0x1d8] sm:$0xff]  ;;  %v6370_v31 = vld [vmem:[%s11819_s14] sm:$0xff] }
 0x858   :  { %v5900_v62 = vadd.f32 %v5895_v58, %v5843_v50  ;;  %8310 = vmatprep.subr.bf16.mxu1 %v8309_v41  ;;  %v8281_v58 = vpack.c.bf16 %v6157_v39, %v6156_v36  ;;  %v6140_v50 = vld [vmem:[%s11817_s12 + $0x20] sm:$0xff]  ;;  %v6179_v41 = vld [vmem:[%s11817_s12 + $0x158] sm:$0xff]  ;;  %v8325_v46 = vpack.c.bf16 %v6195_v10, %v6194_v14  ;;  %v6371_v14 = vld [vmem:[%s11819_s14 + $0x8] sm:$0xff] }
 0x859   :  { %8312 = vmatpush3.bf16.msra.mxu1 %v8311_v32  ;;  %v8327_v29 = vpack.c.bf16 %v6179_v41, %v6178_v43  ;;  %v6165_v32 = vld [vmem:[%s11817_s12 + $0xe8] sm:$0xff]  ;;  %v6148_v36 = vld [vmem:[%s11817_s12 + $0x60] sm:$0xff]  ;;  %v8338_v41 = vpack.c.bf16 %v6371_v14, %v6370_v31 }
 0x85a   :  { %8282 = vmatprep.subr.bf16.mxu0 %v8281_v58 }
 0x85f   :  { %v5949_v34 = vpop.f32.mrb[168].mxu1 }
 0x860   :  { %v5956_v33 = vadd.f32 %v5949_v34, %v5899_v20  ;;  %v8248_v52 = vpop.f32.mrb[169].mxu1  ;;  %v6141_v20 = vld [vmem:[%s11817_s12 + $0x28] sm:$0xff]  ;;  %v8315_v34 = vpack.c.bf16 %v6173_v63, %v6172_v18 }
 0x861   :  { %v5952_v54 = vpop.f32.mrb[170].mxu1  ;;  %v8283_v56 = vpack.c.bf16 %v6141_v20, %v6140_v50  ;;  %v6149_v50 = vld [vmem:[%s11817_s12 + $0x68] sm:$0xff]  ;;  %v6196_v20 = vld [vmem:[%s11817_s12 + $0x1e0] sm:$0xff] }
 0x862   :  { %v5965_v60 = vadd.f32 %v7074_v5, %v5956_v33  ;;  %v5957_v0 = vadd.f32 %v5952_v54, %v5900_v62  ;;  %v8249_v55 = vpop.f32.mrb[171].mxu1  ;;  %v6188_v62 = vld [vmem:[%s11817_s12 + $0x1a0] sm:$0xff]  ;;  %v6159_v33 = vld [vmem:[%s11817_s12 + $0xb8] sm:$0xff]  ;;  %v6142_v54 = vld [vmem:[%s11817_s12 + $0x30] sm:$0xff] }
 0x863   :  { %v8313_v12 = vpack.c.bf16 %v6189_v16, %v6188_v62  ;;  %8284 = vmatpush3.bf16.msra.mxu0 %v8283_v56  ;;  %v8299_v56 = vpack.c.bf16 %v6149_v50, %v6148_v36  ;;  %v6181_v16 = vld [vmem:[%s11817_s12 + $0x168] sm:$0xff]  ;;  %v6377_v50 = vld [vmem:[%s11819_s14 + $0x38] sm:$0xff] }
 0x864   :  { %v5967_v53 = vmax.f32 %v5965_v60, 0.0  ;;  %v5966_v9 = vadd.f32 %v7074_v5, %v5957_v0  ;;  %v6158_v5 = vld [vmem:[%s11817_s12 + $0xb0] sm:$0xff]  ;;  %v6143_v60 = vld [vmem:[%s11817_s12 + $0x38] sm:$0xff]  ;;  %v6375_v36 = vld [vmem:[%s11819_s14 + $0x28] sm:$0xff] }
 0x865   :  { %8314 = vmatprep.subr.bf16.mxu1 %v8313_v12  ;;  %v8285_v52 = vpack.c.bf16 %v6159_v33, %v6158_v5  ;;  %v6166_v12 = vld [vmem:[%s11817_s12 + $0xf0] sm:$0xff]  ;;  %v6151_v5 = vld [vmem:[%s11817_s12 + $0x78] sm:$0xff] }
 0x866   :  { %v5999_v27 = vcombine.high %v5967_v53, %v5967_v53  ;;  %v5968_v57 = vmax.f32 %v5966_v9, 0.0  ;;  %v5978_v45 = vrot.slane %v5967_v53, %v11448_v40  ;;  %5970 = vst.msk [vmem:[#allocation2] sm:$0x1] %vm5969_vm7, %v5967_v53  ;;  %8316 = vmatpush3.bf16.msra.mxu1 %v8315_v34  ;;  %v8287_v53 = vpack.c.bf16 %v6143_v60, %v6142_v54  ;;  %v6190_v9 = vld [vmem:[%s11817_s12 + $0x1b0] sm:$0xff]  ;;  %v6199_v54 = vld [vmem:[%s11817_s12 + $0x1f8] sm:$0xff] }
 0x867   :  { %8286 = vmatprep.subr.bf16.mxu0 %v8285_v52  ;;  %v6150_v34 = vld [vmem:[%s11817_s12 + $0x70] sm:$0xff] }
 0x868   :  { %v6052_v13 = vcombine.high %v5968_v57, %v5968_v57  ;;  %6079 = vrot.lane.b32.xlu0 %v5978_v45, %s8796_s24  ;;  %v11454_v44 = vrot.slane %v5968_v57, %v11448_v40  ;;  %v6006_v47 = vrot.slane %v5999_v27, %v11448_v40  ;;  %6026 = vst.msk [vmem:[#allocation2 + $0x4] sm:$0x1] %vm5969_vm7, %v5968_v57  ;;  %v5979_v35 = vrot.slane %v5978_v45, 7  ;;  %v6191_v27 = vld [vmem:[%s11817_s12 + $0x1b8] sm:$0xff]  ;;  %v6198_v52 = vld [vmem:[%s11817_s12 + $0x1f0] sm:$0xff] }
 0x869   :  { %v11469_v7 = vcombine.high %v5978_v45, %v5978_v45  ;;  %v8317_v57 = vpack.c.bf16 %v6191_v27, %v6190_v9  ;;  %v6174_v45 = vld [vmem:[%s11817_s12 + $0x130] sm:$0xff]  ;;  %8288 = vmatpush3.bf16.msra.mxu0 %v8287_v53  ;;  %v8333_v53 = vpack.c.bf16 %v6199_v54, %v6198_v52  ;;  %v6183_v27 = vld [vmem:[%s11817_s12 + $0x178] sm:$0xff]  ;;  %v7076_v52 = vld [vmem:[%s11820_s15] ss:$0 sm:$0xff] }
 0x86a   :  { %6107 = vrot.lane.b32.xlu1 %v11454_v44, %s8796_s24  ;;  %v11461_v49 = vrot.slane %v6052_v13, %v11448_v40  ;;  %6008 = vst.msk [vmem:[#allocation2 + $0x2] sm:$0x1] %vm5969_vm7, %v6006_v47  ;;  %v11473_v3 = vcombine.high %v6006_v47, %v6006_v47  ;;  %v6009_v15 = vrot.slane %v6006_v47, 7  ;;  %v11493_v17 = vrot.slane %v5979_v35, 2  ;;  %v6175_v13 = vld [vmem:[%s11817_s12 + $0x138] sm:$0xff]  ;;  %v6161_v35 = vld [vmem:[%s11817_s12 + $0xc8] sm:$0xff] }
 0x86b   :  { %v11527_v21 = vcombine.high %v11454_v44, %v11454_v44  ;;  %v6035_v22 = vrot.slane %v11454_v44, 7  ;;  %v5992_v55 = vrot.slane %v11469_v7, 7  ;;  %8318 = vmatprep.subr.bf16.mxu1 %v8317_v57  ;;  %v6182_v9 = vld [vmem:[%s11817_s12 + $0x170] sm:$0xff] }
 0x86c   :  { %6093 = vrot.lane.b32.xlu0 %v6006_v47, %s8796_s24  ;;  %6061 = vst.msk [vmem:[#allocation2 + $0x6] sm:$0x1] %vm5969_vm7, %v11461_v49  ;;  %v11509_v61 = vrot.slane %v6009_v15, 2  ;;  %v11545_v37 = vcombine.high %v11461_v49, %v11461_v49  ;;  %v6062_v11 = vrot.slane %v11461_v49, 7  ;;  %v6020_v47 = vrot.slane %v11473_v3, 7 }
 0x86d   :  { %v11591_v0 = vrot.slane %v6035_v22, 2  ;;  %v5993_v1 = vrot.slane %v5992_v55, 2  ;;  %v6046_v59 = vrot.slane %v11527_v21, 7  ;;  %v6197_v22 = vld [vmem:[%s11817_s12 + $0x1e8] sm:$0xff]  ;;  %v8303_v55 = vpack.c.bf16 %v6151_v5, %v6150_v34 }
 0x86e   :  { %6121 = vrot.lane.b32.xlu1 %v11461_v49, %s8796_s24  ;;  %v11608_v44 = vrot.slane %v6062_v11, 2  ;;  %v8319_v49 = vpack.c.bf16 %v6175_v13, %v6174_v45  ;;  %v6021_v19 = vrot.slane %v6020_v47, 2  ;;  %v6073_v39 = vrot.slane %v11545_v37, 7  ;;  %v6167_v11 = vld [vmem:[%s11817_s12 + $0xf8] sm:$0xff] }
 0x86f   :  { %v8329_v62 = vpack.c.bf16 %v6197_v22, %v6196_v20  ;;  %v6047_v18 = vrot.slane %v6046_v59, 2  ;;  %v8301_v33 = vpack.c.bf16 %v6167_v11, %v6166_v12  ;;  %v8335_v57 = vpack.c.bf16 %v6183_v27, %v6182_v9  ;;  %v6379_v22 = vld [vmem:[%s11819_s14 + $0x48] sm:$0xff] }
 0x870   :  { %5987 = vrot.lane.b32.xlu0 %v11469_v7, %s8797_s11  ;;  %8320 = vmatpush3.bf16.msra.mxu1 %v8319_v49  ;;  %v6074_v60 = vrot.slane %v6073_v39, 2  ;;  %v8799_v45 = vmov 0.0|0.0  }
 0x871   :  { %8322 = vmatprep.subr.bf16.mxu1 %v8321_v24 }
 0x872   :  { %6016 = vrot.lane.b32.xlu1 %v11473_v3, %s8797_s11 }
 0x874   :  { %6085 = vrot.lane.b32.xlu0 %v11469_v7, %s8798_s0  ;;  %v6160_v7 = vld [vmem:[%s11817_s12 + $0xc0] sm:$0xff]  ;;  %8324 = vmatpush3.bf16.msra.mxu1 %v8323_v51 }
 0x875   :  { %v8289_v15 = vpack.c.bf16 %v6161_v35, %v6160_v7  ;;  %8326 = vmatprep.subr.bf16.mxu1 %v8325_v46  ;;  %v6372_v46 = vld [vmem:[%s11819_s14 + $0x10] sm:$0xff] }
 0x876   :  { %6099 = vrot.lane.b32.xlu1 %v11473_v3, %s8798_s0  ;;  %v6145_v3 = vld [vmem:[%s11817_s12 + $0x48] sm:$0xff] }
 0x877   :  { %v8291_v26 = vpack.c.bf16 %v6145_v3, %v6144_v28  ;;  %8290 = vmatprep.subr.bf16.mxu0 %v8289_v15 }
 0x878   :  { %5981 = vrot.lane.b32.xlu0 %v11493_v17, %s8798_s0  ;;  %8328 = vmatpush3.bf16.msra.mxu1 %v8327_v29  ;;  %v6373_v29 = vld [vmem:[%s11819_s14 + $0x18] sm:$0xff] }
 0x879   :  { %8292 = vmatpush3.bf16.msra.mxu0 %v8291_v26  ;;  %8330 = vmatprep.subr.bf16.mxu1 %v8329_v62 }
 0x87a   :  { %6011 = vrot.lane.b32.xlu1 %v11509_v61, %s8798_s0  ;;  %8294 = vmatprep.subr.bf16.mxu0 %v8293_v2 }
 0x87c   :  { %6042 = vrot.lane.b32.xlu0 %v11527_v21, %s8797_s11 }
 0x87d   :  { %8296 = vmatpush3.bf16.msra.mxu0 %v8295_v25 }
 0x87e   :  { %6069 = vrot.lane.b32.xlu1 %v11545_v37, %s8797_s11 }
 0x880   :  { %6113 = vrot.lane.b32.xlu0 %v11527_v21, %s8798_s0  ;;  %v6164_v21 = vld [vmem:[%s11817_s12 + $0xe0] sm:$0xff] }
 0x881   :  { %v8297_v58 = vpack.c.bf16 %v6165_v32, %v6164_v21  ;;  %v8341_v32 = vpack.c.bf16 %v6373_v29, %v6372_v46 }
 0x882   :  { %6127 = vrot.lane.b32.xlu1 %v11545_v37, %s8798_s0  ;;  %v6180_v37 = vld [vmem:[%s11817_s12 + $0x160] sm:$0xff] }
 0x883   :  { %v8331_v63 = vpack.c.bf16 %v6181_v16, %v6180_v37  ;;  %8298 = vmatprep.subr.bf16.mxu0 %v8297_v58  ;;  %v6376_v58 = vld [vmem:[%s11819_s14 + $0x30] sm:$0xff]  ;;  %v7075_v37 = vld [vmem:[%s11818_s13] ss:$0 sm:$0xff] }
 0x884   :  { %6037 = vrot.lane.b32.xlu0 %v11591_v0, %s8798_s0  ;;  %8300 = vmatpush3.bf16.msra.mxu0 %v8299_v56  ;;  %v8347_v20 = vpack.c.bf16 %v6377_v50, %v6376_v58 }
 0x885   :  { %8302 = vmatprep.subr.bf16.mxu0 %v8301_v33  ;;  %8332 = vmatpush3.bf16.msra.mxu1 %v8331_v63 }
 0x886   :  { %6064 = vrot.lane.b32.xlu1 %v11608_v44, %s8798_s0  ;;  %8334 = vmatprep.subr.bf16.mxu1 %v8333_v53 }
 0x888   :  { %5994 = vrot.lane.b32.xlu0 %v5993_v1, %s8796_s24  ;;  %8304 = vmatpush3.bf16.msra.mxu0 %v8303_v55 }
 0x889   :  { %8336 = vmatpush3.bf16.msra.mxu1 %v8335_v57  ;;  %8337 = vmatprep.subr.bf16.mxu0 %v8799_v45 }
 0x88a   :  { %6022 = vrot.lane.b32.xlu1 %v6021_v19, %s8796_s24 }
 0x88c   :  { %6089 = vrot.lane.b32.xlu0 %v5993_v1, %s8797_s11 }
 0x88e   :  { %6103 = vrot.lane.b32.xlu1 %v6021_v19, %s8797_s11 }
 0x890   :  { %6048 = vrot.lane.b32.xlu0 %v6047_v18, %s8796_s24 }
 0x892   :  { %6075 = vrot.lane.b32.xlu1 %v6074_v60, %s8796_s24 }
 0x894   :  { %6117 = vrot.lane.b32.xlu0 %v6047_v18, %s8797_s11 }
 0x896   :  { %6131 = vrot.lane.b32.xlu1 %v6074_v60, %s8797_s11 }
 0x8da   :  { %v6080_v13 = vpop.permute.xlu0 %6079 }
 0x8db   :  { %6082 = vst.msk [vmem:[#allocation2 + $0x1] sm:$0x1] %vm5969_vm7, %v6080_v13 }
 0x8dc   :  { %6084 = vst.msk [vmem:[#allocation2 + $0x1] sm:$0x1] %vm5984_vm8, %v11493_v17  ;;  %v6108_v47 = vpop.permute.xlu1 %6107 }
 0x8dd   :  { %6110 = vst.msk [vmem:[#allocation2 + $0x5] sm:$0x1] %vm5969_vm7, %v6108_v47 }
 0x8de   :  { %6112 = vst.msk [vmem:[#allocation2 + $0x5] sm:$0x1] %vm5984_vm8, %v11591_v0  ;;  %v6094_v49 = vpop.permute.xlu0 %6093 }
 0x8df   :  { %6096 = vst.msk [vmem:[#allocation2 + $0x3] sm:$0x1] %vm5969_vm7, %v6094_v49 }
 0x8e0   :  { %6098 = vst.msk [vmem:[#allocation2 + $0x3] sm:$0x1] %vm5984_vm8, %v11509_v61  ;;  %v6122_v7 = vpop.permute.xlu1 %6121 }
 0x8e1   :  { %6124 = vst.msk [vmem:[#allocation2 + $0x7] sm:$0x1] %vm5969_vm7, %v6122_v7 }
 0x8e2   :  { %6126 = vst.msk [vmem:[#allocation2 + $0x7] sm:$0x1] %vm5984_vm8, %v11608_v44  ;;  %v5988_v35 = vpop.permute.xlu0 %5987 }
 0x8e4   :  { %v6017_v17 = vpop.permute.xlu1 %6016 }
 0x8e6   :  { %v6086_v15 = vpop.permute.xlu0 %6085 }
 0x8e7   :  { %6088 = vst.msk [vmem:[#allocation2 + $0x1] sm:$0x1] %vm5990_vm9, %v6086_v15 }
 0x8e8   :  { %v6100_v28 = vpop.permute.xlu1 %6099 }
 0x8e9   :  { %6102 = vst.msk [vmem:[#allocation2 + $0x3] sm:$0x1] %vm5990_vm9, %v6100_v28 }
 0x8ea   :  { %v5982_v0 = vpop.permute.xlu0 %5981 }
 0x8eb   :  { %5985 = vst.msk [vmem:[#allocation2] sm:$0x1] %vm5984_vm8, %v5982_v0 }
 0x8ec   :  { %5991 = vst.msk [vmem:[#allocation2] sm:$0x1] %vm5990_vm9, %v5988_v35  ;;  %v6012_v61 = vpop.permute.xlu1 %6011 }
 0x8ed   :  { %6014 = vst.msk [vmem:[#allocation2 + $0x2] sm:$0x1] %vm5984_vm8, %v6012_v61 }
 0x8ee   :  { %6019 = vst.msk [vmem:[#allocation2 + $0x2] sm:$0x1] %vm5990_vm9, %v6017_v17  ;;  %v6043_v44 = vpop.permute.xlu0 %6042 }
 0x8f0   :  { %v6070_v3 = vpop.permute.xlu1 %6069 }
 0x8f2   :  { %v6114_v1 = vpop.permute.xlu0 %6113 }
 0x8f3   :  { %6116 = vst.msk [vmem:[#allocation2 + $0x5] sm:$0x1] %vm5990_vm9, %v6114_v1 }
 0x8f4   :  { %v6128_v26 = vpop.permute.xlu1 %6127 }
 0x8f5   :  { %6130 = vst.msk [vmem:[#allocation2 + $0x7] sm:$0x1] %vm5990_vm9, %v6128_v26 }
 0x8f6   :  { %v6038_v8 = vpop.permute.xlu0 %6037 }
 0x8f7   :  { %6040 = vst.msk [vmem:[#allocation2 + $0x4] sm:$0x1] %vm5984_vm8, %v6038_v8 }
 0x8f8   :  { %6045 = vst.msk [vmem:[#allocation2 + $0x4] sm:$0x1] %vm5990_vm9, %v6043_v44  ;;  %v6065_v6 = vpop.permute.xlu1 %6064 }
 0x8f9   :  { %6067 = vst.msk [vmem:[#allocation2 + $0x6] sm:$0x1] %vm5984_vm8, %v6065_v6 }
 0x8fa   :  { %6072 = vst.msk [vmem:[#allocation2 + $0x6] sm:$0x1] %vm5990_vm9, %v6070_v3  ;;  %v5995_v24 = vpop.permute.xlu0 %5994 }
 0x8fb   :  { %5998 = vst.msk [vmem:[#allocation2] sm:$0x1] %vm5997_vm10, %v5995_v24 }
 0x8fc   :  { %v6023_v4 = vpop.permute.xlu1 %6022 }
 0x8fd   :  { %6025 = vst.msk [vmem:[#allocation2 + $0x2] sm:$0x1] %vm5997_vm10, %v6023_v4 }
 0x8fe   :  { %v6090_v23 = vpop.permute.xlu0 %6089 }
 0x8ff   :  { %6092 = vst.msk [vmem:[#allocation2 + $0x1] sm:$0x1] %vm5997_vm10, %v6090_v23 }
 0x900   :  { %v6104_v19 = vpop.permute.xlu1 %6103 }
 0x901   :  { %6106 = vst.msk [vmem:[#allocation2 + $0x3] sm:$0x1] %vm5997_vm10, %v6104_v19 }
 0x902   :  { %v6049_v51 = vpop.permute.xlu0 %6048 }
 0x903   :  { %6051 = vst.msk [vmem:[#allocation2 + $0x4] sm:$0x1] %vm5997_vm10, %v6049_v51 }
 0x904   :  { %v6076_v48 = vpop.permute.xlu1 %6075 }
 0x905   :  { %6078 = vst.msk [vmem:[#allocation2 + $0x6] sm:$0x1] %vm5997_vm10, %v6076_v48 }
 0x906   :  { %v6118_v30 = vpop.permute.xlu0 %6117 }
 0x907   :  { %6120 = vst.msk [vmem:[#allocation2 + $0x5] sm:$0x1] %vm5997_vm10, %v6118_v30 }
 0x908   :  { %v6132_v2 = vpop.permute.xlu1 %6131 }
 0x909   :  { %6134 = vst.msk [vmem:[#allocation2 + $0x7] sm:$0x1] %vm5997_vm10, %v6132_v2 }
 0x910   :  { %v6135_v38 = vld [vmem:[#allocation2] sm:$0xff] }
 0x911   :  { %v6215_v59 = vrot.slane %v6135_v38, %v11448_v40  ;;  %v6208_v25 = vcombine.high %v6135_v38, %v6135_v38 }
 0x913   :  { %v6223_v10 = vcombine.high %v6215_v59, %v6215_v59  ;;  %v6222_v43 = vrot.slane %v6208_v25, %v11448_v40  ;;  %v6374_v40 = vld [vmem:[%s11819_s14 + $0x20] sm:$0xff] }
 0x914   :  { %v8344_v39 = vpack.c.bf16 %v6375_v36, %v6374_v40 }
 0x915   :  { %6293 = vmatprep.mubr.f32.mxu0 %v6223_v10  ;;  %v6224_v21 = vcombine.high %v6222_v43, %v6222_v43 }
 0x916   :  { %6294 = vmatmul.mubr.f32.vlgmr.msra.gmra.mrb[164].mxu0 %v6215_v59 }
 0x917   :  { %6363 = vmatprep.mubr.f32.mxu1 %v6224_v21  ;;  %8339 = vmatpush3.bf16.msra.mxu0 %v8338_v41 }
 0x918   :  { %6364 = vmatmul.mubr.f32.vlgmr.msra.gmra.mrb[172].mxu1 %v6222_v43  ;;  %8340 = vmatprep.subr.bf16.mxu0 %v8799_v45 }
 0x919   :  { %8270 = vmatprep.mubr.msk.f32.mxu0 %vm8794_vm2, %v8793_v42  ;;  %v6378_v42 = vld [vmem:[%s11819_s14 + $0x40] sm:$0xff] }
 0x91a   :  { %v8350_v56 = vpack.c.bf16 %v6379_v22, %v6378_v42 }
 0x91b   :  { %8342 = vmatpush3.bf16.msra.mxu0 %v8341_v32 }
 0x91c   :  { %8343 = vmatprep.subr.bf16.mxu0 %v8799_v45 }
 0x91f   :  { %8345 = vmatpush3.bf16.msra.mxu0 %v8344_v39 }
 0x920   :  { %8346 = vmatprep.subr.bf16.mxu0 %v8799_v45 }
 0x923   :  { %8348 = vmatpush3.bf16.msra.mxu0 %v8347_v20 }
 0x924   :  { %8349 = vmatprep.subr.bf16.mxu0 %v8799_v45 }
 0x927   :  { %8351 = vmatpush3.bf16.msra.mxu0 %v8350_v56 }
 0x9e9   :  { %v7765_v62 = vpop.f32.mrb[164].mxu0 }
 0x9ea   :  { %v7766_v16 = vpop.f32.mrb[165].mxu0 }
 0x9eb   :  { %v7767_v12 = vadd.f32 %v7766_v16, %v7765_v62  ;;  %v7800_v18 = vpop.f32.mrb[172].mxu1 }
 0x9ec   :  { %v7801_v63 = vpop.f32.mrb[173].mxu1 }
 0x9ed   :  { %v6296_v11 = vadd.f32 %v7767_v12, %v7075_v37  ;;  %v7802_v34 = vadd.f32 %v7801_v63, %v7800_v18 }
 0x9ef   :  { %v6366_v5 = vadd.f32 %v7802_v34, %v6296_v11 }
 0x9f1   :  { %v6369_v33 = vmax.f32 %v6366_v5, 0.0 }
 0x9f3   :  { %8271 = vmatmul.mubr.msk.f32.vlgmr.msra.gmra.mrb[166].mxu0 %vm6387_vm11, %v6369_v33 }
 0xac6   :  { %v6457_v54 = vpop.f32.mrb[166].mxu0 }
 0xac7   :  { %v6458_v60 = vadd.f32 %v7076_v52, %v6457_v54  ;;  %v8272_v55 = vpop.f32.mrb[167].mxu0 }
 0xac9   :  { %v6462_v53 = vsel %vm6461_vm12, %v6458_v60, -inf }
 0xaca   :  { %6463 = vmax.xlane.f32.xlu0 %v6462_v53 }
 0xb57   :  { %v6464_v9 = vpop.xlane.xlu0 %6463 }
 0xb58   :  { %v6465_v27 = vsub.f32 %v6458_v60, %v6464_v9 }
 0xb5a   :  { %v6466_v57 = vmul.f32 1.442695, %v6465_v27 }
 0xb5c   :  { %8713 = vpow2.f32 %v6466_v57 }
 0xb66   :  { %v8714_v45 = vpop.eup %8713 }
 0xb67   :  { %v6468_v13 = vsel %vm6461_vm12, %v8714_v45, 0.0 }
 0xb68   :  { %6469 = vadd.xlane.f32.xlu1 %v6468_v13 }
 0xbf5   :  { %v6470_v47 = vpop.xlane.xlu1 %6469 }
 0xbf6   :  { %8715 = vrcp.f32 %v6470_v47 }
 0xc00   :  { %v8716_v49 = vpop.eup %8715 }
 0xc01   :  { %v6472_v7 = vmul.f32 %v8716_v49, %v8714_v45 }
 0xc03   :  { %6473 = vst.msk [vmem:[%s11821_s16] sm:$0x3] %vm6461_vm12, %v6472_v7 }
 0xc04   :  { %6475 = vst.msk [vmem:[%s11821_s16] sm:$0x3] %vm6474_vm13, %v6458_v60 }
 0xc05   :  { %6480 = vsyncpa [#allocation4], 1 }
 0xc06   :  { %6481 = vsyncpa [#allocation6], 1 }

</bundles_post_ra>
